<compile_context>
chip_gen: v5e
topology: v5e:2x2
jax: 0.10.0
libtpu: 0.0.40
codegen_flags: <defaults>
</compile_context>

<pallas_src>
import jax
import jax.numpy as jnp
from jax.experimental import pallas as pl
from jax.experimental.pallas import tpu as pltpu

INPUT_SIZE = 3072
HIDDEN_SIZE = 500
HIDDEN_SIZE2 = 200
NUM_CLASSES = 10

# Lane-aligned padded sizes (multiples of 128).
H1P = 512       # 500 -> 512
H2P = 256       # 200 -> 256
OUTP = 128      # 10  -> 128 (lane-dense output slab, sliced outside)

MAX_BATCH_TILE = 256   # batch-block size once B is large (MXU M-dim = 256)


def mlp_kernel(x_ref, w1_ref, b1_ref, w2_ref, b2_ref, w3_ref, b3_ref, o_ref):
    # Layer 1: (BT, 3072) @ (3072, 512) + b1, ReLU.  Single step, f32 accum.
    h1 = jnp.dot(x_ref[...], w1_ref[...], preferred_element_type=jnp.float32)
    h1 = jnp.maximum(h1 + b1_ref[...], 0.0)
    # Layer 2: (BT, 512) @ (512, 256) + b2, ReLU.
    h2 = jnp.dot(h1.astype(jnp.bfloat16), w2_ref[...],
                 preferred_element_type=jnp.float32)
    h2 = jnp.maximum(h2 + b2_ref[...], 0.0)
    # Layer 3: (BT, 256) @ (256, 128) + b3.
    h3 = jnp.dot(h2.astype(jnp.bfloat16), w3_ref[...],
                 preferred_element_type=jnp.float32)
    o_ref[...] = (h3 + b3_ref[...]).astype(o_ref.dtype)


def mlp_forward(x, w1, b1, w2, b2, w3, b3):
    B = x.shape[0]
    # Batch tile: full (sublane-rounded) batch when small, 256 when large.
    if B >= MAX_BATCH_TILE:
        bt = MAX_BATCH_TILE
    else:
        bt = ((B + 7) // 8) * 8            # round up to sublane multiple
    Bp = ((B + bt - 1) // bt) * bt         # pad rows so grid divides evenly
    if Bp != B:
        x = jnp.pad(x, ((0, Bp - B), (0, 0)))
    n_b = Bp // bt

    out_padded = pl.pallas_call(
        mlp_kernel,
        out_shape=jax.ShapeDtypeStruct((Bp, OUTP), jnp.float32),
        grid_spec=pltpu.PrefetchScalarGridSpec(
            num_scalar_prefetch=0,
            grid=(n_b,),
            in_specs=[
                pl.BlockSpec((bt, INPUT_SIZE), lambda b: (b, 0)),  # x block (streamed)
                pl.BlockSpec((INPUT_SIZE, H1P), lambda b: (0, 0)), # W1 (resident)
                pl.BlockSpec((1, H1P), lambda b: (0, 0)),          # b1 (resident)
                pl.BlockSpec((H1P, H2P), lambda b: (0, 0)),        # W2 (resident)
                pl.BlockSpec((1, H2P), lambda b: (0, 0)),          # b2 (resident)
                pl.BlockSpec((H2P, OUTP), lambda b: (0, 0)),       # W3 (resident)
                pl.BlockSpec((1, OUTP), lambda b: (0, 0)),         # b3 (resident)
            ],
            out_specs=pl.BlockSpec((bt, OUTP), lambda b: (b, 0)),
        ),
        compiler_params=pltpu.CompilerParams(
            # Batch blocks are independent -> shard across TensorCores (v7x).
            dimension_semantics=("parallel",),
            # Footprint: W1 bf16 3 MiB (x2 bufs) + W2/W3/biases < 0.5 MiB
            # + x/out blocks (~2 MiB at bt=256, double-buffered) < 10 MiB.
            # 16 MiB stays inside v5e's scoped limit and v7x's 64 MiB VMEM.
            vmem_limit_bytes=16 << 20,
        ),
    )(x, w1, b1, w2, b2, w3, b3)
    return out_padded[:B, :NUM_CLASSES]


def init_linear(key, in_features, out_features, in_pad, out_pad):
    # PyTorch nn.Linear default init: U(-1/sqrt(fan_in), 1/sqrt(fan_in)).
    kw, kb = jax.random.split(key)
    bound = 1.0 / (in_features ** 0.5)
    w = jax.random.uniform(kw, (in_features, out_features), jnp.float32,
                           minval=-bound, maxval=bound)
    b = jax.random.uniform(kb, (1, out_features), jnp.float32,
                           minval=-bound, maxval=bound)
    # Zero-pad to lane-aligned shapes; pad region is numerically inert.
    w = jnp.pad(w, ((0, in_pad - in_features), (0, out_pad - out_features)))
    b = jnp.pad(b, ((0, 0), (0, out_pad - out_features)))
    return w.astype(jnp.bfloat16), b  # weights bf16, biases f32


if __name__ == "__main__":
    key = jax.random.PRNGKey(0)
    kx, k1, k2, k3 = jax.random.split(key, 4)

    B = 8
    x = jax.random.normal(kx, (B, INPUT_SIZE), jnp.float32).astype(jnp.bfloat16)

    w1, b1 = init_linear(k1, INPUT_SIZE, HIDDEN_SIZE, INPUT_SIZE, H1P)
    w2, b2 = init_linear(k2, HIDDEN_SIZE, HIDDEN_SIZE2, H1P, H2P)
    w3, b3 = init_linear(k3, HIDDEN_SIZE2, NUM_CLASSES, H2P, OUTP)

    out = jax.block_until_ready(mlp_forward(x, w1, b1, w2, b2, w3, b3))

    # Plain-JAX reference mirroring the kernel math (bf16 inputs, f32 accum).
    h1 = jnp.maximum(jnp.dot(x, w1, preferred_element_type=jnp.float32) + b1, 0.0)
    h2 = jnp.maximum(jnp.dot(h1.astype(jnp.bfloat16), w2,
                             preferred_element_type=jnp.float32) + b2, 0.0)
    ref = (jnp.dot(h2.astype(jnp.bfloat16), w3,
                   preferred_element_type=jnp.float32) + b3)[:, :NUM_CLASSES]

    assert out.shape == (B, NUM_CLASSES)
    assert jnp.allclose(out, ref, atol=2e-3, rtol=2e-3)

    print("KERNEL_OK")
</pallas_src>

<mosaic_0001>
module attributes {stable_mosaic.version = 11 : i64} {
  func.func @mlp_kernel(%arg0: i32, %arg1: memref<8x3072xbf16, #tpu.memory_space<vmem>>, %arg2: memref<3072x512xbf16, #tpu.memory_space<vmem>>, %arg3: memref<1x512xf32, #tpu.memory_space<vmem>>, %arg4: memref<512x256xbf16, #tpu.memory_space<vmem>>, %arg5: memref<1x256xf32, #tpu.memory_space<vmem>>, %arg6: memref<256x128xbf16, #tpu.memory_space<vmem>>, %arg7: memref<1x128xf32, #tpu.memory_space<vmem>>, %arg8: memref<8x128xf32, #tpu.memory_space<vmem>>) attributes {dimension_semantics = [#tpu.dimension_semantics<parallel>], iteration_bounds = array<i64: 1>, scalar_prefetch = 0 : i64, scratch_operands = 0 : i64, tpu.core_type = #tpu.core_type<tc>, window_params = [{transform_indices = @transform_0, window_bounds = array<i64: 8, 3072>}, {pipeline_mode = #tpu.pipeline_mode<synchronous>, transform_indices = @transform_1, window_bounds = array<i64: 3072, 512>}, {pipeline_mode = #tpu.pipeline_mode<synchronous>, transform_indices = @transform_2, window_bounds = array<i64: 1, 512>}, {pipeline_mode = #tpu.pipeline_mode<synchronous>, transform_indices = @transform_3, window_bounds = array<i64: 512, 256>}, {pipeline_mode = #tpu.pipeline_mode<synchronous>, transform_indices = @transform_4, window_bounds = array<i64: 1, 256>}, {pipeline_mode = #tpu.pipeline_mode<synchronous>, transform_indices = @transform_5, window_bounds = array<i64: 256, 128>}, {pipeline_mode = #tpu.pipeline_mode<synchronous>, transform_indices = @transform_6, window_bounds = array<i64: 1, 128>}, {transform_indices = @transform_7, window_bounds = array<i64: 8, 128>}]} {
    %c0 = arith.constant 0 : index
    %c0_0 = arith.constant 0 : index
    %0 = vector.load %arg1[%c0, %c0_0] : memref<8x3072xbf16, #tpu.memory_space<vmem>>, vector<8x3072xbf16>
    %c0_1 = arith.constant 0 : index
    %c0_2 = arith.constant 0 : index
    %1 = vector.load %arg2[%c0_1, %c0_2] : memref<3072x512xbf16, #tpu.memory_space<vmem>>, vector<3072x512xbf16>
    %cst = arith.constant dense<0.000000e+00> : vector<8x512xf32>
    %2 = tpu.matmul %0, %1, %cst {dimension_numbers = #tpu.dot_dimension_numbers<[1], [0], [0], [1], [0, 0, 1, 1], [], []>} : vector<8x3072xbf16>, vector<3072x512xbf16>, vector<8x512xf32> -> vector<8x512xf32>
    %c0_3 = arith.constant 0 : index
    %c0_4 = arith.constant 0 : index
    %3 = vector.load %arg3[%c0_3, %c0_4] : memref<1x512xf32, #tpu.memory_space<vmem>>, vector<1x512xf32>
    %4 = vector.broadcast %3 : vector<1x512xf32> to vector<8x512xf32>
    %5 = arith.addf %2, %4 : vector<8x512xf32>
    %cst_5 = arith.constant 0.000000e+00 : f32
    %6 = vector.broadcast %cst_5 : f32 to vector<8x512xf32>
    %7 = arith.maximumf %5, %6 : vector<8x512xf32>
    %8 = arith.truncf %7 : vector<8x512xf32> to vector<8x512xbf16>
    %c0_6 = arith.constant 0 : index
    %c0_7 = arith.constant 0 : index
    %9 = vector.load %arg4[%c0_6, %c0_7] : memref<512x256xbf16, #tpu.memory_space<vmem>>, vector<512x256xbf16>
    %cst_8 = arith.constant dense<0.000000e+00> : vector<8x256xf32>
    %10 = tpu.matmul %8, %9, %cst_8 {dimension_numbers = #tpu.dot_dimension_numbers<[1], [0], [0], [1], [0, 0, 1, 1], [], []>} : vector<8x512xbf16>, vector<512x256xbf16>, vector<8x256xf32> -> vector<8x256xf32>
    %c0_9 = arith.constant 0 : index
    %c0_10 = arith.constant 0 : index
    %11 = vector.load %arg5[%c0_9, %c0_10] : memref<1x256xf32, #tpu.memory_space<vmem>>, vector<1x256xf32>
    %12 = vector.broadcast %11 : vector<1x256xf32> to vector<8x256xf32>
    %13 = arith.addf %10, %12 : vector<8x256xf32>
    %cst_11 = arith.constant 0.000000e+00 : f32
    %14 = vector.broadcast %cst_11 : f32 to vector<8x256xf32>
    %15 = arith.maximumf %13, %14 : vector<8x256xf32>
    %16 = arith.truncf %15 : vector<8x256xf32> to vector<8x256xbf16>
    %c0_12 = arith.constant 0 : index
    %c0_13 = arith.constant 0 : index
    %17 = vector.load %arg6[%c0_12, %c0_13] : memref<256x128xbf16, #tpu.memory_space<vmem>>, vector<256x128xbf16>
    %cst_14 = arith.constant dense<0.000000e+00> : vector<8x128xf32>
    %18 = tpu.matmul %16, %17, %cst_14 {dimension_numbers = #tpu.dot_dimension_numbers<[1], [0], [0], [1], [0, 0, 1, 1], [], []>} : vector<8x256xbf16>, vector<256x128xbf16>, vector<8x128xf32> -> vector<8x128xf32>
    %c0_15 = arith.constant 0 : index
    %c0_16 = arith.constant 0 : index
    %19 = vector.load %arg7[%c0_15, %c0_16] : memref<1x128xf32, #tpu.memory_space<vmem>>, vector<1x128xf32>
    %20 = vector.broadcast %19 : vector<1x128xf32> to vector<8x128xf32>
    %21 = arith.addf %18, %20 : vector<8x128xf32>
    %c0_17 = arith.constant 0 : index
    %c0_18 = arith.constant 0 : index
    %22 = vector.load %arg8[%c0_17, %c0_18] : memref<8x128xf32, #tpu.memory_space<vmem>>, vector<8x128xf32>
    tpu.vector_store %arg8[%c0_17, %c0_18], %21 {strides = array<i32>} : memref<8x128xf32, #tpu.memory_space<vmem>>, vector<8x128xf32>,
    return
  }
  func.func @transform_0(%arg0: i32) -> (i32, i32) {
    %c0_i32 = arith.constant 0 : i32
    %c0_i32_0 = arith.constant 0 : i32
    return %arg0, %c0_i32 : i32, i32
  }
  func.func @transform_1(%arg0: i32) -> (i32, i32) {
    %c0_i32 = arith.constant 0 : i32
    %c0_i32_0 = arith.constant 0 : i32
    %c0_i32_1 = arith.constant 0 : i32
    return %c0_i32, %c0_i32_0 : i32, i32
  }
  func.func @transform_2(%arg0: i32) -> (i32, i32) {
    %c0_i32 = arith.constant 0 : i32
    %c0_i32_0 = arith.constant 0 : i32
    %c0_i32_1 = arith.constant 0 : i32
    return %c0_i32, %c0_i32_0 : i32, i32
  }
  func.func @transform_3(%arg0: i32) -> (i32, i32) {
    %c0_i32 = arith.constant 0 : i32
    %c0_i32_0 = arith.constant 0 : i32
    %c0_i32_1 = arith.constant 0 : i32
    return %c0_i32, %c0_i32_0 : i32, i32
  }
  func.func @transform_4(%arg0: i32) -> (i32, i32) {
    %c0_i32 = arith.constant 0 : i32
    %c0_i32_0 = arith.constant 0 : i32
    %c0_i32_1 = arith.constant 0 : i32
    return %c0_i32, %c0_i32_0 : i32, i32
  }
  func.func @transform_5(%arg0: i32) -> (i32, i32) {
    %c0_i32 = arith.constant 0 : i32
    %c0_i32_0 = arith.constant 0 : i32
    %c0_i32_1 = arith.constant 0 : i32
    return %c0_i32, %c0_i32_0 : i32, i32
  }
  func.func @transform_6(%arg0: i32) -> (i32, i32) {
    %c0_i32 = arith.constant 0 : i32
    %c0_i32_0 = arith.constant 0 : i32
    %c0_i32_1 = arith.constant 0 : i32
    return %c0_i32, %c0_i32_0 : i32, i32
  }
  func.func @transform_7(%arg0: i32) -> (i32, i32) {
    %c0_i32 = arith.constant 0 : i32
    %c0_i32_0 = arith.constant 0 : i32
    return %arg0, %c0_i32 : i32, i32
  }
}

</mosaic_0001>

<bundles_post_ra>
// kernel: tpu_custom_call.1
= control target key start
LH: loop header
LB: loop body
LE: loop exit
PB: predicated region body
PF: predicated region fallthrough
CT: control target
= control target key end

     0   :  { %12 = vsyncpa [#allocation3], 0  ;;  %s11532_s0 = inlined_call_operand.hbm [shape: bf16[8,3072], index: 0, kind: input, shape index: {}]   ;;  %s11533_s1 = inlined_call_operand.hbm [shape: bf16[3072,512], index: 1, kind: input, shape index: {}]   ;;  %s11534_s2 = inlined_call_operand.hbm [shape: f32[1,512], index: 2, kind: input, shape index: {}]   ;;  %s11535_s3 = inlined_call_operand.hbm [shape: bf16[512,256], index: 3, kind: input, shape index: {}]   ;;  %s11536_s4 = inlined_call_operand.hbm [shape: f32[1,256], index: 4, kind: input, shape index: {}]   ;;  %s11537_s5 = inlined_call_operand.hbm [shape: bf16[256,128], index: 5, kind: input, shape index: {}]   ;;  %s11538_s6 = inlined_call_operand.hbm [shape: f32[1,128], index: 6, kind: input, shape index: {}]   ;;  %s11539_s7 = inlined_call_operand.hbm [shape: f32[8,128], index: 7, kind: output, shape index: {}]  }
   0x1   :  { %13 = vsyncpa [#allocation6], 0 }
   0x2   :  { %14 = vsyncpa [#allocation9], 0 }
   0x3   :  { %15 = vsyncpa [#allocation12], 0  ;;  %s32_s26 = sshll.u32 %s11533_s1, 4  ;;  %s33_s26 = int_to_ptr.hbm [resolvable:$true] %s32_s26 }
   0x4   :  { %16 = vsyncpa [#allocation4], 0  ;;  %s11235_s27 = smov [#allocation5]   ;;  %s56_s8 = sshll.u32 %s11535_s3, 4  ;;  %s57_s8 = int_to_ptr.hbm [resolvable:$true] %s56_s8 }
   0x5   :  { %s34_s28 = sshll.u32 %s11235_s27, 4  ;;  %s11236_s9 = smov 256   ;;  %s35_s28 = int_to_ptr.vmem [resolvable:$true] %s34_s28 }
   0x6   :  { %s11237_s10 = smov 16   ;;  %s11238_s11 = smov [#allocation8]  }
   0x7   :  { %40 = dma.hbm_to_vmem [thread:$0]  %s33_s26, 98304, %s35_s28, [#allocation6], %s11236_s9, %s11236_s9, %s11237_s10  }
   0x8   :  { %s58_s12 = sshll.u32 %s11238_s11, 4  ;;  %s11239_s13 = smov 128   ;;  %s59_s12 = int_to_ptr.vmem [resolvable:$true] %s58_s12 }
   0x9   :  { %s11240_s14 = smov 8   ;;  %s80_s16 = sshll.u32 %s11537_s5, 4  ;;  %s81_s16 = int_to_ptr.hbm [resolvable:$true] %s80_s16 }
   0xa   :  { %64 = dma.hbm_to_vmem [thread:$0]  %s57_s8, 8192, %s59_s12, [#allocation9], %s11239_s13, %s11239_s13, %s11240_s14  }
   0xb   :  { %s11241_s17 = smov [#allocation11]   ;;  %s22_s20 = sshll.u32 %s11532_s0, 4  ;;  %s23_s20 = int_to_ptr.hbm [resolvable:$true] %s22_s20 }
   0xc   :  { %s82_s18 = sshll.u32 %s11241_s17, 4  ;;  %s11242_s21 = smov 64   ;;  %s83_s18 = int_to_ptr.vmem [resolvable:$true] %s82_s18 }
   0xd   :  { %s11243_s22 = smov 4   ;;  %s11244_s23 = smov [#allocation2]  }
   0xe   :  { %88 = dma.hbm_to_vmem [thread:$0]  %s81_s16, 2048, %s83_s18, [#allocation12], %s11242_s21, %s11242_s21, %s11243_s22  }
   0xf   :  { %s24_s24 = sshll.u32 %s11244_s23, 4  ;;  %s46_s27 = sshll.u32 %s11534_s2, 4  ;;  %s25_s24 = int_to_ptr.vmem [resolvable:$true] %s24_s24  ;;  %s47_s27 = int_to_ptr.hbm [resolvable:$true] %s46_s27 }
  0x10   :  { %27 = dma.hbm_to_vmem [thread:$0]  %s23_s20, 1536, %s25_s24, [#allocation3]  }
  0x11   :  { %s70_s29 = sshll.u32 %s11536_s4, 4  ;;  %s11245_s30 = smov [#allocation7]   ;;  %s71_s29 = int_to_ptr.hbm [resolvable:$true] %s70_s29 }
  0x12   :  { %s48_s8 = sshll.u32 %s11245_s30, 4  ;;  %s11246_s0 = smov [#allocation10]   ;;  %s49_s8 = int_to_ptr.vmem [resolvable:$true] %s48_s8 }
  0x13   :  { %51 = dma.hbm_to_vmem [thread:$0]  %s47_s27, 64, %s49_s8, [#allocation6]  }
  0x14   :  { %s72_s9 = sshll.u32 %s11246_s0, 4  ;;  %s94_s12 = sshll.u32 %s11538_s6, 4  ;;  %s73_s9 = int_to_ptr.vmem [resolvable:$true] %s72_s9  ;;  %s95_s12 = int_to_ptr.hbm [resolvable:$true] %s94_s12 }
  0x15   :  { %75 = dma.hbm_to_vmem [thread:$0]  %s71_s29, 32, %s73_s9, [#allocation9]  }
  0x16   :  { %s11247_s2 = smov [#allocation13]  }
  0x17   :  { %s96_s13 = sshll.u32 %s11247_s2, 4  ;;  %s97_s13 = int_to_ptr.vmem [resolvable:$true] %s96_s13 }
  0x18   :  { %99 = dma.hbm_to_vmem [thread:$0]  %s95_s12, 16, %s97_s13, [#allocation12]  }
  0x19   :  { %11225 = dma.done.wait [#allocation3], 1536  }
  0x1a   :  { %11226 = vsyncadd [#allocation3], 4294965760 }
  0x1b   :  { %11227 = dma.done.wait [#allocation6], 98368  }
  0x1c   :  { %11228 = vsyncadd [#allocation6], 4294868928 }
  0x1d   :  { %11229 = dma.done.wait [#allocation9], 8224  }
  0x1e   :  { %11230 = vsyncadd [#allocation9], 4294959072 }
  0x1f   :  { %11231 = dma.done.wait [#allocation12], 2064  }
  0x20   :  { %11232 = vsyncadd [#allocation12], 4294965232  ;;  %v6889_v0 = vld [vmem:[#allocation5 + $0xe0] sm:$0xf]  ;;  %v10197_v1 = vld [vmem:[#allocation5 + $0xec] sm:$0xf0] }
  0x21   :  { %v7017_v2 = vld [vmem:[#allocation5 + $0x1e0] sm:$0xf]  ;;  %v6890_v3 = vor.u32 %v10197_v1, %v6889_v0  ;;  %v10229_v4 = vld [vmem:[#allocation5 + $0x1ec] sm:$0xf0]  ;;  %s11248_s4 = smov [#allocation14]   ;;  %s6762_s15 = sshll.u32 %s11539_s7, 4  ;;  %s6763_s15 = int_to_ptr.hbm [resolvable:$true] %s6762_s15 }
  0x22   :  { %v7145_v5 = vld [vmem:[#allocation5 + $0x2e0] sm:$0xf]  ;;  %v10261_v6 = vld [vmem:[#allocation5 + $0x2ec] sm:$0xf0]  ;;  %v7018_v7 = vor.u32 %v10229_v4, %v7017_v2  ;;  %s6760_s6 = sshll.u32 %s11248_s4, 4  ;;  %s6761_s6 = int_to_ptr.vmem [resolvable:$true] %s6760_s6 }
  0x23   :  { %v7146_v8 = vor.u32 %v10261_v6, %v7145_v5  ;;  %v7273_v9 = vld [vmem:[#allocation5 + $0x3e0] sm:$0xf]  ;;  %v10293_v10 = vld [vmem:[#allocation5 + $0x3ec] sm:$0xf0]  ;;  %4842 = vmatpush.bf16.msra.mxu0 %v6890_v3 }
  0x24   :  { %v6873_v11 = vld [vmem:[#allocation5 + $0xc0] sm:$0xf]  ;;  %v7274_v12 = vor.u32 %v10293_v10, %v7273_v9  ;;  %v10193_v13 = vld [vmem:[#allocation5 + $0xcc] sm:$0xf0]  ;;  %4855 = vmatpush.bf16.msra.mxu1 %v7018_v7 }
  0x25   :  { %v7001_v14 = vld [vmem:[#allocation5 + $0x1c0] sm:$0xf]  ;;  %v10225_v15 = vld [vmem:[#allocation5 + $0x1cc] sm:$0xf0]  ;;  %4868 = vmatpush.bf16.msra.mxu2 %v7146_v8  ;;  %v6874_v16 = vor.u32 %v10193_v13, %v6873_v11 }
  0x26   :  { %v7002_v17 = vor.u32 %v10225_v15, %v7001_v14  ;;  %v7129_v18 = vld [vmem:[#allocation5 + $0x2c0] sm:$0xf]  ;;  %v10257_v19 = vld [vmem:[#allocation5 + $0x2cc] sm:$0xf0]  ;;  %4881 = vmatpush.bf16.msra.mxu3 %v7274_v12 }
  0x27   :  { %v7257_v20 = vld [vmem:[#allocation5 + $0x3c0] sm:$0xf]  ;;  %v7130_v21 = vor.u32 %v10257_v19, %v7129_v18  ;;  %v10289_v22 = vld [vmem:[#allocation5 + $0x3cc] sm:$0xf0]  ;;  %4843 = vmatpush.bf16.msra.mxu0 %v6874_v16 }
  0x28   :  { %v6857_v23 = vld [vmem:[#allocation5 + $0xa0] sm:$0xf]  ;;  %v10189_v24 = vld [vmem:[#allocation5 + $0xac] sm:$0xf0]  ;;  %v7258_v25 = vor.u32 %v10289_v22, %v7257_v20  ;;  %4856 = vmatpush.bf16.msra.mxu1 %v7002_v17 }
  0x29   :  { %v6985_v26 = vld [vmem:[#allocation5 + $0x1a0] sm:$0xf]  ;;  %v10221_v27 = vld [vmem:[#allocation5 + $0x1ac] sm:$0xf0]  ;;  %v6858_v29 = vor.u32 %v10189_v24, %v6857_v23  ;;  %4869 = vmatpush.bf16.msra.mxu2 %v7130_v21 }
  0x2a   :  { %v7113_v28 = vld [vmem:[#allocation5 + $0x2a0] sm:$0xf]  ;;  %v10253_v30 = vld [vmem:[#allocation5 + $0x2ac] sm:$0xf0]  ;;  %v6986_v33 = vor.u32 %v10221_v27, %v6985_v26  ;;  %4882 = vmatpush.bf16.msra.mxu3 %v7258_v25 }
  0x2b   :  { %v7241_v31 = vld [vmem:[#allocation5 + $0x3a0] sm:$0xf]  ;;  %v10285_v32 = vld [vmem:[#allocation5 + $0x3ac] sm:$0xf0]  ;;  %v7114_v34 = vor.u32 %v10253_v30, %v7113_v28  ;;  %4844 = vmatpush.bf16.msra.mxu0 %v6858_v29 }
  0x2c   :  { %v6841_v35 = vld [vmem:[#allocation5 + $0x80] sm:$0xf]  ;;  %v10185_v36 = vld [vmem:[#allocation5 + $0x8c] sm:$0xf0]  ;;  %v7242_v38 = vor.u32 %v10285_v32, %v7241_v31  ;;  %4857 = vmatpush.bf16.msra.mxu1 %v6986_v33 }
  0x2d   :  { %v6969_v37 = vld [vmem:[#allocation5 + $0x180] sm:$0xf]  ;;  %v10217_v39 = vld [vmem:[#allocation5 + $0x18c] sm:$0xf0]  ;;  %v6842_v44 = vor.u32 %v10185_v36, %v6841_v35  ;;  %4870 = vmatpush.bf16.msra.mxu2 %v7114_v34 }
  0x2e   :  { %v7097_v40 = vld [vmem:[#allocation5 + $0x280] sm:$0xf]  ;;  %v10249_v41 = vld [vmem:[#allocation5 + $0x28c] sm:$0xf0]  ;;  %v6970_v45 = vor.u32 %v10217_v39, %v6969_v37  ;;  %4883 = vmatpush.bf16.msra.mxu3 %v7242_v38 }
  0x2f   :  { %v7225_v42 = vld [vmem:[#allocation5 + $0x380] sm:$0xf]  ;;  %v10281_v43 = vld [vmem:[#allocation5 + $0x38c] sm:$0xf0]  ;;  %v7098_v46 = vor.u32 %v10249_v41, %v7097_v40  ;;  %4845 = vmatpush.bf16.msra.mxu0 %v6842_v44 }
  0x30   :  { %v6825_v47 = vld [vmem:[#allocation5 + $0x60] sm:$0xf]  ;;  %v10181_v48 = vld [vmem:[#allocation5 + $0x6c] sm:$0xf0]  ;;  %v7226_v50 = vor.u32 %v10281_v43, %v7225_v42  ;;  %4858 = vmatpush.bf16.msra.mxu1 %v6970_v45 }
  0x31   :  { %v6953_v49 = vld [vmem:[#allocation5 + $0x160] sm:$0xf]  ;;  %v10213_v51 = vld [vmem:[#allocation5 + $0x16c] sm:$0xf0]  ;;  %v6826_v56 = vor.u32 %v10181_v48, %v6825_v47  ;;  %4871 = vmatpush.bf16.msra.mxu2 %v7098_v46 }
  0x32   :  { %v7081_v52 = vld [vmem:[#allocation5 + $0x260] sm:$0xf]  ;;  %v10245_v53 = vld [vmem:[#allocation5 + $0x26c] sm:$0xf0]  ;;  %v6954_v57 = vor.u32 %v10213_v51, %v6953_v49  ;;  %4884 = vmatpush.bf16.msra.mxu3 %v7226_v50 }
  0x33   :  { %v7209_v54 = vld [vmem:[#allocation5 + $0x360] sm:$0xf]  ;;  %v10277_v55 = vld [vmem:[#allocation5 + $0x36c] sm:$0xf0]  ;;  %v7082_v58 = vor.u32 %v10245_v53, %v7081_v52  ;;  %4846 = vmatpush.bf16.msra.mxu0 %v6826_v56 }
  0x34   :  { %v6809_v59 = vld [vmem:[#allocation5 + $0x40] sm:$0xf]  ;;  %v10177_v60 = vld [vmem:[#allocation5 + $0x4c] sm:$0xf0]  ;;  %v7210_v62 = vor.u32 %v10277_v55, %v7209_v54  ;;  %4859 = vmatpush.bf16.msra.mxu1 %v6954_v57 }
  0x35   :  { %v6937_v61 = vld [vmem:[#allocation5 + $0x140] sm:$0xf]  ;;  %v10209_v63 = vld [vmem:[#allocation5 + $0x14c] sm:$0xf0]  ;;  %v6810_v4 = vor.u32 %v10177_v60, %v6809_v59  ;;  %4872 = vmatpush.bf16.msra.mxu2 %v7082_v58 }
  0x36   :  { %v7065_v0 = vld [vmem:[#allocation5 + $0x240] sm:$0xf]  ;;  %v10241_v1 = vld [vmem:[#allocation5 + $0x24c] sm:$0xf0]  ;;  %v6938_v5 = vor.u32 %v10209_v63, %v6937_v61  ;;  %4885 = vmatpush.bf16.msra.mxu3 %v7210_v62 }
  0x37   :  { %v7193_v2 = vld [vmem:[#allocation5 + $0x340] sm:$0xf]  ;;  %v10273_v3 = vld [vmem:[#allocation5 + $0x34c] sm:$0xf0]  ;;  %v7066_v6 = vor.u32 %v10241_v1, %v7065_v0  ;;  %4847 = vmatpush.bf16.msra.mxu0 %v6810_v4 }
  0x38   :  { %v6793_v7 = vld [vmem:[#allocation5 + $0x20] sm:$0xf]  ;;  %v10173_v8 = vld [vmem:[#allocation5 + $0x2c] sm:$0xf0]  ;;  %v7194_v10 = vor.u32 %v10273_v3, %v7193_v2  ;;  %4860 = vmatpush.bf16.msra.mxu1 %v6938_v5  ;;  %v129_v2 = vld [vmem:[#allocation2 + $0x8] sm:$0xff] }
  0x39   :  { %v6921_v9 = vld [vmem:[#allocation5 + $0x120] sm:$0xf]  ;;  %v10205_v11 = vld [vmem:[#allocation5 + $0x12c] sm:$0xf0]  ;;  %v6794_v16 = vor.u32 %v10173_v8, %v6793_v7  ;;  %4873 = vmatpush.bf16.msra.mxu2 %v7066_v6  ;;  %v932_v8 = vunpack.c.l.b16 %v129_v2 }
  0x3a   :  { %v7049_v12 = vld [vmem:[#allocation5 + $0x220] sm:$0xf]  ;;  %v10237_v13 = vld [vmem:[#allocation5 + $0x22c] sm:$0xf0]  ;;  %v6922_v19 = vor.u32 %v10205_v11, %v6921_v9  ;;  %4886 = vmatpush.bf16.msra.mxu3 %v7194_v10  ;;  %v933_v10 = vunpack.c.h.b16 %v129_v2 }
  0x3b   :  { %v7177_v14 = vld [vmem:[#allocation5 + $0x320] sm:$0xf]  ;;  %v10269_v15 = vld [vmem:[#allocation5 + $0x32c] sm:$0xf0]  ;;  %v7050_v20 = vor.u32 %v10237_v13, %v7049_v12  ;;  %4848 = vmatpush.bf16.msra.mxu0 %v6794_v16 }
  0x3c   :  { %v6777_v17 = vld [vmem:[#allocation5] sm:$0xf]  ;;  %v10169_v18 = vld [vmem:[#allocation5 + $0xc] sm:$0xf0]  ;;  %v7178_v24 = vor.u32 %v10269_v15, %v7177_v14  ;;  %4861 = vmatpush.bf16.msra.mxu1 %v6922_v19 }
  0x3d   :  { %v6905_v21 = vld [vmem:[#allocation5 + $0x100] sm:$0xf]  ;;  %v10201_v22 = vld [vmem:[#allocation5 + $0x10c] sm:$0xf0]  ;;  %v6778_v31 = vor.u32 %v10169_v18, %v6777_v17  ;;  %4874 = vmatpush.bf16.msra.mxu2 %v7050_v20  ;;  %v11310_v18 = vpack.c.b16 %v932_v8, %v932_v8  ;;  %v11314_v20 = vpack.c.b16 %v933_v10, %v933_v10 }
  0x3e   :  { %v7033_v23 = vld [vmem:[#allocation5 + $0x200] sm:$0xf]  ;;  %v10233_v25 = vld [vmem:[#allocation5 + $0x20c] sm:$0xf0]  ;;  %v6906_v35 = vor.u32 %v10201_v22, %v6905_v21  ;;  %4887 = vmatpush.bf16.msra.mxu3 %v7178_v24 }
  0x3f   :  { %v7161_v26 = vld [vmem:[#allocation5 + $0x300] sm:$0xf]  ;;  %v10265_v27 = vld [vmem:[#allocation5 + $0x30c] sm:$0xf0]  ;;  %v7034_v36 = vor.u32 %v10233_v25, %v7033_v23  ;;  %4849 = vmatpush.bf16.msra.mxu0 %v6778_v31 }
  0x40   :  { %v7401_v28 = vld [vmem:[#allocation5 + $0x4e0] sm:$0xf]  ;;  %v10325_v29 = vld [vmem:[#allocation5 + $0x4ec] sm:$0xf0]  ;;  %v7162_v39 = vor.u32 %v10265_v27, %v7161_v26  ;;  %4862 = vmatpush.bf16.msra.mxu1 %v6906_v35 }
  0x41   :  { %v7529_v30 = vld [vmem:[#allocation5 + $0x5e0] sm:$0xf]  ;;  %v10357_v32 = vld [vmem:[#allocation5 + $0x5ec] sm:$0xf0]  ;;  %v7402_v40 = vor.u32 %v10325_v29, %v7401_v28  ;;  %4875 = vmatpush.bf16.msra.mxu2 %v7034_v36 }
  0x42   :  { %v7657_v33 = vld [vmem:[#allocation5 + $0x6e0] sm:$0xf]  ;;  %v10389_v34 = vld [vmem:[#allocation5 + $0x6ec] sm:$0xf0]  ;;  %v7530_v41 = vor.u32 %v10357_v32, %v7529_v30  ;;  %4888 = vmatpush.bf16.msra.mxu3 %v7162_v39 }
  0x43   :  { %v7785_v37 = vld [vmem:[#allocation5 + $0x7e0] sm:$0xf]  ;;  %v10421_v38 = vld [vmem:[#allocation5 + $0x7ec] sm:$0xf0]  ;;  %v7658_v42 = vor.u32 %v10389_v34, %v7657_v33  ;;  %4894 = vmatpush.bf16.msrb.mxu0 %v7402_v40 }
  0x44   :  { %v7385_v43 = vld [vmem:[#allocation5 + $0x4c0] sm:$0xf]  ;;  %v10321_v44 = vld [vmem:[#allocation5 + $0x4cc] sm:$0xf0]  ;;  %v7786_v46 = vor.u32 %v10421_v38, %v7785_v37  ;;  %4907 = vmatpush.bf16.msrb.mxu1 %v7530_v41  ;;  %4876 = vmatmul.bf16.vlgmr.msra.gmra.mxu2 %v11310_v18 }
  0x45   :  { %v7513_v45 = vld [vmem:[#allocation5 + $0x5c0] sm:$0xf]  ;;  %v10353_v47 = vld [vmem:[#allocation5 + $0x5cc] sm:$0xf0]  ;;  %v7386_v52 = vor.u32 %v10321_v44, %v7385_v43  ;;  %4920 = vmatpush.bf16.msrb.mxu2 %v7658_v42  ;;  %4889 = vmatmul.bf16.vlgmr.msra.gmra.mxu3 %v11314_v20 }
  0x46   :  { %v7641_v48 = vld [vmem:[#allocation5 + $0x6c0] sm:$0xf]  ;;  %v10385_v49 = vld [vmem:[#allocation5 + $0x6cc] sm:$0xf0]  ;;  %v7514_v54 = vor.u32 %v10353_v47, %v7513_v45  ;;  %4933 = vmatpush.bf16.msrb.mxu3 %v7786_v46 }
  0x47   :  { %v7769_v50 = vld [vmem:[#allocation5 + $0x7c0] sm:$0xf]  ;;  %v10417_v51 = vld [vmem:[#allocation5 + $0x7cc] sm:$0xf0]  ;;  %v7642_v55 = vor.u32 %v10385_v49, %v7641_v48  ;;  %4895 = vmatpush.bf16.msrb.mxu0 %v7386_v52 }
  0x48   :  { %v7369_v53 = vld [vmem:[#allocation5 + $0x4a0] sm:$0xf]  ;;  %v10317_v56 = vld [vmem:[#allocation5 + $0x4ac] sm:$0xf0]  ;;  %v7770_v59 = vor.u32 %v10417_v51, %v7769_v50  ;;  %4908 = vmatpush.bf16.msrb.mxu1 %v7514_v54 }
  0x49   :  { %v7497_v57 = vld [vmem:[#allocation5 + $0x5a0] sm:$0xf]  ;;  %v10349_v58 = vld [vmem:[#allocation5 + $0x5ac] sm:$0xf0]  ;;  %v7370_v0 = vor.u32 %v10317_v56, %v7369_v53  ;;  %4921 = vmatpush.bf16.msrb.mxu2 %v7642_v55 }
  0x4a   :  { %v7625_v60 = vld [vmem:[#allocation5 + $0x6a0] sm:$0xf]  ;;  %v10381_v61 = vld [vmem:[#allocation5 + $0x6ac] sm:$0xf0]  ;;  %v7498_v1 = vor.u32 %v10349_v58, %v7497_v57  ;;  %4934 = vmatpush.bf16.msrb.mxu3 %v7770_v59 }
  0x4b   :  { %v7753_v62 = vld [vmem:[#allocation5 + $0x7a0] sm:$0xf]  ;;  %v10413_v63 = vld [vmem:[#allocation5 + $0x7ac] sm:$0xf0]  ;;  %v7626_v4 = vor.u32 %v10381_v61, %v7625_v60  ;;  %4896 = vmatpush.bf16.msrb.mxu0 %v7370_v0 }
  0x4c   :  { %v128_v3 = vld [vmem:[#allocation2] sm:$0xff]  ;;  %v10313_v6 = vld [vmem:[#allocation5 + $0x48c] sm:$0xf0]  ;;  %v7754_v11 = vor.u32 %v10413_v63, %v7753_v62  ;;  %4909 = vmatpush.bf16.msrb.mxu1 %v7498_v1 }
  0x4d   :  { %v7353_v5 = vld [vmem:[#allocation5 + $0x480] sm:$0xf]  ;;  %v930_v9 = vunpack.c.l.b16 %v128_v3  ;;  %v10345_v12 = vld [vmem:[#allocation5 + $0x58c] sm:$0xf0]  ;;  %v931_v15 = vunpack.c.h.b16 %v128_v3  ;;  %4922 = vmatpush.bf16.msrb.mxu2 %v7626_v4  ;;  %v131_v3 = vld [vmem:[#allocation2 + $0x18] sm:$0xff] }
  0x4e   :  { %v7481_v7 = vld [vmem:[#allocation5 + $0x580] sm:$0xf]  ;;  %v10377_v14 = vld [vmem:[#allocation5 + $0x68c] sm:$0xf0]  ;;  %v7354_v21 = vor.u32 %v10313_v6, %v7353_v5  ;;  %4935 = vmatpush.bf16.msrb.mxu3 %v7754_v11 }
  0x4f   :  { %v7609_v13 = vld [vmem:[#allocation5 + $0x680] sm:$0xf]  ;;  %v10409_v17 = vld [vmem:[#allocation5 + $0x78c] sm:$0xf0]  ;;  %v11312_v19 = vpack.c.b16 %v930_v9, %v930_v9  ;;  %v11316_v22 = vpack.c.b16 %v931_v15, %v931_v15  ;;  %v7482_v23 = vor.u32 %v10345_v12, %v7481_v7  ;;  %v936_v15 = vunpack.c.l.b16 %v131_v3 }
  0x50   :  { %v7737_v16 = vld [vmem:[#allocation5 + $0x780] sm:$0xf]  ;;  %v7610_v24 = vor.u32 %v10377_v14, %v7609_v13  ;;  %v10309_v26 = vld [vmem:[#allocation5 + $0x46c] sm:$0xf0]  ;;  %4897 = vmatpush.bf16.msrb.mxu0 %v7354_v21 }
  0x51   :  { %v7337_v25 = vld [vmem:[#allocation5 + $0x460] sm:$0xf]  ;;  %v7738_v28 = vor.u32 %v10409_v17, %v7737_v16  ;;  %v10341_v29 = vld [vmem:[#allocation5 + $0x56c] sm:$0xf0]  ;;  %4850 = vmatmul.bf16.vlgmr.msra.gmra.mxu0 %v11312_v19  ;;  %4863 = vmatmul.bf16.vlgmr.msra.gmra.mxu1 %v11316_v22 }
  0x52   :  { %v7465_v27 = vld [vmem:[#allocation5 + $0x560] sm:$0xf]  ;;  %v10373_v31 = vld [vmem:[#allocation5 + $0x66c] sm:$0xf0]  ;;  %v7338_v34 = vor.u32 %v10309_v26, %v7337_v25  ;;  %4910 = vmatpush.bf16.msrb.mxu1 %v7482_v23  ;;  %4923 = vmatpush.bf16.msrb.mxu2 %v7610_v24  ;;  %v937_v25 = vunpack.c.h.b16 %v131_v3 }
  0x53   :  { %v7593_v30 = vld [vmem:[#allocation5 + $0x660] sm:$0xf]  ;;  %v10405_v33 = vld [vmem:[#allocation5 + $0x76c] sm:$0xf0]  ;;  %v7466_v35 = vor.u32 %v10341_v29, %v7465_v27  ;;  %4936 = vmatpush.bf16.msrb.mxu3 %v7738_v28 }
  0x54   :  { %v7721_v32 = vld [vmem:[#allocation5 + $0x760] sm:$0xf]  ;;  %v7594_v36 = vor.u32 %v10373_v31, %v7593_v30  ;;  %v10305_v38 = vld [vmem:[#allocation5 + $0x44c] sm:$0xf0]  ;;  %4898 = vmatpush.bf16.msrb.mxu0 %v7338_v34 }
  0x55   :  { %v7321_v37 = vld [vmem:[#allocation5 + $0x440] sm:$0xf]  ;;  %v7722_v40 = vor.u32 %v10405_v33, %v7721_v32  ;;  %v10337_v41 = vld [vmem:[#allocation5 + $0x54c] sm:$0xf0] }
  0x56   :  { %v7449_v39 = vld [vmem:[#allocation5 + $0x540] sm:$0xf]  ;;  %v10369_v43 = vld [vmem:[#allocation5 + $0x64c] sm:$0xf0]  ;;  %v7322_v46 = vor.u32 %v10305_v38, %v7321_v37  ;;  %4911 = vmatpush.bf16.msrb.mxu1 %v7466_v35  ;;  %4924 = vmatpush.bf16.msrb.mxu2 %v7594_v36  ;;  %v11322_v38 = vpack.c.b16 %v936_v15, %v936_v15 }
  0x57   :  { %v7577_v42 = vld [vmem:[#allocation5 + $0x640] sm:$0xf]  ;;  %v10401_v45 = vld [vmem:[#allocation5 + $0x74c] sm:$0xf0]  ;;  %v7450_v47 = vor.u32 %v10337_v41, %v7449_v39  ;;  %4937 = vmatpush.bf16.msrb.mxu3 %v7722_v40 }
  0x58   :  { %v7705_v44 = vld [vmem:[#allocation5 + $0x740] sm:$0xf]  ;;  %v7578_v48 = vor.u32 %v10369_v43, %v7577_v42  ;;  %v10301_v50 = vld [vmem:[#allocation5 + $0x42c] sm:$0xf0]  ;;  %4899 = vmatpush.bf16.msrb.mxu0 %v7322_v46  ;;  %v11326_v42 = vpack.c.b16 %v937_v25, %v937_v25 }
  0x59   :  { %v7305_v49 = vld [vmem:[#allocation5 + $0x420] sm:$0xf]  ;;  %v7706_v52 = vor.u32 %v10401_v45, %v7705_v44  ;;  %v10333_v53 = vld [vmem:[#allocation5 + $0x52c] sm:$0xf0] }
  0x5a   :  { %v7433_v51 = vld [vmem:[#allocation5 + $0x520] sm:$0xf]  ;;  %v10365_v55 = vld [vmem:[#allocation5 + $0x62c] sm:$0xf0]  ;;  %v7306_v59 = vor.u32 %v10301_v50, %v7305_v49  ;;  %4912 = vmatpush.bf16.msrb.mxu1 %v7450_v47  ;;  %4925 = vmatpush.bf16.msrb.mxu2 %v7578_v48 }
  0x5b   :  { %v7561_v54 = vld [vmem:[#allocation5 + $0x620] sm:$0xf]  ;;  %v10397_v57 = vld [vmem:[#allocation5 + $0x72c] sm:$0xf0]  ;;  %v7434_v63 = vor.u32 %v10333_v53, %v7433_v51  ;;  %4938 = vmatpush.bf16.msrb.mxu3 %v7706_v52 }
  0x5c   :  { %v7689_v56 = vld [vmem:[#allocation5 + $0x720] sm:$0xf]  ;;  %v10297_v60 = vld [vmem:[#allocation5 + $0x40c] sm:$0xf0]  ;;  %v7562_v0 = vor.u32 %v10365_v55, %v7561_v54  ;;  %4900 = vmatpush.bf16.msrb.mxu0 %v7306_v59 }
  0x5d   :  { %v7289_v58 = vld [vmem:[#allocation5 + $0x400] sm:$0xf]  ;;  %v10329_v62 = vld [vmem:[#allocation5 + $0x50c] sm:$0xf0]  ;;  %v7690_v4 = vor.u32 %v10397_v57, %v7689_v56 }
  0x5e   :  { %v7417_v61 = vld [vmem:[#allocation5 + $0x500] sm:$0xf]  ;;  %v10361_v2 = vld [vmem:[#allocation5 + $0x60c] sm:$0xf0]  ;;  %v7290_v11 = vor.u32 %v10297_v60, %v7289_v58  ;;  %4913 = vmatpush.bf16.msrb.mxu1 %v7434_v63  ;;  %4926 = vmatpush.bf16.msrb.mxu2 %v7562_v0 }
  0x5f   :  { %v7545_v1 = vld [vmem:[#allocation5 + $0x600] sm:$0xf]  ;;  %v10393_v6 = vld [vmem:[#allocation5 + $0x70c] sm:$0xf0]  ;;  %v7418_v16 = vor.u32 %v10329_v62, %v7417_v61  ;;  %4939 = vmatpush.bf16.msrb.mxu3 %v7690_v4 }
  0x60   :  { %v7673_v5 = vld [vmem:[#allocation5 + $0x700] sm:$0xf]  ;;  %v130_v7 = vld [vmem:[#allocation2 + $0x10] sm:$0xff]  ;;  %v7546_v17 = vor.u32 %v10361_v2, %v7545_v1  ;;  %4901 = vmatpush.bf16.msrb.mxu0 %v7290_v11 }
  0x61   :  { %v7913_v8 = vld [vmem:[#allocation5 + $0x8e0] sm:$0xf]  ;;  %v10453_v9 = vld [vmem:[#allocation5 + $0x8ec] sm:$0xf0]  ;;  %v934_v24 = vunpack.c.l.b16 %v130_v7  ;;  %v7674_v26 = vor.u32 %v10393_v6, %v7673_v5  ;;  %v935_v28 = vunpack.c.h.b16 %v130_v7 }
  0x62   :  { %v8041_v10 = vld [vmem:[#allocation5 + $0x9e0] sm:$0xf]  ;;  %v10485_v12 = vld [vmem:[#allocation5 + $0x9ec] sm:$0xf0]  ;;  %v7914_v27 = vor.u32 %v10453_v9, %v7913_v8  ;;  %4914 = vmatpush.bf16.msrb.mxu1 %v7418_v16  ;;  %4927 = vmatpush.bf16.msrb.mxu2 %v7546_v17 }
  0x63   :  { %v8169_v13 = vld [vmem:[#allocation5 + $0xae0] sm:$0xf]  ;;  %v10517_v14 = vld [vmem:[#allocation5 + $0xaec] sm:$0xf0]  ;;  %v8042_v29 = vor.u32 %v10485_v12, %v8041_v10  ;;  %v11324_v41 = vpack.c.b16 %v934_v24, %v934_v24  ;;  %4940 = vmatpush.bf16.msrb.mxu3 %v7674_v26  ;;  %v11328_v44 = vpack.c.b16 %v935_v28, %v935_v28 }
  0x64   :  { %v8297_v21 = vld [vmem:[#allocation5 + $0xbe0] sm:$0xf]  ;;  %v10549_v23 = vld [vmem:[#allocation5 + $0xbec] sm:$0xf0]  ;;  %v8170_v30 = vor.u32 %v10517_v14, %v8169_v13  ;;  %4946 = vmatpush.bf16.msra.mxu0 %v7914_v27 }
  0x65   :  { %v7897_v31 = vld [vmem:[#allocation5 + $0x8c0] sm:$0xf]  ;;  %v10449_v32 = vld [vmem:[#allocation5 + $0x8cc] sm:$0xf0]  ;;  %v8298_v34 = vor.u32 %v10549_v23, %v8297_v21  ;;  %4928 = vmatmul.bf16.vlgmr.msrb.gmra.mxu2 %v11322_v38  ;;  %4902 = vmatmul.bf16.vlgmr.msrb.gmra.mxu0 %v11324_v41 }
  0x66   :  { %v8025_v33 = vld [vmem:[#allocation5 + $0x9c0] sm:$0xf]  ;;  %v10481_v35 = vld [vmem:[#allocation5 + $0x9cc] sm:$0xf0]  ;;  %v7898_v43 = vor.u32 %v10449_v32, %v7897_v31  ;;  %4959 = vmatpush.bf16.msra.mxu1 %v8042_v29  ;;  %4972 = vmatpush.bf16.msra.mxu2 %v8170_v30 }
  0x67   :  { %v8153_v36 = vld [vmem:[#allocation5 + $0xac0] sm:$0xf]  ;;  %v10513_v37 = vld [vmem:[#allocation5 + $0xacc] sm:$0xf0]  ;;  %v8026_v45 = vor.u32 %v10481_v35, %v8025_v33  ;;  %4985 = vmatpush.bf16.msra.mxu3 %v8298_v34  ;;  %4915 = vmatmul.bf16.vlgmr.msrb.gmra.mxu1 %v11328_v44 }
  0x68   :  { %v8281_v39 = vld [vmem:[#allocation5 + $0xbc0] sm:$0xf]  ;;  %v10545_v40 = vld [vmem:[#allocation5 + $0xbcc] sm:$0xf0]  ;;  %v8154_v46 = vor.u32 %v10513_v37, %v8153_v36  ;;  %4941 = vmatmul.bf16.vlgmr.msrb.gmra.mxu3 %v11326_v42  ;;  %4947 = vmatpush.bf16.msra.mxu0 %v7898_v43 }
  0x69   :  { %v7881_v47 = vld [vmem:[#allocation5 + $0x8a0] sm:$0xf]  ;;  %v10445_v48 = vld [vmem:[#allocation5 + $0x8ac] sm:$0xf0]  ;;  %v8282_v50 = vor.u32 %v10545_v40, %v8281_v39 }
  0x6a   :  { %v8009_v49 = vld [vmem:[#allocation5 + $0x9a0] sm:$0xf]  ;;  %v10477_v51 = vld [vmem:[#allocation5 + $0x9ac] sm:$0xf0]  ;;  %v7882_v56 = vor.u32 %v10445_v48, %v7881_v47  ;;  %4960 = vmatpush.bf16.msra.mxu1 %v8026_v45  ;;  %4973 = vmatpush.bf16.msra.mxu2 %v8154_v46 }
  0x6b   :  { %v8137_v52 = vld [vmem:[#allocation5 + $0xaa0] sm:$0xf]  ;;  %v10509_v53 = vld [vmem:[#allocation5 + $0xaac] sm:$0xf0]  ;;  %v8010_v57 = vor.u32 %v10477_v51, %v8009_v49  ;;  %4986 = vmatpush.bf16.msra.mxu3 %v8282_v50 }
  0x6c   :  { %v8265_v54 = vld [vmem:[#allocation5 + $0xba0] sm:$0xf]  ;;  %v10541_v55 = vld [vmem:[#allocation5 + $0xbac] sm:$0xf0]  ;;  %v8138_v58 = vor.u32 %v10509_v53, %v8137_v52  ;;  %4948 = vmatpush.bf16.msra.mxu0 %v7882_v56 }
  0x6d   :  { %v7865_v59 = vld [vmem:[#allocation5 + $0x880] sm:$0xf]  ;;  %v10441_v60 = vld [vmem:[#allocation5 + $0x88c] sm:$0xf0]  ;;  %v8266_v62 = vor.u32 %v10541_v55, %v8265_v54 }
  0x6e   :  { %v7993_v61 = vld [vmem:[#allocation5 + $0x980] sm:$0xf]  ;;  %v10473_v63 = vld [vmem:[#allocation5 + $0x98c] sm:$0xf0]  ;;  %v7866_v4 = vor.u32 %v10441_v60, %v7865_v59  ;;  %4961 = vmatpush.bf16.msra.mxu1 %v8010_v57  ;;  %4974 = vmatpush.bf16.msra.mxu2 %v8138_v58 }
  0x6f   :  { %v8121_v0 = vld [vmem:[#allocation5 + $0xa80] sm:$0xf]  ;;  %v10505_v1 = vld [vmem:[#allocation5 + $0xa8c] sm:$0xf0]  ;;  %v7994_v5 = vor.u32 %v10473_v63, %v7993_v61  ;;  %4987 = vmatpush.bf16.msra.mxu3 %v8266_v62  ;;  %v133_v61 = vld [vmem:[#allocation2 + $0x28] sm:$0xff] }
  0x70   :  { %v8249_v2 = vld [vmem:[#allocation5 + $0xb80] sm:$0xf]  ;;  %v10537_v3 = vld [vmem:[#allocation5 + $0xb8c] sm:$0xf0]  ;;  %v8122_v6 = vor.u32 %v10505_v1, %v8121_v0  ;;  %4949 = vmatpush.bf16.msra.mxu0 %v7866_v4 }
  0x71   :  { %v7849_v7 = vld [vmem:[#allocation5 + $0x860] sm:$0xf]  ;;  %v10437_v8 = vld [vmem:[#allocation5 + $0x86c] sm:$0xf0]  ;;  %v8250_v10 = vor.u32 %v10537_v3, %v8249_v2 }
  0x72   :  { %v7977_v9 = vld [vmem:[#allocation5 + $0x960] sm:$0xf]  ;;  %v10469_v11 = vld [vmem:[#allocation5 + $0x96c] sm:$0xf0]  ;;  %v7850_v16 = vor.u32 %v10437_v8, %v7849_v7  ;;  %4962 = vmatpush.bf16.msra.mxu1 %v7994_v5  ;;  %4975 = vmatpush.bf16.msra.mxu2 %v8122_v6 }
  0x73   :  { %v8105_v12 = vld [vmem:[#allocation5 + $0xa60] sm:$0xf]  ;;  %v10501_v13 = vld [vmem:[#allocation5 + $0xa6c] sm:$0xf0]  ;;  %v7978_v17 = vor.u32 %v10469_v11, %v7977_v9  ;;  %4988 = vmatpush.bf16.msra.mxu3 %v8250_v10  ;;  %v940_v10 = vunpack.c.l.b16 %v133_v61 }
  0x74   :  { %v8233_v14 = vld [vmem:[#allocation5 + $0xb60] sm:$0xf]  ;;  %v10533_v15 = vld [vmem:[#allocation5 + $0xb6c] sm:$0xf0]  ;;  %v8106_v21 = vor.u32 %v10501_v13, %v8105_v12  ;;  %4950 = vmatpush.bf16.msra.mxu0 %v7850_v16 }
  0x75   :  { %v7833_v23 = vld [vmem:[#allocation5 + $0x840] sm:$0xf]  ;;  %v10433_v24 = vld [vmem:[#allocation5 + $0x84c] sm:$0xf0]  ;;  %v8234_v26 = vor.u32 %v10533_v15, %v8233_v14  ;;  %v941_v14 = vunpack.c.h.b16 %v133_v61 }
  0x76   :  { %v7961_v25 = vld [vmem:[#allocation5 + $0x940] sm:$0xf]  ;;  %v10465_v27 = vld [vmem:[#allocation5 + $0x94c] sm:$0xf0]  ;;  %v7834_v32 = vor.u32 %v10433_v24, %v7833_v23  ;;  %4963 = vmatpush.bf16.msra.mxu1 %v7978_v17  ;;  %4976 = vmatpush.bf16.msra.mxu2 %v8106_v21 }
  0x77   :  { %v8089_v28 = vld [vmem:[#allocation5 + $0xa40] sm:$0xf]  ;;  %v10497_v29 = vld [vmem:[#allocation5 + $0xa4c] sm:$0xf0]  ;;  %v7962_v34 = vor.u32 %v10465_v27, %v7961_v25  ;;  %4989 = vmatpush.bf16.msra.mxu3 %v8234_v26 }
  0x78   :  { %v8217_v30 = vld [vmem:[#allocation5 + $0xb40] sm:$0xf]  ;;  %v10529_v31 = vld [vmem:[#allocation5 + $0xb4c] sm:$0xf0]  ;;  %v8090_v35 = vor.u32 %v10497_v29, %v8089_v28  ;;  %4951 = vmatpush.bf16.msra.mxu0 %v7834_v32  ;;  %v11336_v29 = vpack.c.b16 %v940_v10, %v940_v10 }
  0x79   :  { %v7817_v33 = vld [vmem:[#allocation5 + $0x820] sm:$0xf]  ;;  %v10429_v36 = vld [vmem:[#allocation5 + $0x82c] sm:$0xf0]  ;;  %v8218_v40 = vor.u32 %v10529_v31, %v8217_v30 }
  0x7a   :  { %v7945_v37 = vld [vmem:[#allocation5 + $0x920] sm:$0xf]  ;;  %v10461_v39 = vld [vmem:[#allocation5 + $0x92c] sm:$0xf0]  ;;  %v7818_v49 = vor.u32 %v10429_v36, %v7817_v33  ;;  %4964 = vmatpush.bf16.msra.mxu1 %v7962_v34  ;;  %4977 = vmatpush.bf16.msra.mxu2 %v8090_v35  ;;  %v11340_v33 = vpack.c.b16 %v941_v14, %v941_v14 }
  0x7b   :  { %v8073_v43 = vld [vmem:[#allocation5 + $0xa20] sm:$0xf]  ;;  %v10493_v45 = vld [vmem:[#allocation5 + $0xa2c] sm:$0xf0]  ;;  %v7946_v53 = vor.u32 %v10461_v39, %v7945_v37  ;;  %4990 = vmatpush.bf16.msra.mxu3 %v8218_v40 }
  0x7c   :  { %v8201_v46 = vld [vmem:[#allocation5 + $0xb20] sm:$0xf]  ;;  %v10525_v47 = vld [vmem:[#allocation5 + $0xb2c] sm:$0xf0]  ;;  %v8074_v54 = vor.u32 %v10493_v45, %v8073_v43  ;;  %4952 = vmatpush.bf16.msra.mxu0 %v7818_v49 }
  0x7d   :  { %v7801_v48 = vld [vmem:[#allocation5 + $0x800] sm:$0xf]  ;;  %v10425_v50 = vld [vmem:[#allocation5 + $0x80c] sm:$0xf0]  ;;  %v8202_v58 = vor.u32 %v10525_v47, %v8201_v46 }
  0x7e   :  { %v7929_v51 = vld [vmem:[#allocation5 + $0x900] sm:$0xf]  ;;  %v10457_v52 = vld [vmem:[#allocation5 + $0x90c] sm:$0xf0]  ;;  %v7802_v1 = vor.u32 %v10425_v50, %v7801_v48  ;;  %4965 = vmatpush.bf16.msra.mxu1 %v7946_v53  ;;  %4978 = vmatpush.bf16.msra.mxu2 %v8074_v54 }
  0x7f   :  { %v8057_v55 = vld [vmem:[#allocation5 + $0xa00] sm:$0xf]  ;;  %v10489_v56 = vld [vmem:[#allocation5 + $0xa0c] sm:$0xf0]  ;;  %v7930_v6 = vor.u32 %v10457_v52, %v7929_v51  ;;  %4991 = vmatpush.bf16.msra.mxu3 %v8202_v58 }
  0x80   :  { %v132_v57 = vld [vmem:[#allocation2 + $0x20] sm:$0xff]  ;;  %v10521_v60 = vld [vmem:[#allocation5 + $0xb0c] sm:$0xf0]  ;;  %v8058_v7 = vor.u32 %v10489_v56, %v8057_v55  ;;  %4953 = vmatpush.bf16.msra.mxu0 %v7802_v1 }
  0x81   :  { %v8185_v59 = vld [vmem:[#allocation5 + $0xb00] sm:$0xf]  ;;  %v10581_v63 = vld [vmem:[#allocation5 + $0xcec] sm:$0xf0]  ;;  %v938_v5 = vunpack.c.l.b16 %v132_v57  ;;  %v939_v11 = vunpack.c.h.b16 %v132_v57 }
  0x82   :  { %v8425_v62 = vld [vmem:[#allocation5 + $0xce0] sm:$0xf]  ;;  %v10613_v2 = vld [vmem:[#allocation5 + $0xdec] sm:$0xf0]  ;;  %v8186_v12 = vor.u32 %v10521_v60, %v8185_v59  ;;  %4966 = vmatpush.bf16.msra.mxu1 %v7930_v6  ;;  %4979 = vmatpush.bf16.msra.mxu2 %v8058_v7 }
  0x83   :  { %v8553_v0 = vld [vmem:[#allocation5 + $0xde0] sm:$0xf]  ;;  %v10645_v4 = vld [vmem:[#allocation5 + $0xeec] sm:$0xf0]  ;;  %v8426_v13 = vor.u32 %v10581_v63, %v8425_v62  ;;  %v11334_v25 = vpack.c.b16 %v938_v5, %v938_v5  ;;  %v11338_v30 = vpack.c.b16 %v939_v11, %v939_v11 }
  0x84   :  { %v8681_v3 = vld [vmem:[#allocation5 + $0xee0] sm:$0xf]  ;;  %v10677_v9 = vld [vmem:[#allocation5 + $0xfec] sm:$0xf0]  ;;  %v8554_v15 = vor.u32 %v10613_v2, %v8553_v0  ;;  %4992 = vmatpush.bf16.msra.mxu3 %v8186_v12 }
  0x85   :  { %v8809_v8 = vld [vmem:[#allocation5 + $0xfe0] sm:$0xf]  ;;  %v8682_v16 = vor.u32 %v10645_v4, %v8681_v3  ;;  %v10577_v21 = vld [vmem:[#allocation5 + $0xccc] sm:$0xf0]  ;;  %4998 = vmatpush.bf16.msrb.mxu0 %v8426_v13  ;;  %4980 = vmatmul.bf16.vlgmr.msra.gmra.mxu2 %v11336_v29 }
  0x86   :  { %v8409_v17 = vld [vmem:[#allocation5 + $0xcc0] sm:$0xf]  ;;  %v8810_v24 = vor.u32 %v10677_v9, %v8809_v8  ;;  %v10609_v26 = vld [vmem:[#allocation5 + $0xdcc] sm:$0xf0]  ;;  %5011 = vmatpush.bf16.msrb.mxu1 %v8554_v15  ;;  %4954 = vmatmul.bf16.vlgmr.msra.gmra.mxu0 %v11334_v25 }
  0x87   :  { %v8537_v23 = vld [vmem:[#allocation5 + $0xdc0] sm:$0xf]  ;;  %v10641_v28 = vld [vmem:[#allocation5 + $0xecc] sm:$0xf0]  ;;  %v8410_v34 = vor.u32 %v10577_v21, %v8409_v17  ;;  %5024 = vmatpush.bf16.msrb.mxu2 %v8682_v16  ;;  %4967 = vmatmul.bf16.vlgmr.msra.gmra.mxu1 %v11338_v30 }
  0x88   :  { %v8665_v27 = vld [vmem:[#allocation5 + $0xec0] sm:$0xf]  ;;  %v10673_v32 = vld [vmem:[#allocation5 + $0xfcc] sm:$0xf0]  ;;  %v8538_v35 = vor.u32 %v10609_v26, %v8537_v23  ;;  %5037 = vmatpush.bf16.msrb.mxu3 %v8810_v24 }
  0x89   :  { %v8793_v31 = vld [vmem:[#allocation5 + $0xfc0] sm:$0xf]  ;;  %v8666_v36 = vor.u32 %v10641_v28, %v8665_v27  ;;  %v10573_v39 = vld [vmem:[#allocation5 + $0xcac] sm:$0xf0]  ;;  %4993 = vmatmul.bf16.vlgmr.msra.gmra.mxu3 %v11340_v33  ;;  %4999 = vmatpush.bf16.msrb.mxu0 %v8410_v34 }
  0x8a   :  { %v8393_v37 = vld [vmem:[#allocation5 + $0xca0] sm:$0xf]  ;;  %v8794_v43 = vor.u32 %v10673_v32, %v8793_v31  ;;  %v10605_v45 = vld [vmem:[#allocation5 + $0xdac] sm:$0xf0]  ;;  %5012 = vmatpush.bf16.msrb.mxu1 %v8538_v35 }
  0x8b   :  { %v8521_v40 = vld [vmem:[#allocation5 + $0xda0] sm:$0xf]  ;;  %v10637_v47 = vld [vmem:[#allocation5 + $0xeac] sm:$0xf0]  ;;  %v8394_v50 = vor.u32 %v10573_v39, %v8393_v37  ;;  %5025 = vmatpush.bf16.msrb.mxu2 %v8666_v36 }
  0x8c   :  { %v8649_v46 = vld [vmem:[#allocation5 + $0xea0] sm:$0xf]  ;;  %v10669_v49 = vld [vmem:[#allocation5 + $0xfac] sm:$0xf0]  ;;  %v8522_v51 = vor.u32 %v10605_v45, %v8521_v40  ;;  %5038 = vmatpush.bf16.msrb.mxu3 %v8794_v43 }
  0x8d   :  { %v8777_v48 = vld [vmem:[#allocation5 + $0xfa0] sm:$0xf]  ;;  %v8650_v52 = vor.u32 %v10637_v47, %v8649_v46  ;;  %v10569_v54 = vld [vmem:[#allocation5 + $0xc8c] sm:$0xf0]  ;;  %5000 = vmatpush.bf16.msrb.mxu0 %v8394_v50 }
  0x8e   :  { %v8377_v53 = vld [vmem:[#allocation5 + $0xc80] sm:$0xf]  ;;  %v8778_v56 = vor.u32 %v10669_v49, %v8777_v48  ;;  %v10601_v57 = vld [vmem:[#allocation5 + $0xd8c] sm:$0xf0]  ;;  %5013 = vmatpush.bf16.msrb.mxu1 %v8522_v51 }
  0x8f   :  { %v8505_v55 = vld [vmem:[#allocation5 + $0xd80] sm:$0xf]  ;;  %v10633_v59 = vld [vmem:[#allocation5 + $0xe8c] sm:$0xf0]  ;;  %v8378_v62 = vor.u32 %v10569_v54, %v8377_v53  ;;  %5026 = vmatpush.bf16.msrb.mxu2 %v8650_v52 }
  0x90   :  { %v8633_v58 = vld [vmem:[#allocation5 + $0xe80] sm:$0xf]  ;;  %v10665_v61 = vld [vmem:[#allocation5 + $0xf8c] sm:$0xf0]  ;;  %v8506_v63 = vor.u32 %v10601_v57, %v8505_v55  ;;  %5039 = vmatpush.bf16.msrb.mxu3 %v8778_v56 }
  0x91   :  { %v8761_v60 = vld [vmem:[#allocation5 + $0xf80] sm:$0xf]  ;;  %v8634_v0 = vor.u32 %v10633_v59, %v8633_v58  ;;  %v10565_v2 = vld [vmem:[#allocation5 + $0xc6c] sm:$0xf0]  ;;  %5001 = vmatpush.bf16.msrb.mxu0 %v8378_v62  ;;  %v135_v59 = vld [vmem:[#allocation2 + $0x38] sm:$0xff] }
  0x92   :  { %v8361_v1 = vld [vmem:[#allocation5 + $0xc60] sm:$0xf]  ;;  %v8762_v4 = vor.u32 %v10665_v61, %v8761_v60  ;;  %v10597_v5 = vld [vmem:[#allocation5 + $0xd6c] sm:$0xf0]  ;;  %5014 = vmatpush.bf16.msrb.mxu1 %v8506_v63 }
  0x93   :  { %v8489_v3 = vld [vmem:[#allocation5 + $0xd60] sm:$0xf]  ;;  %v10629_v7 = vld [vmem:[#allocation5 + $0xe6c] sm:$0xf0]  ;;  %v8362_v10 = vor.u32 %v10565_v2, %v8361_v1  ;;  %5027 = vmatpush.bf16.msrb.mxu2 %v8634_v0 }
  0x94   :  { %v8617_v6 = vld [vmem:[#allocation5 + $0xe60] sm:$0xf]  ;;  %v10661_v9 = vld [vmem:[#allocation5 + $0xf6c] sm:$0xf0]  ;;  %v8490_v11 = vor.u32 %v10597_v5, %v8489_v3  ;;  %5040 = vmatpush.bf16.msrb.mxu3 %v8762_v4 }
  0x95   :  { %v8745_v8 = vld [vmem:[#allocation5 + $0xf60] sm:$0xf]  ;;  %v8618_v12 = vor.u32 %v10629_v7, %v8617_v6  ;;  %v10561_v14 = vld [vmem:[#allocation5 + $0xc4c] sm:$0xf0]  ;;  %5002 = vmatpush.bf16.msrb.mxu0 %v8362_v10 }
  0x96   :  { %v8345_v13 = vld [vmem:[#allocation5 + $0xc40] sm:$0xf]  ;;  %v8746_v16 = vor.u32 %v10661_v9, %v8745_v8  ;;  %v10593_v17 = vld [vmem:[#allocation5 + $0xd4c] sm:$0xf0]  ;;  %5015 = vmatpush.bf16.msrb.mxu1 %v8490_v11  ;;  %v944_v8 = vunpack.c.l.b16 %v135_v59 }
  0x97   :  { %v8473_v15 = vld [vmem:[#allocation5 + $0xd40] sm:$0xf]  ;;  %v10625_v23 = vld [vmem:[#allocation5 + $0xe4c] sm:$0xf0]  ;;  %v8346_v27 = vor.u32 %v10561_v14, %v8345_v13  ;;  %5028 = vmatpush.bf16.msrb.mxu2 %v8618_v12  ;;  %v945_v12 = vunpack.c.h.b16 %v135_v59 }
  0x98   :  { %v8601_v21 = vld [vmem:[#allocation5 + $0xe40] sm:$0xf]  ;;  %v10657_v26 = vld [vmem:[#allocation5 + $0xf4c] sm:$0xf0]  ;;  %v8474_v28 = vor.u32 %v10593_v17, %v8473_v15  ;;  %5041 = vmatpush.bf16.msrb.mxu3 %v8746_v16 }
  0x99   :  { %v8729_v24 = vld [vmem:[#allocation5 + $0xf40] sm:$0xf]  ;;  %v8602_v31 = vor.u32 %v10625_v23, %v8601_v21  ;;  %v10557_v34 = vld [vmem:[#allocation5 + $0xc2c] sm:$0xf0]  ;;  %5003 = vmatpush.bf16.msrb.mxu0 %v8346_v27 }
  0x9a   :  { %v8329_v32 = vld [vmem:[#allocation5 + $0xc20] sm:$0xf]  ;;  %v8730_v36 = vor.u32 %v10657_v26, %v8729_v24  ;;  %v10589_v37 = vld [vmem:[#allocation5 + $0xd2c] sm:$0xf0]  ;;  %5016 = vmatpush.bf16.msrb.mxu1 %v8474_v28  ;;  %v11348_v28 = vpack.c.b16 %v944_v8, %v944_v8 }
  0x9b   :  { %v8457_v35 = vld [vmem:[#allocation5 + $0xd20] sm:$0xf]  ;;  %v10621_v40 = vld [vmem:[#allocation5 + $0xe2c] sm:$0xf0]  ;;  %v8330_v47 = vor.u32 %v10557_v34, %v8329_v32  ;;  %5029 = vmatpush.bf16.msrb.mxu2 %v8602_v31 }
  0x9c   :  { %v8585_v39 = vld [vmem:[#allocation5 + $0xe20] sm:$0xf]  ;;  %v10653_v45 = vld [vmem:[#allocation5 + $0xf2c] sm:$0xf0]  ;;  %v8458_v51 = vor.u32 %v10589_v37, %v8457_v35  ;;  %5042 = vmatpush.bf16.msrb.mxu3 %v8730_v36  ;;  %v11352_v35 = vpack.c.b16 %v945_v12, %v945_v12 }
  0x9d   :  { %v8713_v43 = vld [vmem:[#allocation5 + $0xf20] sm:$0xf]  ;;  %v10553_v48 = vld [vmem:[#allocation5 + $0xc0c] sm:$0xf0]  ;;  %v8586_v52 = vor.u32 %v10621_v40, %v8585_v39  ;;  %5004 = vmatpush.bf16.msrb.mxu0 %v8330_v47 }
  0x9e   :  { %v8313_v46 = vld [vmem:[#allocation5 + $0xc00] sm:$0xf]  ;;  %v10585_v50 = vld [vmem:[#allocation5 + $0xd0c] sm:$0xf0]  ;;  %v8714_v56 = vor.u32 %v10653_v45, %v8713_v43  ;;  %5017 = vmatpush.bf16.msrb.mxu1 %v8458_v51 }
  0x9f   :  { %v8441_v49 = vld [vmem:[#allocation5 + $0xd00] sm:$0xf]  ;;  %v10617_v54 = vld [vmem:[#allocation5 + $0xe0c] sm:$0xf0]  ;;  %v8314_v63 = vor.u32 %v10553_v48, %v8313_v46  ;;  %5030 = vmatpush.bf16.msrb.mxu2 %v8586_v52 }
  0xa0   :  { %v8569_v53 = vld [vmem:[#allocation5 + $0xe00] sm:$0xf]  ;;  %v134_v55 = vld [vmem:[#allocation2 + $0x30] sm:$0xff]  ;;  %v8442_v4 = vor.u32 %v10585_v50, %v8441_v49  ;;  %5043 = vmatpush.bf16.msrb.mxu3 %v8714_v56 }
  0xa1   :  { %v8697_v57 = vld [vmem:[#allocation5 + $0xf00] sm:$0xf]  ;;  %v10649_v58 = vld [vmem:[#allocation5 + $0xf0c] sm:$0xf0]  ;;  %v942_v3 = vunpack.c.l.b16 %v134_v55  ;;  %v8570_v5 = vor.u32 %v10617_v54, %v8569_v53  ;;  %v943_v9 = vunpack.c.h.b16 %v134_v55  ;;  %5005 = vmatpush.bf16.msrb.mxu0 %v8314_v63 }
  0xa2   :  { %v8937_v60 = vld [vmem:[#allocation5 + $0x10e0] sm:$0xf]  ;;  %v10709_v61 = vld [vmem:[#allocation5 + $0x10ec] sm:$0xf0]  ;;  %v8698_v10 = vor.u32 %v10649_v58, %v8697_v57  ;;  %5018 = vmatpush.bf16.msrb.mxu1 %v8442_v4 }
  0xa3   :  { %v9065_v62 = vld [vmem:[#allocation5 + $0x11e0] sm:$0xf]  ;;  %v10741_v0 = vld [vmem:[#allocation5 + $0x11ec] sm:$0xf0]  ;;  %v8938_v11 = vor.u32 %v10709_v61, %v8937_v60  ;;  %v11346_v23 = vpack.c.b16 %v942_v3, %v942_v3  ;;  %5031 = vmatpush.bf16.msrb.mxu2 %v8570_v5  ;;  %v11350_v31 = vpack.c.b16 %v943_v9, %v943_v9 }
  0xa4   :  { %v9193_v1 = vld [vmem:[#allocation5 + $0x12e0] sm:$0xf]  ;;  %v10773_v2 = vld [vmem:[#allocation5 + $0x12ec] sm:$0xf0]  ;;  %v9066_v13 = vor.u32 %v10741_v0, %v9065_v62  ;;  %5044 = vmatpush.bf16.msrb.mxu3 %v8698_v10 }
  0xa5   :  { %v9321_v6 = vld [vmem:[#allocation5 + $0x13e0] sm:$0xf]  ;;  %v10805_v7 = vld [vmem:[#allocation5 + $0x13ec] sm:$0xf0]  ;;  %v9194_v14 = vor.u32 %v10773_v2, %v9193_v1  ;;  %5050 = vmatpush.bf16.msra.mxu0 %v8938_v11  ;;  %5019 = vmatmul.bf16.vlgmr.msrb.gmra.mxu1 %v11350_v31 }
  0xa6   :  { %v8921_v15 = vld [vmem:[#allocation5 + $0x10c0] sm:$0xf]  ;;  %v10705_v16 = vld [vmem:[#allocation5 + $0x10cc] sm:$0xf0]  ;;  %v9322_v21 = vor.u32 %v10805_v7, %v9321_v6  ;;  %5063 = vmatpush.bf16.msra.mxu1 %v9066_v13  ;;  %5006 = vmatmul.bf16.vlgmr.msrb.gmra.mxu0 %v11346_v23 }
  0xa7   :  { %v9049_v17 = vld [vmem:[#allocation5 + $0x11c0] sm:$0xf]  ;;  %v10737_v24 = vld [vmem:[#allocation5 + $0x11cc] sm:$0xf0]  ;;  %v8922_v36 = vor.u32 %v10705_v16, %v8921_v15  ;;  %5076 = vmatpush.bf16.msra.mxu2 %v9194_v14  ;;  %5045 = vmatmul.bf16.vlgmr.msrb.gmra.mxu3 %v11352_v35 }
  0xa8   :  { %v9177_v26 = vld [vmem:[#allocation5 + $0x12c0] sm:$0xf]  ;;  %v10769_v27 = vld [vmem:[#allocation5 + $0x12cc] sm:$0xf0]  ;;  %v9050_v37 = vor.u32 %v10737_v24, %v9049_v17  ;;  %5089 = vmatpush.bf16.msra.mxu3 %v9322_v21  ;;  %5032 = vmatmul.bf16.vlgmr.msrb.gmra.mxu2 %v11348_v28 }
  0xa9   :  { %v9305_v32 = vld [vmem:[#allocation5 + $0x13c0] sm:$0xf]  ;;  %v10801_v34 = vld [vmem:[#allocation5 + $0x13cc] sm:$0xf0]  ;;  %v9178_v39 = vor.u32 %v10769_v27, %v9177_v26  ;;  %5051 = vmatpush.bf16.msra.mxu0 %v8922_v36 }
  0xaa   :  { %v8905_v40 = vld [vmem:[#allocation5 + $0x10a0] sm:$0xf]  ;;  %v10701_v43 = vld [vmem:[#allocation5 + $0x10ac] sm:$0xf0]  ;;  %v9306_v46 = vor.u32 %v10801_v34, %v9305_v32  ;;  %5064 = vmatpush.bf16.msra.mxu1 %v9050_v37 }
  0xab   :  { %v9033_v45 = vld [vmem:[#allocation5 + $0x11a0] sm:$0xf]  ;;  %v10733_v47 = vld [vmem:[#allocation5 + $0x11ac] sm:$0xf0]  ;;  %v8906_v52 = vor.u32 %v10701_v43, %v8905_v40  ;;  %5077 = vmatpush.bf16.msra.mxu2 %v9178_v39 }
  0xac   :  { %v9161_v48 = vld [vmem:[#allocation5 + $0x12a0] sm:$0xf]  ;;  %v10765_v49 = vld [vmem:[#allocation5 + $0x12ac] sm:$0xf0]  ;;  %v9034_v53 = vor.u32 %v10733_v47, %v9033_v45  ;;  %5090 = vmatpush.bf16.msra.mxu3 %v9306_v46 }
  0xad   :  { %v9289_v50 = vld [vmem:[#allocation5 + $0x13a0] sm:$0xf]  ;;  %v10797_v51 = vld [vmem:[#allocation5 + $0x13ac] sm:$0xf0]  ;;  %v9162_v54 = vor.u32 %v10765_v49, %v9161_v48  ;;  %5052 = vmatpush.bf16.msra.mxu0 %v8906_v52 }
  0xae   :  { %v8889_v55 = vld [vmem:[#allocation5 + $0x1080] sm:$0xf]  ;;  %v10697_v56 = vld [vmem:[#allocation5 + $0x108c] sm:$0xf0]  ;;  %v9290_v58 = vor.u32 %v10797_v51, %v9289_v50  ;;  %5065 = vmatpush.bf16.msra.mxu1 %v9034_v53 }
  0xaf   :  { %v9017_v57 = vld [vmem:[#allocation5 + $0x1180] sm:$0xf]  ;;  %v10729_v59 = vld [vmem:[#allocation5 + $0x118c] sm:$0xf0]  ;;  %v8890_v0 = vor.u32 %v10697_v56, %v8889_v55  ;;  %5078 = vmatpush.bf16.msra.mxu2 %v9162_v54 }
  0xb0   :  { %v9145_v60 = vld [vmem:[#allocation5 + $0x1280] sm:$0xf]  ;;  %v10761_v61 = vld [vmem:[#allocation5 + $0x128c] sm:$0xf0]  ;;  %v9018_v1 = vor.u32 %v10729_v59, %v9017_v57  ;;  %5091 = vmatpush.bf16.msra.mxu3 %v9290_v58 }
  0xb1   :  { %v9273_v62 = vld [vmem:[#allocation5 + $0x1380] sm:$0xf]  ;;  %v10793_v63 = vld [vmem:[#allocation5 + $0x138c] sm:$0xf0]  ;;  %v9146_v2 = vor.u32 %v10761_v61, %v9145_v60  ;;  %5053 = vmatpush.bf16.msra.mxu0 %v8890_v0 }
  0xb2   :  { %v8873_v3 = vld [vmem:[#allocation5 + $0x1060] sm:$0xf]  ;;  %v10693_v4 = vld [vmem:[#allocation5 + $0x106c] sm:$0xf0]  ;;  %v9274_v6 = vor.u32 %v10793_v63, %v9273_v62  ;;  %5066 = vmatpush.bf16.msra.mxu1 %v9018_v1  ;;  %v137_v1 = vld [vmem:[#allocation2 + $0x48] sm:$0xff] }
  0xb3   :  { %v9001_v5 = vld [vmem:[#allocation5 + $0x1160] sm:$0xf]  ;;  %v10725_v7 = vld [vmem:[#allocation5 + $0x116c] sm:$0xf0]  ;;  %v8874_v12 = vor.u32 %v10693_v4, %v8873_v3  ;;  %5079 = vmatpush.bf16.msra.mxu2 %v9146_v2 }
  0xb4   :  { %v9129_v8 = vld [vmem:[#allocation5 + $0x1260] sm:$0xf]  ;;  %v10757_v9 = vld [vmem:[#allocation5 + $0x126c] sm:$0xf0]  ;;  %v9002_v13 = vor.u32 %v10725_v7, %v9001_v5  ;;  %5092 = vmatpush.bf16.msra.mxu3 %v9274_v6 }
  0xb5   :  { %v9257_v10 = vld [vmem:[#allocation5 + $0x1360] sm:$0xf]  ;;  %v10789_v11 = vld [vmem:[#allocation5 + $0x136c] sm:$0xf0]  ;;  %v9130_v14 = vor.u32 %v10757_v9, %v9129_v8  ;;  %5054 = vmatpush.bf16.msra.mxu0 %v8874_v12 }
  0xb6   :  { %v8857_v15 = vld [vmem:[#allocation5 + $0x1040] sm:$0xf]  ;;  %v10689_v16 = vld [vmem:[#allocation5 + $0x104c] sm:$0xf0]  ;;  %v9258_v21 = vor.u32 %v10789_v11, %v9257_v10  ;;  %5067 = vmatpush.bf16.msra.mxu1 %v9002_v13 }
  0xb7   :  { %v8985_v17 = vld [vmem:[#allocation5 + $0x1140] sm:$0xf]  ;;  %v10721_v24 = vld [vmem:[#allocation5 + $0x114c] sm:$0xf0]  ;;  %v8858_v36 = vor.u32 %v10689_v16, %v8857_v15  ;;  %5080 = vmatpush.bf16.msra.mxu2 %v9130_v14  ;;  %v948_v14 = vunpack.c.l.b16 %v137_v1 }
  0xb8   :  { %v9113_v26 = vld [vmem:[#allocation5 + $0x1240] sm:$0xf]  ;;  %v10753_v27 = vld [vmem:[#allocation5 + $0x124c] sm:$0xf0]  ;;  %v8986_v37 = vor.u32 %v10721_v24, %v8985_v17  ;;  %5093 = vmatpush.bf16.msra.mxu3 %v9258_v21  ;;  %v949_v21 = vunpack.c.h.b16 %v137_v1 }
  0xb9   :  { %v9241_v32 = vld [vmem:[#allocation5 + $0x1340] sm:$0xf]  ;;  %v10785_v34 = vld [vmem:[#allocation5 + $0x134c] sm:$0xf0]  ;;  %v9114_v39 = vor.u32 %v10753_v27, %v9113_v26  ;;  %5055 = vmatpush.bf16.msra.mxu0 %v8858_v36 }
  0xba   :  { %v8841_v40 = vld [vmem:[#allocation5 + $0x1020] sm:$0xf]  ;;  %v10685_v43 = vld [vmem:[#allocation5 + $0x102c] sm:$0xf0]  ;;  %v9242_v46 = vor.u32 %v10785_v34, %v9241_v32  ;;  %5068 = vmatpush.bf16.msra.mxu1 %v8986_v37 }
  0xbb   :  { %v8969_v45 = vld [vmem:[#allocation5 + $0x1120] sm:$0xf]  ;;  %v10717_v47 = vld [vmem:[#allocation5 + $0x112c] sm:$0xf0]  ;;  %v8842_v53 = vor.u32 %v10685_v43, %v8841_v40  ;;  %5081 = vmatpush.bf16.msra.mxu2 %v9114_v39 }
  0xbc   :  { %v9097_v48 = vld [vmem:[#allocation5 + $0x1220] sm:$0xf]  ;;  %v10749_v49 = vld [vmem:[#allocation5 + $0x122c] sm:$0xf0]  ;;  %v8970_v57 = vor.u32 %v10717_v47, %v8969_v45  ;;  %5094 = vmatpush.bf16.msra.mxu3 %v9242_v46  ;;  %v11360_v45 = vpack.c.b16 %v948_v14, %v948_v14 }
  0xbd   :  { %v9225_v50 = vld [vmem:[#allocation5 + $0x1320] sm:$0xf]  ;;  %v10781_v51 = vld [vmem:[#allocation5 + $0x132c] sm:$0xf0]  ;;  %v9098_v58 = vor.u32 %v10749_v49, %v9097_v48  ;;  %5056 = vmatpush.bf16.msra.mxu0 %v8842_v53  ;;  %v11364_v49 = vpack.c.b16 %v949_v21, %v949_v21 }
  0xbe   :  { %v8825_v52 = vld [vmem:[#allocation5 + $0x1000] sm:$0xf]  ;;  %v10681_v54 = vld [vmem:[#allocation5 + $0x100c] sm:$0xf0]  ;;  %v9226_v62 = vor.u32 %v10781_v51, %v9225_v50  ;;  %5069 = vmatpush.bf16.msra.mxu1 %v8970_v57 }
  0xbf   :  { %v8953_v55 = vld [vmem:[#allocation5 + $0x1100] sm:$0xf]  ;;  %v10713_v56 = vld [vmem:[#allocation5 + $0x110c] sm:$0xf0]  ;;  %v8826_v5 = vor.u32 %v10681_v54, %v8825_v52  ;;  %5082 = vmatpush.bf16.msra.mxu2 %v9098_v58 }
  0xc0   :  { %v9081_v59 = vld [vmem:[#allocation5 + $0x1200] sm:$0xf]  ;;  %v10745_v60 = vld [vmem:[#allocation5 + $0x120c] sm:$0xf0]  ;;  %v8954_v10 = vor.u32 %v10713_v56, %v8953_v55  ;;  %5095 = vmatpush.bf16.msra.mxu3 %v9226_v62 }
  0xc1   :  { %v136_v61 = vld [vmem:[#allocation2 + $0x40] sm:$0xff]  ;;  %v10777_v0 = vld [vmem:[#allocation5 + $0x130c] sm:$0xf0]  ;;  %v9082_v11 = vor.u32 %v10745_v60, %v9081_v59  ;;  %5057 = vmatpush.bf16.msra.mxu0 %v8826_v5 }
  0xc2   :  { %v9209_v63 = vld [vmem:[#allocation5 + $0x1300] sm:$0xf]  ;;  %v10837_v3 = vld [vmem:[#allocation5 + $0x14ec] sm:$0xf0]  ;;  %v946_v9 = vunpack.c.l.b16 %v136_v61  ;;  %v947_v15 = vunpack.c.h.b16 %v136_v61  ;;  %5070 = vmatpush.bf16.msra.mxu1 %v8954_v10 }
  0xc3   :  { %v9449_v2 = vld [vmem:[#allocation5 + $0x14e0] sm:$0xf]  ;;  %v10869_v6 = vld [vmem:[#allocation5 + $0x15ec] sm:$0xf0]  ;;  %v9210_v16 = vor.u32 %v10777_v0, %v9209_v63  ;;  %5083 = vmatpush.bf16.msra.mxu2 %v9082_v11 }
  0xc4   :  { %v9577_v4 = vld [vmem:[#allocation5 + $0x15e0] sm:$0xf]  ;;  %v10901_v8 = vld [vmem:[#allocation5 + $0x16ec] sm:$0xf0]  ;;  %v9450_v17 = vor.u32 %v10837_v3, %v9449_v2  ;;  %v11358_v37 = vpack.c.b16 %v946_v9, %v946_v9  ;;  %v11362_v46 = vpack.c.b16 %v947_v15, %v947_v15 }
  0xc5   :  { %v9705_v7 = vld [vmem:[#allocation5 + $0x16e0] sm:$0xf]  ;;  %v10933_v13 = vld [vmem:[#allocation5 + $0x17ec] sm:$0xf0]  ;;  %v9578_v24 = vor.u32 %v10869_v6, %v9577_v4  ;;  %5096 = vmatpush.bf16.msra.mxu3 %v9210_v16 }
  0xc6   :  { %v9833_v12 = vld [vmem:[#allocation5 + $0x17e0] sm:$0xf]  ;;  %v9706_v26 = vor.u32 %v10901_v8, %v9705_v7  ;;  %v10833_v32 = vld [vmem:[#allocation5 + $0x14cc] sm:$0xf0]  ;;  %5102 = vmatpush.bf16.msrb.mxu0 %v9450_v17  ;;  %5084 = vmatmul.bf16.vlgmr.msra.gmra.mxu2 %v11360_v45 }
  0xc7   :  { %v9433_v27 = vld [vmem:[#allocation5 + $0x14c0] sm:$0xf]  ;;  %v9834_v36 = vor.u32 %v10933_v13, %v9833_v12  ;;  %v10865_v39 = vld [vmem:[#allocation5 + $0x15cc] sm:$0xf0]  ;;  %5115 = vmatpush.bf16.msrb.mxu1 %v9578_v24  ;;  %5058 = vmatmul.bf16.vlgmr.msra.gmra.mxu0 %v11358_v37 }
  0xc8   :  { %v9561_v34 = vld [vmem:[#allocation5 + $0x15c0] sm:$0xf]  ;;  %v10897_v43 = vld [vmem:[#allocation5 + $0x16cc] sm:$0xf0]  ;;  %v9434_v50 = vor.u32 %v10833_v32, %v9433_v27  ;;  %5128 = vmatpush.bf16.msrb.mxu2 %v9706_v26  ;;  %5071 = vmatmul.bf16.vlgmr.msra.gmra.mxu1 %v11362_v46 }
  0xc9   :  { %v9689_v40 = vld [vmem:[#allocation5 + $0x16c0] sm:$0xf]  ;;  %v10929_v48 = vld [vmem:[#allocation5 + $0x17cc] sm:$0xf0]  ;;  %v9562_v51 = vor.u32 %v10865_v39, %v9561_v34  ;;  %5141 = vmatpush.bf16.msrb.mxu3 %v9834_v36 }
  0xca   :  { %v9817_v47 = vld [vmem:[#allocation5 + $0x17c0] sm:$0xf]  ;;  %v9690_v52 = vor.u32 %v10897_v43, %v9689_v40  ;;  %v10829_v54 = vld [vmem:[#allocation5 + $0x14ac] sm:$0xf0]  ;;  %5097 = vmatmul.bf16.vlgmr.msra.gmra.mxu3 %v11364_v49  ;;  %5103 = vmatpush.bf16.msrb.mxu0 %v9434_v50 }
  0xcb   :  { %v9417_v53 = vld [vmem:[#allocation5 + $0x14a0] sm:$0xf]  ;;  %v9818_v56 = vor.u32 %v10929_v48, %v9817_v47  ;;  %v10861_v57 = vld [vmem:[#allocation5 + $0x15ac] sm:$0xf0]  ;;  %5116 = vmatpush.bf16.msrb.mxu1 %v9562_v51 }
  0xcc   :  { %v9545_v55 = vld [vmem:[#allocation5 + $0x15a0] sm:$0xf]  ;;  %v10893_v59 = vld [vmem:[#allocation5 + $0x16ac] sm:$0xf0]  ;;  %v9418_v62 = vor.u32 %v10829_v54, %v9417_v53  ;;  %5129 = vmatpush.bf16.msrb.mxu2 %v9690_v52 }
  0xcd   :  { %v9673_v58 = vld [vmem:[#allocation5 + $0x16a0] sm:$0xf]  ;;  %v10925_v61 = vld [vmem:[#allocation5 + $0x17ac] sm:$0xf0]  ;;  %v9546_v63 = vor.u32 %v10861_v57, %v9545_v55  ;;  %5142 = vmatpush.bf16.msrb.mxu3 %v9818_v56 }
  0xce   :  { %v9801_v60 = vld [vmem:[#allocation5 + $0x17a0] sm:$0xf]  ;;  %v9674_v0 = vor.u32 %v10893_v59, %v9673_v58  ;;  %v10825_v2 = vld [vmem:[#allocation5 + $0x148c] sm:$0xf0]  ;;  %5104 = vmatpush.bf16.msrb.mxu0 %v9418_v62  ;;  %v4851_v57 = vpop.f32.mrf.mxu0 }
  0xcf   :  { %v9401_v1 = vld [vmem:[#allocation5 + $0x1480] sm:$0xf]  ;;  %v9802_v4 = vor.u32 %v10925_v61, %v9801_v60  ;;  %v10857_v5 = vld [vmem:[#allocation5 + $0x158c] sm:$0xf0]  ;;  %5117 = vmatpush.bf16.msrb.mxu1 %v9546_v63 }
  0xd0   :  { %v9529_v3 = vld [vmem:[#allocation5 + $0x1580] sm:$0xf]  ;;  %v10889_v7 = vld [vmem:[#allocation5 + $0x168c] sm:$0xf0]  ;;  %v9402_v10 = vor.u32 %v10825_v2, %v9401_v1  ;;  %5130 = vmatpush.bf16.msrb.mxu2 %v9674_v0  ;;  %v4864_v0 = vpop.f32.mrf.mxu1 }
  0xd1   :  { %v9657_v6 = vld [vmem:[#allocation5 + $0x1680] sm:$0xf]  ;;  %v10921_v9 = vld [vmem:[#allocation5 + $0x178c] sm:$0xf0]  ;;  %v9530_v12 = vor.u32 %v10857_v5, %v9529_v3  ;;  %5143 = vmatpush.bf16.msrb.mxu3 %v9802_v4 }
  0xd2   :  { %v9785_v8 = vld [vmem:[#allocation5 + $0x1780] sm:$0xf]  ;;  %v9658_v13 = vor.u32 %v10889_v7, %v9657_v6  ;;  %v10821_v14 = vld [vmem:[#allocation5 + $0x146c] sm:$0xf0]  ;;  %5105 = vmatpush.bf16.msrb.mxu0 %v9402_v10 }
  0xd3   :  { %v9385_v11 = vld [vmem:[#allocation5 + $0x1460] sm:$0xf]  ;;  %v10853_v16 = vld [vmem:[#allocation5 + $0x156c] sm:$0xf0]  ;;  %v9786_v17 = vor.u32 %v10921_v9, %v9785_v8  ;;  %5118 = vmatpush.bf16.msrb.mxu1 %v9530_v12 }
  0xd4   :  { %v9513_v15 = vld [vmem:[#allocation5 + $0x1560] sm:$0xf]  ;;  %v10885_v24 = vld [vmem:[#allocation5 + $0x166c] sm:$0xf0]  ;;  %v9386_v34 = vor.u32 %v10821_v14, %v9385_v11  ;;  %5131 = vmatpush.bf16.msrb.mxu2 %v9658_v13 }
  0xd5   :  { %v9641_v21 = vld [vmem:[#allocation5 + $0x1660] sm:$0xf]  ;;  %v10917_v32 = vld [vmem:[#allocation5 + $0x176c] sm:$0xf0]  ;;  %v9514_v39 = vor.u32 %v10853_v16, %v9513_v15  ;;  %5144 = vmatpush.bf16.msrb.mxu3 %v9786_v17 }
  0xd6   :  { %v908_v26 = vld [vmem:[#allocation7] sm:$0xf]  ;;  %v9642_v40 = vor.u32 %v10885_v24, %v9641_v21  ;;  %v10817_v43 = vld [vmem:[#allocation5 + $0x144c] sm:$0xf0]  ;;  %5106 = vmatpush.bf16.msrb.mxu0 %v9386_v34  ;;  %v4877_v21 = vpop.f32.mrf.mxu2 }
  0xd7   :  { %v9769_v27 = vld [vmem:[#allocation5 + $0x1760] sm:$0xf]  ;;  %v910_v48 = vperm.slane %v908_v26, 0  ;;  %v10849_v51 = vld [vmem:[#allocation5 + $0x154c] sm:$0xf0]  ;;  %5119 = vmatpush.bf16.msrb.mxu1 %v9514_v39 }
  0xd8   :  { %v9369_v36 = vld [vmem:[#allocation5 + $0x1440] sm:$0xf]  ;;  %v9770_v50 = vor.u32 %v10917_v32, %v9769_v27  ;;  %v10881_v53 = vld [vmem:[#allocation5 + $0x164c] sm:$0xf0]  ;;  %5132 = vmatpush.bf16.msrb.mxu2 %v9642_v40  ;;  %v139_v32 = vld [vmem:[#allocation2 + $0x58] sm:$0xff] }
  0xd9   :  { %v9497_v47 = vld [vmem:[#allocation5 + $0x1540] sm:$0xf]  ;;  %v10913_v55 = vld [vmem:[#allocation5 + $0x174c] sm:$0xf0]  ;;  %v9370_v56 = vor.u32 %v10817_v43, %v9369_v36  ;;  %v4852_v63 = vadd.f32 %v4851_v57, %v910_v48  ;;  %v4890_v36 = vpop.f32.mrf.mxu3  ;;  %v10195_v39 = vld [vmem:[#allocation5 + $0xe4] sm:$0xf] }
  0xda   :  { %v9625_v52 = vld [vmem:[#allocation5 + $0x1640] sm:$0xf]  ;;  %v9498_v58 = vor.u32 %v10849_v51, %v9497_v47  ;;  %v10813_v61 = vld [vmem:[#allocation5 + $0x142c] sm:$0xf0]  ;;  %5145 = vmatpush.bf16.msrb.mxu3 %v9770_v50  ;;  %v6891_v40 = vld [vmem:[#allocation5 + $0xf0] sm:$0xf0] }
  0xdb   :  { %v9753_v54 = vld [vmem:[#allocation5 + $0x1740] sm:$0xf]  ;;  %v9626_v59 = vor.u32 %v10881_v53, %v9625_v52  ;;  %v10845_v2 = vld [vmem:[#allocation5 + $0x152c] sm:$0xf0]  ;;  %v4865_v8 = vadd.f32 %v4864_v0, %v4852_v63  ;;  %5107 = vmatpush.bf16.msrb.mxu0 %v9370_v56  ;;  %v10227_v43 = vld [vmem:[#allocation5 + $0x1e4] sm:$0xf]  ;;  %v6894_v63 = vor.u32 %v10195_v39, %v6891_v40  ;;  %v953_v0 = vunpack.c.h.b16 %v139_v32 }
  0xdc   :  { %v9353_v60 = vld [vmem:[#allocation5 + $0x1420] sm:$0xf]  ;;  %v9754_v1 = vor.u32 %v10913_v55, %v9753_v54  ;;  %v10877_v4 = vld [vmem:[#allocation5 + $0x162c] sm:$0xf0]  ;;  %5120 = vmatpush.bf16.msrb.mxu1 %v9498_v58  ;;  %v7019_v48 = vld [vmem:[#allocation5 + $0x1f0] sm:$0xf0]  ;;  %v4853_v54 = vpop.f32.mrf.mxu0 }
  0xdd   :  { %v9481_v62 = vld [vmem:[#allocation5 + $0x1520] sm:$0xf]  ;;  %v10909_v6 = vld [vmem:[#allocation5 + $0x172c] sm:$0xf0]  ;;  %v9354_v9 = vor.u32 %v10813_v61, %v9353_v60  ;;  %5133 = vmatpush.bf16.msrb.mxu2 %v9626_v59  ;;  %v4878_v34 = vadd.f32 %v4877_v21, %v4865_v8  ;;  %v10259_v50 = vld [vmem:[#allocation5 + $0x2e4] sm:$0xf]  ;;  %v952_v59 = vunpack.c.l.b16 %v139_v32  ;;  %v4866_v61 = vpop.f32.mrf.mxu1 }
  0xde   :  { %v9609_v3 = vld [vmem:[#allocation5 + $0x1620] sm:$0xf]  ;;  %v10809_v10 = vld [vmem:[#allocation5 + $0x140c] sm:$0xf0]  ;;  %v9482_v13 = vor.u32 %v10845_v2, %v9481_v62  ;;  %5146 = vmatpush.bf16.msrb.mxu3 %v9754_v1  ;;  %v7147_v51 = vld [vmem:[#allocation5 + $0x2f0] sm:$0xf0]  ;;  %v7022_v1 = vor.u32 %v10227_v43, %v7019_v48 }
  0xdf   :  { %v9737_v5 = vld [vmem:[#allocation5 + $0x1720] sm:$0xf]  ;;  %v10841_v12 = vld [vmem:[#allocation5 + $0x150c] sm:$0xf0]  ;;  %v9610_v14 = vor.u32 %v10877_v4, %v9609_v3  ;;  %5108 = vmatpush.bf16.msrb.mxu0 %v9354_v9  ;;  %v11370_v53 = vadd.f32 %v4890_v36, %v4878_v34  ;;  %v10291_v57 = vld [vmem:[#allocation5 + $0x3e4] sm:$0xf]  ;;  %v7150_v2 = vor.u32 %v10259_v50, %v7147_v51 }
  0xe0   :  { %v9337_v7 = vld [vmem:[#allocation5 + $0x1400] sm:$0xf]  ;;  %v10873_v16 = vld [vmem:[#allocation5 + $0x160c] sm:$0xf0]  ;;  %v9738_v24 = vor.u32 %v10909_v6, %v9737_v5  ;;  %5121 = vmatpush.bf16.msrb.mxu1 %v9482_v13  ;;  %v7275_v58 = vld [vmem:[#allocation5 + $0x3f0] sm:$0xf0] }
  0xe1   :  { %v9465_v11 = vld [vmem:[#allocation5 + $0x1500] sm:$0xf]  ;;  %v138_v17 = vld [vmem:[#allocation2 + $0x50] sm:$0xff]  ;;  %v9338_v47 = vor.u32 %v10809_v10, %v9337_v7  ;;  %5134 = vmatpush.bf16.msrb.mxu2 %v9610_v14  ;;  %v10191_v3 = vld [vmem:[#allocation5 + $0xc4] sm:$0xf]  ;;  %v7278_v6 = vor.u32 %v10291_v57, %v7275_v58  ;;  %v4892_v21 = vpop.f32.mrf.mxu3 }
  0xe2   :  { %v9593_v15 = vld [vmem:[#allocation5 + $0x1600] sm:$0xf]  ;;  %v10905_v27 = vld [vmem:[#allocation5 + $0x170c] sm:$0xf0]  ;;  %v950_v52 = vunpack.c.l.b16 %v138_v17  ;;  %v9466_v55 = vor.u32 %v10841_v12, %v9465_v11  ;;  %v951_v60 = vunpack.c.h.b16 %v138_v17  ;;  %5147 = vmatpush.bf16.msrb.mxu3 %v9738_v24  ;;  %v6875_v4 = vld [vmem:[#allocation5 + $0xd0] sm:$0xf0]  ;;  %v11374_v11 = vpack.c.b16 %v952_v59, %v952_v59 }
  0xe3   :  { %v9721_v26 = vld [vmem:[#allocation5 + $0x1700] sm:$0xf]  ;;  %v9594_v56 = vor.u32 %v10873_v16, %v9593_v15  ;;  %v10223_v5 = vld [vmem:[#allocation5 + $0x1c4] sm:$0xf]  ;;  %5109 = vmatpush.bf16.msrb.mxu0 %v9338_v47  ;;  %v7003_v8 = vld [vmem:[#allocation5 + $0x1d0] sm:$0xf0]  ;;  %v4879_v15 = vpop.f32.mrf.mxu2  ;;  %v11378_v16 = vpack.c.b16 %v953_v0, %v953_v0  ;;  %v6878_v17 = vor.u32 %v10191_v3, %v6875_v4 }
  0xe4   :  { %v9722_v62 = vor.u32 %v10905_v27, %v9721_v26  ;;  %v11372_v7 = vpack.c.b16 %v950_v52, %v950_v52  ;;  %v10255_v9 = vld [vmem:[#allocation5 + $0x2c4] sm:$0xf]  ;;  %v7131_v10 = vld [vmem:[#allocation5 + $0x2d0] sm:$0xf0]  ;;  %5122 = vmatpush.bf16.msrb.mxu1 %v9466_v55  ;;  %v11376_v12 = vpack.c.b16 %v951_v60, %v951_v60  ;;  %v7006_v24 = vor.u32 %v10223_v5, %v7003_v8  ;;  %v4903_v0 = vpop.f32.mrf.mxu0 }
  0xe5   :  { %5135 = vmatpush.bf16.msrb.mxu2 %v9594_v56  ;;  %v10287_v13 = vld [vmem:[#allocation5 + $0x3c4] sm:$0xf]  ;;  %v7259_v14 = vld [vmem:[#allocation5 + $0x3d0] sm:$0xf0]  ;;  %v7134_v26 = vor.u32 %v10255_v9, %v7131_v10  ;;  %v4916_v8 = vpop.f32.mrf.mxu1 }
  0xe6   :  { %5148 = vmatpush.bf16.msrb.mxu3 %v9722_v62  ;;  %v10187_v27 = vld [vmem:[#allocation5 + $0xa4] sm:$0xf]  ;;  %v6859_v32 = vld [vmem:[#allocation5 + $0xb0] sm:$0xf0]  ;;  %5110 = vmatmul.bf16.vlgmr.msrb.gmra.mxu0 %v11372_v7  ;;  %v7262_v36 = vor.u32 %v10287_v13, %v7259_v14 }
  0xe7   :  { %5154 = vmatpush.bf16.msra.mxu0 %v6894_v63  ;;  %v10219_v34 = vld [vmem:[#allocation5 + $0x1a4] sm:$0xf]  ;;  %v6987_v39 = vld [vmem:[#allocation5 + $0x1b0] sm:$0xf0]  ;;  %5123 = vmatmul.bf16.vlgmr.msrb.gmra.mxu1 %v11376_v12  ;;  %v6862_v50 = vor.u32 %v10187_v27, %v6859_v32 }
  0xe8   :  { %5167 = vmatpush.bf16.msra.mxu1 %v7022_v1  ;;  %v10251_v40 = vld [vmem:[#allocation5 + $0x2a4] sm:$0xf]  ;;  %v7115_v43 = vld [vmem:[#allocation5 + $0x2b0] sm:$0xf0]  ;;  %5136 = vmatmul.bf16.vlgmr.msrb.gmra.mxu2 %v11374_v11  ;;  %v6990_v51 = vor.u32 %v10219_v34, %v6987_v39 }
  0xe9   :  { %5180 = vmatpush.bf16.msra.mxu2 %v7150_v2  ;;  %v10283_v47 = vld [vmem:[#allocation5 + $0x3a4] sm:$0xf]  ;;  %v7243_v48 = vld [vmem:[#allocation5 + $0x3b0] sm:$0xf0]  ;;  %5149 = vmatmul.bf16.vlgmr.msrb.gmra.mxu3 %v11378_v16  ;;  %v7118_v52 = vor.u32 %v10251_v40, %v7115_v43 }
  0xea   :  { %5193 = vmatpush.bf16.msra.mxu3 %v7278_v6  ;;  %v10183_v54 = vld [vmem:[#allocation5 + $0x84] sm:$0xf]  ;;  %v6843_v55 = vld [vmem:[#allocation5 + $0x90] sm:$0xf0]  ;;  %v7246_v57 = vor.u32 %v10283_v47, %v7243_v48  ;;  %v4904_v6 = vadd.f32 %v4903_v0, %v11370_v53 }
  0xeb   :  { %5155 = vmatpush.bf16.msra.mxu0 %v6878_v17  ;;  %v10215_v56 = vld [vmem:[#allocation5 + $0x184] sm:$0xf]  ;;  %v6971_v58 = vld [vmem:[#allocation5 + $0x190] sm:$0xf0]  ;;  %v6846_v63 = vor.u32 %v10183_v54, %v6843_v55  ;;  %v4929_v39 = vpop.f32.mrf.mxu2 }
  0xec   :  { %5168 = vmatpush.bf16.msra.mxu1 %v7006_v24  ;;  %v10247_v59 = vld [vmem:[#allocation5 + $0x284] sm:$0xf]  ;;  %v7099_v60 = vld [vmem:[#allocation5 + $0x290] sm:$0xf0]  ;;  %v6974_v1 = vor.u32 %v10215_v56, %v6971_v58  ;;  %v4917_v21 = vadd.f32 %v4916_v8, %v4904_v6  ;;  %v4905_v56 = vpop.f32.mrf.mxu0 }
  0xed   :  { %5181 = vmatpush.bf16.msra.mxu2 %v7134_v26  ;;  %v10279_v61 = vld [vmem:[#allocation5 + $0x384] sm:$0xf]  ;;  %v7227_v62 = vld [vmem:[#allocation5 + $0x390] sm:$0xf0]  ;;  %v7102_v2 = vor.u32 %v10247_v59, %v7099_v60 }
  0xee   :  { %5194 = vmatpush.bf16.msra.mxu3 %v7262_v36  ;;  %v10179_v3 = vld [vmem:[#allocation5 + $0x64] sm:$0xf]  ;;  %v6827_v4 = vld [vmem:[#allocation5 + $0x70] sm:$0xf0]  ;;  %v7230_v9 = vor.u32 %v10279_v61, %v7227_v62  ;;  %v4930_v48 = vadd.f32 %v4929_v39, %v4917_v21  ;;  %v4918_v62 = vpop.f32.mrf.mxu1 }
  0xef   :  { %5156 = vmatpush.bf16.msra.mxu0 %v6862_v50  ;;  %v10211_v5 = vld [vmem:[#allocation5 + $0x164] sm:$0xf]  ;;  %v6955_v10 = vld [vmem:[#allocation5 + $0x170] sm:$0xf0]  ;;  %v6830_v24 = vor.u32 %v10179_v3, %v6827_v4  ;;  %v4942_v50 = vpop.f32.mrf.mxu3 }
  0xf0   :  { %5169 = vmatpush.bf16.msra.mxu1 %v6990_v51  ;;  %v10243_v13 = vld [vmem:[#allocation5 + $0x264] sm:$0xf]  ;;  %v7083_v14 = vld [vmem:[#allocation5 + $0x270] sm:$0xf0]  ;;  %v6958_v26 = vor.u32 %v10211_v5, %v6955_v10  ;;  %v11385_v55 = vadd.f32 %v4942_v50, %v4930_v48 }
  0xf1   :  { %5182 = vmatpush.bf16.msra.mxu2 %v7118_v52  ;;  %v10275_v15 = vld [vmem:[#allocation5 + $0x364] sm:$0xf]  ;;  %v7211_v17 = vld [vmem:[#allocation5 + $0x370] sm:$0xf0]  ;;  %v7086_v27 = vor.u32 %v10243_v13, %v7083_v14 }
  0xf2   :  { %5195 = vmatpush.bf16.msra.mxu3 %v7246_v57  ;;  %v10175_v32 = vld [vmem:[#allocation5 + $0x44] sm:$0xf]  ;;  %v6811_v34 = vld [vmem:[#allocation5 + $0x50] sm:$0xf0]  ;;  %v7214_v53 = vor.u32 %v10275_v15, %v7211_v17 }
  0xf3   :  { %5157 = vmatpush.bf16.msra.mxu0 %v6846_v63  ;;  %v10207_v36 = vld [vmem:[#allocation5 + $0x144] sm:$0xf]  ;;  %v6939_v40 = vld [vmem:[#allocation5 + $0x150] sm:$0xf0]  ;;  %v6814_v54 = vor.u32 %v10175_v32, %v6811_v34  ;;  %v4931_v17 = vpop.f32.mrf.mxu2 }
  0xf4   :  { %5170 = vmatpush.bf16.msra.mxu1 %v6974_v1  ;;  %v10239_v43 = vld [vmem:[#allocation5 + $0x244] sm:$0xf]  ;;  %v7067_v47 = vld [vmem:[#allocation5 + $0x250] sm:$0xf0]  ;;  %v6942_v57 = vor.u32 %v10207_v36, %v6939_v40 }
  0xf5   :  { %5183 = vmatpush.bf16.msra.mxu2 %v7102_v2  ;;  %v10271_v51 = vld [vmem:[#allocation5 + $0x344] sm:$0xf]  ;;  %v7195_v52 = vld [vmem:[#allocation5 + $0x350] sm:$0xf0]  ;;  %v7070_v58 = vor.u32 %v10239_v43, %v7067_v47 }
  0xf6   :  { %5196 = vmatpush.bf16.msra.mxu3 %v7230_v9  ;;  %v10171_v59 = vld [vmem:[#allocation5 + $0x24] sm:$0xf]  ;;  %v6795_v60 = vld [vmem:[#allocation5 + $0x30] sm:$0xf0]  ;;  %v7198_v63 = vor.u32 %v10271_v51, %v7195_v52 }
  0xf7   :  { %5158 = vmatpush.bf16.msra.mxu0 %v6830_v24  ;;  %v10203_v61 = vld [vmem:[#allocation5 + $0x124] sm:$0xf]  ;;  %v6923_v0 = vld [vmem:[#allocation5 + $0x130] sm:$0xf0]  ;;  %v6798_v5 = vor.u32 %v10171_v59, %v6795_v60  ;;  %v4944_v32 = vpop.f32.mrf.mxu3 }
  0xf8   :  { %5171 = vmatpush.bf16.msra.mxu1 %v6958_v26  ;;  %v10235_v1 = vld [vmem:[#allocation5 + $0x224] sm:$0xf]  ;;  %v7051_v2 = vld [vmem:[#allocation5 + $0x230] sm:$0xf0]  ;;  %v6926_v9 = vor.u32 %v10203_v61, %v6923_v0 }
  0xf9   :  { %5184 = vmatpush.bf16.msra.mxu2 %v7086_v27  ;;  %v10267_v3 = vld [vmem:[#allocation5 + $0x324] sm:$0xf]  ;;  %v7179_v4 = vld [vmem:[#allocation5 + $0x330] sm:$0xf0]  ;;  %v7054_v10 = vor.u32 %v10235_v1, %v7051_v2 }
  0xfa   :  { %5197 = vmatpush.bf16.msra.mxu3 %v7214_v53  ;;  %v10167_v6 = vld [vmem:[#allocation5 + $0x4] sm:$0xf]  ;;  %v6779_v8 = vld [vmem:[#allocation5 + $0x10] sm:$0xf0]  ;;  %v7182_v21 = vor.u32 %v10267_v3, %v7179_v4 }
  0xfb   :  { %5159 = vmatpush.bf16.msra.mxu0 %v6814_v54  ;;  %v10199_v13 = vld [vmem:[#allocation5 + $0x104] sm:$0xf]  ;;  %v6907_v14 = vld [vmem:[#allocation5 + $0x110] sm:$0xf0]  ;;  %v6782_v53 = vor.u32 %v10167_v6, %v6779_v8 }
  0xfc   :  { %5172 = vmatpush.bf16.msra.mxu1 %v6942_v57  ;;  %v10231_v15 = vld [vmem:[#allocation5 + $0x204] sm:$0xf]  ;;  %v7035_v24 = vld [vmem:[#allocation5 + $0x210] sm:$0xf0]  ;;  %v6910_v48 = vor.u32 %v10199_v13, %v6907_v14 }
  0xfd   :  { %5185 = vmatpush.bf16.msra.mxu2 %v7070_v58  ;;  %v10263_v26 = vld [vmem:[#allocation5 + $0x304] sm:$0xf]  ;;  %v7163_v27 = vld [vmem:[#allocation5 + $0x310] sm:$0xf0]  ;;  %v7038_v50 = vor.u32 %v10231_v15, %v7035_v24 }
  0xfe   :  { %5198 = vmatpush.bf16.msra.mxu3 %v7198_v63  ;;  %v10323_v34 = vld [vmem:[#allocation5 + $0x4e4] sm:$0xf]  ;;  %v7403_v36 = vld [vmem:[#allocation5 + $0x4f0] sm:$0xf0]  ;;  %v7166_v54 = vor.u32 %v10263_v26, %v7163_v27 }
  0xff   :  { %v10355_v39 = vld [vmem:[#allocation5 + $0x5e4] sm:$0xf]  ;;  %5160 = vmatpush.bf16.msra.mxu0 %v6798_v5  ;;  %v7531_v40 = vld [vmem:[#allocation5 + $0x5f0] sm:$0xf0]  ;;  %v7406_v56 = vor.u32 %v10323_v34, %v7403_v36 }
 0x100   :  { %v10387_v43 = vld [vmem:[#allocation5 + $0x6e4] sm:$0xf]  ;;  %v7659_v47 = vld [vmem:[#allocation5 + $0x6f0] sm:$0xf0]  ;;  %5173 = vmatpush.bf16.msra.mxu1 %v6926_v9  ;;  %v7534_v57 = vor.u32 %v10355_v39, %v7531_v40 }
 0x101   :  { %5186 = vmatpush.bf16.msra.mxu2 %v7054_v10  ;;  %v10419_v51 = vld [vmem:[#allocation5 + $0x7e4] sm:$0xf]  ;;  %v7787_v52 = vld [vmem:[#allocation5 + $0x7f0] sm:$0xf0]  ;;  %v7662_v58 = vor.u32 %v10387_v43, %v7659_v47 }
 0x102   :  { %5199 = vmatpush.bf16.msra.mxu3 %v7182_v21  ;;  %v10319_v59 = vld [vmem:[#allocation5 + $0x4c4] sm:$0xf]  ;;  %v7387_v60 = vld [vmem:[#allocation5 + $0x4d0] sm:$0xf0]  ;;  %v7790_v62 = vor.u32 %v10419_v51, %v7787_v52 }
 0x103   :  { %v10351_v61 = vld [vmem:[#allocation5 + $0x5c4] sm:$0xf]  ;;  %5161 = vmatpush.bf16.msra.mxu0 %v6782_v53  ;;  %v7515_v63 = vld [vmem:[#allocation5 + $0x5d0] sm:$0xf0]  ;;  %v7390_v4 = vor.u32 %v10319_v59, %v7387_v60 }
 0x104   :  { %v10383_v0 = vld [vmem:[#allocation5 + $0x6c4] sm:$0xf]  ;;  %v7643_v1 = vld [vmem:[#allocation5 + $0x6d0] sm:$0xf0]  ;;  %5174 = vmatpush.bf16.msra.mxu1 %v6910_v48  ;;  %v7518_v5 = vor.u32 %v10351_v61, %v7515_v63  ;;  %v4955_v48 = vpop.f32.mrf.mxu0 }
 0x105   :  { %5187 = vmatpush.bf16.msra.mxu2 %v7038_v50  ;;  %v10415_v2 = vld [vmem:[#allocation5 + $0x7c4] sm:$0xf]  ;;  %v7771_v3 = vld [vmem:[#allocation5 + $0x7d0] sm:$0xf0]  ;;  %v7646_v6 = vor.u32 %v10383_v0, %v7643_v1  ;;  %v4956_v52 = vadd.f32 %v4955_v48, %v11385_v55 }
 0x106   :  { %5200 = vmatpush.bf16.msra.mxu3 %v7166_v54  ;;  %v10315_v8 = vld [vmem:[#allocation5 + $0x4a4] sm:$0xf]  ;;  %v7371_v9 = vld [vmem:[#allocation5 + $0x4b0] sm:$0xf0]  ;;  %v7774_v13 = vor.u32 %v10415_v2, %v7771_v3  ;;  %5162 = vmatmul.bf16.vlgmr.msra.gmra.mxu0 %v11312_v19 }
 0x107   :  { %5206 = vmatpush.bf16.msrb.mxu0 %v7406_v56  ;;  %v10347_v10 = vld [vmem:[#allocation5 + $0x5a4] sm:$0xf]  ;;  %v7499_v14 = vld [vmem:[#allocation5 + $0x5b0] sm:$0xf0]  ;;  %v7374_v26 = vor.u32 %v10315_v8, %v7371_v9  ;;  %5175 = vmatmul.bf16.vlgmr.msra.gmra.mxu1 %v11316_v22  ;;  %v4968_v56 = vpop.f32.mrf.mxu1 }
 0x108   :  { %5219 = vmatpush.bf16.msrb.mxu1 %v7534_v57  ;;  %v10379_v15 = vld [vmem:[#allocation5 + $0x6a4] sm:$0xf]  ;;  %v7627_v17 = vld [vmem:[#allocation5 + $0x6b0] sm:$0xf0]  ;;  %5188 = vmatmul.bf16.vlgmr.msra.gmra.mxu2 %v11310_v18  ;;  %v7502_v27 = vor.u32 %v10347_v10, %v7499_v14  ;;  %v4969_v63 = vadd.f32 %v4968_v56, %v4956_v52  ;;  %v4981_v14 = vpop.f32.mrf.mxu2 }
 0x109   :  { %5232 = vmatpush.bf16.msrb.mxu2 %v7662_v58  ;;  %v10411_v21 = vld [vmem:[#allocation5 + $0x7a4] sm:$0xf]  ;;  %v7755_v24 = vld [vmem:[#allocation5 + $0x7b0] sm:$0xf0]  ;;  %5201 = vmatmul.bf16.vlgmr.msra.gmra.mxu3 %v11314_v20  ;;  %v7630_v32 = vor.u32 %v10379_v15, %v7627_v17 }
 0x10a   :  { %5245 = vmatpush.bf16.msrb.mxu3 %v7790_v62  ;;  %v10311_v34 = vld [vmem:[#allocation5 + $0x484] sm:$0xf]  ;;  %v7355_v36 = vld [vmem:[#allocation5 + $0x490] sm:$0xf0]  ;;  %v7758_v53 = vor.u32 %v10411_v21, %v7755_v24  ;;  %v4982_v24 = vadd.f32 %v4981_v14, %v4969_v63 }
 0x10b   :  { %5207 = vmatpush.bf16.msrb.mxu0 %v7390_v4  ;;  %v10343_v39 = vld [vmem:[#allocation5 + $0x584] sm:$0xf]  ;;  %v7483_v40 = vld [vmem:[#allocation5 + $0x590] sm:$0xf0]  ;;  %v7358_v54 = vor.u32 %v10311_v34, %v7355_v36 }
 0x10c   :  { %5220 = vmatpush.bf16.msrb.mxu1 %v7518_v5  ;;  %v10375_v43 = vld [vmem:[#allocation5 + $0x684] sm:$0xf]  ;;  %v7611_v47 = vld [vmem:[#allocation5 + $0x690] sm:$0xf0]  ;;  %v7486_v57 = vor.u32 %v10343_v39, %v7483_v40  ;;  %v4957_v34 = vpop.f32.mrf.mxu0 }
 0x10d   :  { %5233 = vmatpush.bf16.msrb.mxu2 %v7646_v6  ;;  %v10407_v50 = vld [vmem:[#allocation5 + $0x784] sm:$0xf]  ;;  %v7739_v51 = vld [vmem:[#allocation5 + $0x790] sm:$0xf0]  ;;  %v7614_v58 = vor.u32 %v10375_v43, %v7611_v47 }
 0x10e   :  { %5246 = vmatpush.bf16.msrb.mxu3 %v7774_v13  ;;  %v10307_v59 = vld [vmem:[#allocation5 + $0x464] sm:$0xf]  ;;  %v7339_v60 = vld [vmem:[#allocation5 + $0x470] sm:$0xf0]  ;;  %v7742_v62 = vor.u32 %v10407_v50, %v7739_v51 }
 0x10f   :  { %5208 = vmatpush.bf16.msrb.mxu0 %v7374_v26  ;;  %v10339_v61 = vld [vmem:[#allocation5 + $0x564] sm:$0xf]  ;;  %v7467_v0 = vld [vmem:[#allocation5 + $0x570] sm:$0xf0]  ;;  %v7342_v5 = vor.u32 %v10307_v59, %v7339_v60  ;;  %v4994_v26 = vpop.f32.mrf.mxu3  ;;  %v4970_v39 = vpop.f32.mrf.mxu1 }
 0x110   :  { %5221 = vmatpush.bf16.msrb.mxu1 %v7502_v27  ;;  %v10371_v1 = vld [vmem:[#allocation5 + $0x664] sm:$0xf]  ;;  %v7595_v2 = vld [vmem:[#allocation5 + $0x670] sm:$0xf0]  ;;  %v7470_v55 = vor.u32 %v10339_v61, %v7467_v0 }
 0x111   :  { %5234 = vmatpush.bf16.msrb.mxu2 %v7630_v32  ;;  %v10403_v3 = vld [vmem:[#allocation5 + $0x764] sm:$0xf]  ;;  %v7723_v4 = vld [vmem:[#allocation5 + $0x770] sm:$0xf0]  ;;  %v7598_v6 = vor.u32 %v10371_v1, %v7595_v2 }
 0x112   :  { %5247 = vmatpush.bf16.msrb.mxu3 %v7758_v53  ;;  %v10303_v8 = vld [vmem:[#allocation5 + $0x444] sm:$0xf]  ;;  %v7323_v9 = vld [vmem:[#allocation5 + $0x450] sm:$0xf0]  ;;  %v7726_v13 = vor.u32 %v10403_v3, %v7723_v4  ;;  %v11392_v53 = vadd.f32 %v4994_v26, %v4982_v24 }
 0x113   :  { %5209 = vmatpush.bf16.msrb.mxu0 %v7358_v54  ;;  %v10335_v10 = vld [vmem:[#allocation5 + $0x544] sm:$0xf]  ;;  %v7451_v15 = vld [vmem:[#allocation5 + $0x550] sm:$0xf0]  ;;  %v7326_v36 = vor.u32 %v10303_v8, %v7323_v9 }
 0x114   :  { %5222 = vmatpush.bf16.msrb.mxu1 %v7486_v57  ;;  %v10367_v17 = vld [vmem:[#allocation5 + $0x644] sm:$0xf]  ;;  %v7579_v21 = vld [vmem:[#allocation5 + $0x650] sm:$0xf0]  ;;  %v7454_v40 = vor.u32 %v10335_v10, %v7451_v15 }
 0x115   :  { %5235 = vmatpush.bf16.msrb.mxu2 %v7614_v58  ;;  %v10399_v27 = vld [vmem:[#allocation5 + $0x744] sm:$0xf]  ;;  %v7707_v32 = vld [vmem:[#allocation5 + $0x750] sm:$0xf0]  ;;  %v7582_v43 = vor.u32 %v10367_v17, %v7579_v21 }
 0x116   :  { %5248 = vmatpush.bf16.msrb.mxu3 %v7742_v62  ;;  %v10299_v47 = vld [vmem:[#allocation5 + $0x424] sm:$0xf]  ;;  %v7307_v48 = vld [vmem:[#allocation5 + $0x430] sm:$0xf0]  ;;  %v7710_v51 = vor.u32 %v10399_v27, %v7707_v32 }
 0x117   :  { %5210 = vmatpush.bf16.msrb.mxu0 %v7342_v5  ;;  %v10331_v50 = vld [vmem:[#allocation5 + $0x524] sm:$0xf]  ;;  %v7435_v52 = vld [vmem:[#allocation5 + $0x530] sm:$0xf0]  ;;  %v7310_v59 = vor.u32 %v10299_v47, %v7307_v48 }
 0x118   :  { %5223 = vmatpush.bf16.msrb.mxu1 %v7470_v55  ;;  %v10363_v54 = vld [vmem:[#allocation5 + $0x624] sm:$0xf]  ;;  %v7563_v56 = vld [vmem:[#allocation5 + $0x630] sm:$0xf0]  ;;  %v7438_v62 = vor.u32 %v10331_v50, %v7435_v52 }
 0x119   :  { %5236 = vmatpush.bf16.msrb.mxu2 %v7598_v6  ;;  %v10395_v57 = vld [vmem:[#allocation5 + $0x724] sm:$0xf]  ;;  %v7691_v58 = vld [vmem:[#allocation5 + $0x730] sm:$0xf0]  ;;  %v7566_v63 = vor.u32 %v10363_v54, %v7563_v56  ;;  %v4983_v6 = vpop.f32.mrf.mxu2 }
 0x11a   :  { %5249 = vmatpush.bf16.msrb.mxu3 %v7726_v13  ;;  %v10295_v60 = vld [vmem:[#allocation5 + $0x404] sm:$0xf]  ;;  %v7291_v61 = vld [vmem:[#allocation5 + $0x410] sm:$0xf0]  ;;  %v7694_v3 = vor.u32 %v10395_v57, %v7691_v58  ;;  %v4996_v13 = vpop.f32.mrf.mxu3 }
 0x11b   :  { %5211 = vmatpush.bf16.msrb.mxu0 %v7326_v36  ;;  %v10327_v0 = vld [vmem:[#allocation5 + $0x504] sm:$0xf]  ;;  %v7419_v1 = vld [vmem:[#allocation5 + $0x510] sm:$0xf0]  ;;  %v7294_v14 = vor.u32 %v10295_v60, %v7291_v61 }
 0x11c   :  { %5224 = vmatpush.bf16.msrb.mxu1 %v7454_v40  ;;  %v10359_v2 = vld [vmem:[#allocation5 + $0x604] sm:$0xf]  ;;  %v7547_v4 = vld [vmem:[#allocation5 + $0x610] sm:$0xf0]  ;;  %v7422_v24 = vor.u32 %v10327_v0, %v7419_v1 }
 0x11d   :  { %5237 = vmatpush.bf16.msrb.mxu2 %v7582_v43  ;;  %v10391_v5 = vld [vmem:[#allocation5 + $0x704] sm:$0xf]  ;;  %v7675_v55 = vld [vmem:[#allocation5 + $0x710] sm:$0xf0]  ;;  %v7550_v26 = vor.u32 %v10359_v2, %v7547_v4 }
 0x11e   :  { %5250 = vmatpush.bf16.msrb.mxu3 %v7710_v51  ;;  %v10451_v8 = vld [vmem:[#allocation5 + $0x8e4] sm:$0xf]  ;;  %v7915_v9 = vld [vmem:[#allocation5 + $0x8f0] sm:$0xf0]  ;;  %v7678_v34 = vor.u32 %v10391_v5, %v7675_v55 }
 0x11f   :  { %v10483_v10 = vld [vmem:[#allocation5 + $0x9e4] sm:$0xf]  ;;  %5212 = vmatpush.bf16.msrb.mxu0 %v7310_v59  ;;  %v8043_v15 = vld [vmem:[#allocation5 + $0x9f0] sm:$0xf0]  ;;  %v7918_v36 = vor.u32 %v10451_v8, %v7915_v9 }
 0x120   :  { %v10515_v17 = vld [vmem:[#allocation5 + $0xae4] sm:$0xf]  ;;  %v8171_v21 = vld [vmem:[#allocation5 + $0xaf0] sm:$0xf0]  ;;  %5225 = vmatpush.bf16.msrb.mxu1 %v7438_v62  ;;  %v8046_v39 = vor.u32 %v10483_v10, %v8043_v15 }
 0x121   :  { %5238 = vmatpush.bf16.msrb.mxu2 %v7566_v63  ;;  %v10547_v27 = vld [vmem:[#allocation5 + $0xbe4] sm:$0xf]  ;;  %v8299_v32 = vld [vmem:[#allocation5 + $0xbf0] sm:$0xf0]  ;;  %v8174_v40 = vor.u32 %v10515_v17, %v8171_v21 }
 0x122   :  { %5251 = vmatpush.bf16.msrb.mxu3 %v7694_v3  ;;  %v10447_v43 = vld [vmem:[#allocation5 + $0x8c4] sm:$0xf]  ;;  %v7899_v47 = vld [vmem:[#allocation5 + $0x8d0] sm:$0xf0]  ;;  %v8302_v50 = vor.u32 %v10547_v27, %v8299_v32 }
 0x123   :  { %v10479_v48 = vld [vmem:[#allocation5 + $0x9c4] sm:$0xf]  ;;  %5213 = vmatpush.bf16.msrb.mxu0 %v7294_v14  ;;  %v8027_v51 = vld [vmem:[#allocation5 + $0x9d0] sm:$0xf0]  ;;  %v7902_v58 = vor.u32 %v10447_v43, %v7899_v47 }
 0x124   :  { %v10511_v52 = vld [vmem:[#allocation5 + $0xac4] sm:$0xf]  ;;  %v8155_v54 = vld [vmem:[#allocation5 + $0xad0] sm:$0xf0]  ;;  %5226 = vmatpush.bf16.msrb.mxu1 %v7422_v24  ;;  %v8030_v59 = vor.u32 %v10479_v48, %v8027_v51  ;;  %v5007_v24 = vpop.f32.mrf.mxu0 }
 0x125   :  { %5239 = vmatpush.bf16.msrb.mxu2 %v7550_v26  ;;  %v10543_v56 = vld [vmem:[#allocation5 + $0xbc4] sm:$0xf]  ;;  %v8283_v57 = vld [vmem:[#allocation5 + $0xbd0] sm:$0xf0]  ;;  %v8158_v60 = vor.u32 %v10511_v52, %v8155_v54  ;;  %v5008_v32 = vadd.f32 %v5007_v24, %v11392_v53 }
 0x126   :  { %5252 = vmatpush.bf16.msrb.mxu3 %v7678_v34  ;;  %v10443_v61 = vld [vmem:[#allocation5 + $0x8a4] sm:$0xf]  ;;  %v7883_v62 = vld [vmem:[#allocation5 + $0x8b0] sm:$0xf0]  ;;  %v8286_v0 = vor.u32 %v10543_v56, %v8283_v57  ;;  %5214 = vmatmul.bf16.vlgmr.msrb.gmra.mxu0 %v11324_v41 }
 0x127   :  { %5258 = vmatpush.bf16.msra.mxu0 %v7918_v36  ;;  %v10475_v63 = vld [vmem:[#allocation5 + $0x9a4] sm:$0xf]  ;;  %v8011_v1 = vld [vmem:[#allocation5 + $0x9b0] sm:$0xf0]  ;;  %v7886_v55 = vor.u32 %v10443_v61, %v7883_v62  ;;  %5227 = vmatmul.bf16.vlgmr.msrb.gmra.mxu1 %v11328_v44  ;;  %v5020_v36 = vpop.f32.mrf.mxu1 }
 0x128   :  { %5271 = vmatpush.bf16.msra.mxu1 %v8046_v39  ;;  %5240 = vmatmul.bf16.vlgmr.msrb.gmra.mxu2 %v11322_v38  ;;  %v10507_v2 = vld [vmem:[#allocation5 + $0xaa4] sm:$0xf]  ;;  %v8139_v3 = vld [vmem:[#allocation5 + $0xab0] sm:$0xf0]  ;;  %v8014_v6 = vor.u32 %v10475_v63, %v8011_v1  ;;  %v5021_v51 = vadd.f32 %v5020_v36, %v5008_v32 }
 0x129   :  { %5284 = vmatpush.bf16.msra.mxu2 %v8174_v40  ;;  %v10539_v4 = vld [vmem:[#allocation5 + $0xba4] sm:$0xf]  ;;  %v8267_v5 = vld [vmem:[#allocation5 + $0xbb0] sm:$0xf0]  ;;  %5253 = vmatmul.bf16.vlgmr.msrb.gmra.mxu3 %v11326_v42  ;;  %v8142_v8 = vor.u32 %v10507_v2, %v8139_v3 }
 0x12a   :  { %5297 = vmatpush.bf16.msra.mxu3 %v8302_v50  ;;  %v10439_v9 = vld [vmem:[#allocation5 + $0x884] sm:$0xf]  ;;  %v7867_v10 = vld [vmem:[#allocation5 + $0x890] sm:$0xf0]  ;;  %v8270_v14 = vor.u32 %v10539_v4, %v8267_v5 }
 0x12b   :  { %5259 = vmatpush.bf16.msra.mxu0 %v7902_v58  ;;  %v10471_v13 = vld [vmem:[#allocation5 + $0x984] sm:$0xf]  ;;  %v7995_v15 = vld [vmem:[#allocation5 + $0x990] sm:$0xf0]  ;;  %v7870_v34 = vor.u32 %v10439_v9, %v7867_v10  ;;  %v5033_v1 = vpop.f32.mrf.mxu2 }
 0x12c   :  { %5272 = vmatpush.bf16.msra.mxu1 %v8030_v59  ;;  %v10503_v17 = vld [vmem:[#allocation5 + $0xa84] sm:$0xf]  ;;  %v8123_v21 = vld [vmem:[#allocation5 + $0xa90] sm:$0xf0]  ;;  %v7998_v39 = vor.u32 %v10471_v13, %v7995_v15  ;;  %v5034_v5 = vadd.f32 %v5033_v1, %v5021_v51  ;;  %v5009_v9 = vpop.f32.mrf.mxu0 }
 0x12d   :  { %5285 = vmatpush.bf16.msra.mxu2 %v8158_v60  ;;  %v10535_v26 = vld [vmem:[#allocation5 + $0xb84] sm:$0xf]  ;;  %v8251_v27 = vld [vmem:[#allocation5 + $0xb90] sm:$0xf0]  ;;  %v8126_v40 = vor.u32 %v10503_v17, %v8123_v21 }
 0x12e   :  { %5298 = vmatpush.bf16.msra.mxu3 %v8286_v0  ;;  %v10435_v43 = vld [vmem:[#allocation5 + $0x864] sm:$0xf]  ;;  %v7851_v47 = vld [vmem:[#allocation5 + $0x870] sm:$0xf0]  ;;  %v8254_v50 = vor.u32 %v10535_v26, %v8251_v27 }
 0x12f   :  { %5260 = vmatpush.bf16.msra.mxu0 %v7886_v55  ;;  %v10467_v48 = vld [vmem:[#allocation5 + $0x964] sm:$0xf]  ;;  %v7979_v52 = vld [vmem:[#allocation5 + $0x970] sm:$0xf0]  ;;  %v7854_v59 = vor.u32 %v10435_v43, %v7851_v47  ;;  %v5046_v55 = vpop.f32.mrf.mxu3  ;;  %v5022_v13 = vpop.f32.mrf.mxu1 }
 0x130   :  { %5273 = vmatpush.bf16.msra.mxu1 %v8014_v6  ;;  %v10499_v54 = vld [vmem:[#allocation5 + $0xa64] sm:$0xf]  ;;  %v8107_v56 = vld [vmem:[#allocation5 + $0xa70] sm:$0xf0]  ;;  %v7982_v53 = vor.u32 %v10467_v48, %v7979_v52 }
 0x131   :  { %5286 = vmatpush.bf16.msra.mxu2 %v8142_v8  ;;  %v10531_v57 = vld [vmem:[#allocation5 + $0xb64] sm:$0xf]  ;;  %v8235_v58 = vld [vmem:[#allocation5 + $0xb70] sm:$0xf0]  ;;  %v8110_v60 = vor.u32 %v10499_v54, %v8107_v56 }
 0x132   :  { %5299 = vmatpush.bf16.msra.mxu3 %v8270_v14  ;;  %v10431_v61 = vld [vmem:[#allocation5 + $0x844] sm:$0xf]  ;;  %v7835_v62 = vld [vmem:[#allocation5 + $0x850] sm:$0xf0]  ;;  %v8238_v0 = vor.u32 %v10531_v57, %v8235_v58  ;;  %v11399_v14 = vadd.f32 %v5046_v55, %v5034_v5 }
 0x133   :  { %5261 = vmatpush.bf16.msra.mxu0 %v7870_v34  ;;  %v10463_v63 = vld [vmem:[#allocation5 + $0x944] sm:$0xf]  ;;  %v7963_v2 = vld [vmem:[#allocation5 + $0x950] sm:$0xf0]  ;;  %v7838_v10 = vor.u32 %v10431_v61, %v7835_v62 }
 0x134   :  { %5274 = vmatpush.bf16.msra.mxu1 %v7998_v39  ;;  %v10495_v3 = vld [vmem:[#allocation5 + $0xa44] sm:$0xf]  ;;  %v8091_v4 = vld [vmem:[#allocation5 + $0xa50] sm:$0xf0]  ;;  %v7966_v15 = vor.u32 %v10463_v63, %v7963_v2 }
 0x135   :  { %5287 = vmatpush.bf16.msra.mxu2 %v8126_v40  ;;  %v10527_v6 = vld [vmem:[#allocation5 + $0xb44] sm:$0xf]  ;;  %v8219_v8 = vld [vmem:[#allocation5 + $0xb50] sm:$0xf0]  ;;  %v8094_v17 = vor.u32 %v10495_v3, %v8091_v4 }
 0x136   :  { %5300 = vmatpush.bf16.msra.mxu3 %v8254_v50  ;;  %v10427_v21 = vld [vmem:[#allocation5 + $0x824] sm:$0xf]  ;;  %v7819_v24 = vld [vmem:[#allocation5 + $0x830] sm:$0xf0]  ;;  %v8222_v27 = vor.u32 %v10527_v6, %v8219_v8 }
 0x137   :  { %5262 = vmatpush.bf16.msra.mxu0 %v7854_v59  ;;  %v10459_v26 = vld [vmem:[#allocation5 + $0x924] sm:$0xf]  ;;  %v7947_v32 = vld [vmem:[#allocation5 + $0x930] sm:$0xf0]  ;;  %v7822_v43 = vor.u32 %v10427_v21, %v7819_v24 }
 0x138   :  { %5275 = vmatpush.bf16.msra.mxu1 %v7982_v53  ;;  %v10491_v34 = vld [vmem:[#allocation5 + $0xa24] sm:$0xf]  ;;  %v8075_v36 = vld [vmem:[#allocation5 + $0xa30] sm:$0xf0]  ;;  %v7950_v50 = vor.u32 %v10459_v26, %v7947_v32 }
 0x139   :  { %5288 = vmatpush.bf16.msra.mxu2 %v8110_v60  ;;  %v10523_v39 = vld [vmem:[#allocation5 + $0xb24] sm:$0xf]  ;;  %v8203_v40 = vld [vmem:[#allocation5 + $0xb30] sm:$0xf0]  ;;  %v8078_v51 = vor.u32 %v10491_v34, %v8075_v36  ;;  %v5035_v60 = vpop.f32.mrf.mxu2 }
 0x13a   :  { %5301 = vmatpush.bf16.msra.mxu3 %v8238_v0  ;;  %v10423_v47 = vld [vmem:[#allocation5 + $0x804] sm:$0xf]  ;;  %v7803_v48 = vld [vmem:[#allocation5 + $0x810] sm:$0xf0]  ;;  %v8206_v57 = vor.u32 %v10523_v39, %v8203_v40  ;;  %v5048_v0 = vpop.f32.mrf.mxu3 }
 0x13b   :  { %5263 = vmatpush.bf16.msra.mxu0 %v7838_v10  ;;  %v10455_v52 = vld [vmem:[#allocation5 + $0x904] sm:$0xf]  ;;  %v7931_v54 = vld [vmem:[#allocation5 + $0x910] sm:$0xf0]  ;;  %v7806_v1 = vor.u32 %v10423_v47, %v7803_v48 }
 0x13c   :  { %5276 = vmatpush.bf16.msra.mxu1 %v7966_v15  ;;  %v10487_v56 = vld [vmem:[#allocation5 + $0xa04] sm:$0xf]  ;;  %v8059_v58 = vld [vmem:[#allocation5 + $0xa10] sm:$0xf0]  ;;  %v7934_v5 = vor.u32 %v10455_v52, %v7931_v54 }
 0x13d   :  { %5289 = vmatpush.bf16.msra.mxu2 %v8094_v17  ;;  %v10519_v59 = vld [vmem:[#allocation5 + $0xb04] sm:$0xf]  ;;  %v8187_v53 = vld [vmem:[#allocation5 + $0xb10] sm:$0xf0]  ;;  %v8062_v55 = vor.u32 %v10487_v56, %v8059_v58 }
 0x13e   :  { %5302 = vmatpush.bf16.msra.mxu3 %v8222_v27  ;;  %v10579_v61 = vld [vmem:[#allocation5 + $0xce4] sm:$0xf]  ;;  %v8427_v62 = vld [vmem:[#allocation5 + $0xcf0] sm:$0xf0]  ;;  %v8190_v9 = vor.u32 %v10519_v59, %v8187_v53 }
 0x13f   :  { %v10611_v63 = vld [vmem:[#allocation5 + $0xde4] sm:$0xf]  ;;  %5264 = vmatpush.bf16.msra.mxu0 %v7822_v43  ;;  %v8555_v2 = vld [vmem:[#allocation5 + $0xdf0] sm:$0xf0]  ;;  %v8430_v10 = vor.u32 %v10579_v61, %v8427_v62 }
 0x140   :  { %v10643_v3 = vld [vmem:[#allocation5 + $0xee4] sm:$0xf]  ;;  %v8683_v4 = vld [vmem:[#allocation5 + $0xef0] sm:$0xf0]  ;;  %5277 = vmatpush.bf16.msra.mxu1 %v7950_v50  ;;  %v8558_v13 = vor.u32 %v10611_v63, %v8555_v2 }
 0x141   :  { %5290 = vmatpush.bf16.msra.mxu2 %v8078_v51  ;;  %v10675_v6 = vld [vmem:[#allocation5 + $0xfe4] sm:$0xf]  ;;  %v8811_v8 = vld [vmem:[#allocation5 + $0xff0] sm:$0xf0]  ;;  %v8686_v15 = vor.u32 %v10643_v3, %v8683_v4 }
 0x142   :  { %5303 = vmatpush.bf16.msra.mxu3 %v8206_v57  ;;  %v10575_v17 = vld [vmem:[#allocation5 + $0xcc4] sm:$0xf]  ;;  %v8411_v21 = vld [vmem:[#allocation5 + $0xcd0] sm:$0xf0]  ;;  %v8814_v26 = vor.u32 %v10675_v6, %v8811_v8 }
 0x143   :  { %v10607_v24 = vld [vmem:[#allocation5 + $0xdc4] sm:$0xf]  ;;  %5265 = vmatpush.bf16.msra.mxu0 %v7806_v1  ;;  %v8539_v27 = vld [vmem:[#allocation5 + $0xdd0] sm:$0xf0]  ;;  %v8414_v40 = vor.u32 %v10575_v17, %v8411_v21 }
 0x144   :  { %v10639_v32 = vld [vmem:[#allocation5 + $0xec4] sm:$0xf]  ;;  %v8667_v34 = vld [vmem:[#allocation5 + $0xed0] sm:$0xf0]  ;;  %5278 = vmatpush.bf16.msra.mxu1 %v7934_v5  ;;  %v8542_v43 = vor.u32 %v10607_v24, %v8539_v27  ;;  %v5059_v5 = vpop.f32.mrf.mxu0 }
 0x145   :  { %5291 = vmatpush.bf16.msra.mxu2 %v8062_v55  ;;  %v10671_v36 = vld [vmem:[#allocation5 + $0xfc4] sm:$0xf]  ;;  %v8795_v39 = vld [vmem:[#allocation5 + $0xfd0] sm:$0xf0]  ;;  %v8670_v47 = vor.u32 %v10639_v32, %v8667_v34  ;;  %v5060_v8 = vadd.f32 %v5059_v5, %v11399_v14 }
 0x146   :  { %5304 = vmatpush.bf16.msra.mxu3 %v8190_v9  ;;  %v10571_v48 = vld [vmem:[#allocation5 + $0xca4] sm:$0xf]  ;;  %v8395_v50 = vld [vmem:[#allocation5 + $0xcb0] sm:$0xf0]  ;;  %5266 = vmatmul.bf16.vlgmr.msra.gmra.mxu0 %v11334_v25  ;;  %v8798_v52 = vor.u32 %v10671_v36, %v8795_v39 }
 0x147   :  { %5310 = vmatpush.bf16.msrb.mxu0 %v8430_v10  ;;  %v10603_v51 = vld [vmem:[#allocation5 + $0xda4] sm:$0xf]  ;;  %v8523_v54 = vld [vmem:[#allocation5 + $0xdb0] sm:$0xf0]  ;;  %5279 = vmatmul.bf16.vlgmr.msra.gmra.mxu1 %v11338_v30  ;;  %v8398_v53 = vor.u32 %v10571_v48, %v8395_v50  ;;  %v5072_v10 = vpop.f32.mrf.mxu1 }
 0x148   :  { %5323 = vmatpush.bf16.msrb.mxu1 %v8558_v13  ;;  %v10635_v56 = vld [vmem:[#allocation5 + $0xea4] sm:$0xf]  ;;  %v8651_v57 = vld [vmem:[#allocation5 + $0xeb0] sm:$0xf0]  ;;  %5292 = vmatmul.bf16.vlgmr.msra.gmra.mxu2 %v11336_v29  ;;  %v8526_v60 = vor.u32 %v10603_v51, %v8523_v54  ;;  %v5073_v27 = vadd.f32 %v5072_v10, %v5060_v8 }
 0x149   :  { %5336 = vmatpush.bf16.msrb.mxu2 %v8686_v15  ;;  %v10667_v58 = vld [vmem:[#allocation5 + $0xfa4] sm:$0xf]  ;;  %v8779_v59 = vld [vmem:[#allocation5 + $0xfb0] sm:$0xf0]  ;;  %5305 = vmatmul.bf16.vlgmr.msra.gmra.mxu3 %v11340_v33  ;;  %v8654_v61 = vor.u32 %v10635_v56, %v8651_v57  ;;  %v5085_v54 = vpop.f32.mrf.mxu2 }
 0x14a   :  { %5349 = vmatpush.bf16.msrb.mxu3 %v8814_v26  ;;  %v10567_v62 = vld [vmem:[#allocation5 + $0xc84] sm:$0xf]  ;;  %v8379_v63 = vld [vmem:[#allocation5 + $0xc90] sm:$0xf0]  ;;  %v8782_v1 = vor.u32 %v10667_v58, %v8779_v59  ;;  %v5086_v59 = vadd.f32 %v5085_v54, %v5073_v27 }
 0x14b   :  { %5311 = vmatpush.bf16.msrb.mxu0 %v8414_v40  ;;  %v10599_v0 = vld [vmem:[#allocation5 + $0xd84] sm:$0xf]  ;;  %v8507_v2 = vld [vmem:[#allocation5 + $0xd90] sm:$0xf0]  ;;  %v8382_v9 = vor.u32 %v10567_v62, %v8379_v63 }
 0x14c   :  { %5324 = vmatpush.bf16.msrb.mxu1 %v8542_v43  ;;  %v10631_v3 = vld [vmem:[#allocation5 + $0xe84] sm:$0xf]  ;;  %v8635_v4 = vld [vmem:[#allocation5 + $0xe90] sm:$0xf0]  ;;  %v8510_v13 = vor.u32 %v10599_v0, %v8507_v2  ;;  %v5061_v62 = vpop.f32.mrf.mxu0 }
 0x14d   :  { %5337 = vmatpush.bf16.msrb.mxu2 %v8670_v47  ;;  %v10663_v55 = vld [vmem:[#allocation5 + $0xf84] sm:$0xf]  ;;  %v8763_v6 = vld [vmem:[#allocation5 + $0xf90] sm:$0xf0]  ;;  %v8638_v15 = vor.u32 %v10631_v3, %v8635_v4 }
 0x14e   :  { %5350 = vmatpush.bf16.msrb.mxu3 %v8798_v52  ;;  %v10563_v17 = vld [vmem:[#allocation5 + $0xc64] sm:$0xf]  ;;  %v8363_v21 = vld [vmem:[#allocation5 + $0xc70] sm:$0xf0]  ;;  %v8766_v26 = vor.u32 %v10663_v55, %v8763_v6 }
 0x14f   :  { %5312 = vmatpush.bf16.msrb.mxu0 %v8398_v53  ;;  %v10595_v24 = vld [vmem:[#allocation5 + $0xd64] sm:$0xf]  ;;  %v8491_v32 = vld [vmem:[#allocation5 + $0xd70] sm:$0xf0]  ;;  %v8366_v43 = vor.u32 %v10563_v17, %v8363_v21  ;;  %v5098_v53 = vpop.f32.mrf.mxu3  ;;  %v5074_v0 = vpop.f32.mrf.mxu1 }
 0x150   :  { %5325 = vmatpush.bf16.msrb.mxu1 %v8526_v60  ;;  %v10627_v34 = vld [vmem:[#allocation5 + $0xe64] sm:$0xf]  ;;  %v8619_v36 = vld [vmem:[#allocation5 + $0xe70] sm:$0xf0]  ;;  %v8494_v14 = vor.u32 %v10595_v24, %v8491_v32 }
 0x151   :  { %5338 = vmatpush.bf16.msrb.mxu2 %v8654_v61  ;;  %v10659_v39 = vld [vmem:[#allocation5 + $0xf64] sm:$0xf]  ;;  %v8747_v40 = vld [vmem:[#allocation5 + $0xf70] sm:$0xf0]  ;;  %v8622_v47 = vor.u32 %v10627_v34, %v8619_v36 }
 0x152   :  { %5351 = vmatpush.bf16.msrb.mxu3 %v8782_v1  ;;  %v10559_v48 = vld [vmem:[#allocation5 + $0xc44] sm:$0xf]  ;;  %v8347_v50 = vld [vmem:[#allocation5 + $0xc50] sm:$0xf0]  ;;  %v8750_v52 = vor.u32 %v10659_v39, %v8747_v40  ;;  %v11406_v1 = vadd.f32 %v5098_v53, %v5086_v59 }
 0x153   :  { %5313 = vmatpush.bf16.msrb.mxu0 %v8382_v9  ;;  %v10591_v51 = vld [vmem:[#allocation5 + $0xd44] sm:$0xf]  ;;  %v8475_v56 = vld [vmem:[#allocation5 + $0xd50] sm:$0xf0]  ;;  %v8350_v63 = vor.u32 %v10559_v48, %v8347_v50 }
 0x154   :  { %5326 = vmatpush.bf16.msrb.mxu1 %v8510_v13  ;;  %v10623_v57 = vld [vmem:[#allocation5 + $0xe44] sm:$0xf]  ;;  %v8603_v58 = vld [vmem:[#allocation5 + $0xe50] sm:$0xf0]  ;;  %v8478_v2 = vor.u32 %v10591_v51, %v8475_v56 }
 0x155   :  { %5339 = vmatpush.bf16.msrb.mxu2 %v8638_v15  ;;  %v10655_v60 = vld [vmem:[#allocation5 + $0xf44] sm:$0xf]  ;;  %v8731_v61 = vld [vmem:[#allocation5 + $0xf50] sm:$0xf0]  ;;  %v8606_v3 = vor.u32 %v10623_v57, %v8603_v58 }
 0x156   :  { %5352 = vmatpush.bf16.msrb.mxu3 %v8766_v26  ;;  %v10555_v4 = vld [vmem:[#allocation5 + $0xc24] sm:$0xf]  ;;  %v8331_v5 = vld [vmem:[#allocation5 + $0xc30] sm:$0xf0]  ;;  %v8734_v6 = vor.u32 %v10655_v60, %v8731_v61 }
 0x157   :  { %5314 = vmatpush.bf16.msrb.mxu0 %v8366_v43  ;;  %v10587_v55 = vld [vmem:[#allocation5 + $0xd24] sm:$0xf]  ;;  %v8459_v8 = vld [vmem:[#allocation5 + $0xd30] sm:$0xf0]  ;;  %v8334_v17 = vor.u32 %v10555_v4, %v8331_v5 }
 0x158   :  { %5327 = vmatpush.bf16.msrb.mxu1 %v8494_v14  ;;  %v10619_v9 = vld [vmem:[#allocation5 + $0xe24] sm:$0xf]  ;;  %v8587_v10 = vld [vmem:[#allocation5 + $0xe30] sm:$0xf0]  ;;  %v8462_v26 = vor.u32 %v10587_v55, %v8459_v8 }
 0x159   :  { %5340 = vmatpush.bf16.msrb.mxu2 %v8622_v47  ;;  %v10651_v13 = vld [vmem:[#allocation5 + $0xf24] sm:$0xf]  ;;  %v8715_v15 = vld [vmem:[#allocation5 + $0xf30] sm:$0xf0]  ;;  %v8590_v27 = vor.u32 %v10619_v9, %v8587_v10  ;;  %v5087_v47 = vpop.f32.mrf.mxu2 }
 0x15a   :  { %5353 = vmatpush.bf16.msrb.mxu3 %v8750_v52  ;;  %v10551_v21 = vld [vmem:[#allocation5 + $0xc04] sm:$0xf]  ;;  %v8315_v24 = vld [vmem:[#allocation5 + $0xc10] sm:$0xf0]  ;;  %v8718_v39 = vor.u32 %v10651_v13, %v8715_v15  ;;  %v5100_v52 = vpop.f32.mrf.mxu3 }
 0x15b   :  { %5315 = vmatpush.bf16.msrb.mxu0 %v8350_v63  ;;  %v10583_v32 = vld [vmem:[#allocation5 + $0xd04] sm:$0xf]  ;;  %v8443_v34 = vld [vmem:[#allocation5 + $0xd10] sm:$0xf0]  ;;  %v8318_v54 = vor.u32 %v10551_v21, %v8315_v24 }
 0x15c   :  { %5328 = vmatpush.bf16.msrb.mxu1 %v8478_v2  ;;  %v10615_v36 = vld [vmem:[#allocation5 + $0xe04] sm:$0xf]  ;;  %v8571_v40 = vld [vmem:[#allocation5 + $0xe10] sm:$0xf0]  ;;  %v8446_v59 = vor.u32 %v10583_v32, %v8443_v34 }
 0x15d   :  { %5341 = vmatpush.bf16.msrb.mxu2 %v8606_v3  ;;  %v10647_v43 = vld [vmem:[#allocation5 + $0xf04] sm:$0xf]  ;;  %v8699_v14 = vld [vmem:[#allocation5 + $0xf10] sm:$0xf0]  ;;  %v8574_v53 = vor.u32 %v10615_v36, %v8571_v40 }
 0x15e   :  { %5354 = vmatpush.bf16.msrb.mxu3 %v8734_v6  ;;  %v10707_v48 = vld [vmem:[#allocation5 + $0x10e4] sm:$0xf]  ;;  %v8939_v50 = vld [vmem:[#allocation5 + $0x10f0] sm:$0xf0]  ;;  %v8702_v62 = vor.u32 %v10647_v43, %v8699_v14 }
 0x15f   :  { %v10739_v51 = vld [vmem:[#allocation5 + $0x11e4] sm:$0xf]  ;;  %5316 = vmatpush.bf16.msrb.mxu0 %v8334_v17  ;;  %v9067_v56 = vld [vmem:[#allocation5 + $0x11f0] sm:$0xf0]  ;;  %v8942_v63 = vor.u32 %v10707_v48, %v8939_v50 }
 0x160   :  { %v10771_v57 = vld [vmem:[#allocation5 + $0x12e4] sm:$0xf]  ;;  %v9195_v58 = vld [vmem:[#allocation5 + $0x12f0] sm:$0xf0]  ;;  %5329 = vmatpush.bf16.msrb.mxu1 %v8462_v26  ;;  %v9070_v0 = vor.u32 %v10739_v51, %v9067_v56 }
 0x161   :  { %5342 = vmatpush.bf16.msrb.mxu2 %v8590_v27  ;;  %v10803_v60 = vld [vmem:[#allocation5 + $0x13e4] sm:$0xf]  ;;  %v9323_v61 = vld [vmem:[#allocation5 + $0x13f0] sm:$0xf0]  ;;  %v9198_v2 = vor.u32 %v10771_v57, %v9195_v58 }
 0x162   :  { %5355 = vmatpush.bf16.msrb.mxu3 %v8718_v39  ;;  %v10703_v3 = vld [vmem:[#allocation5 + $0x10c4] sm:$0xf]  ;;  %v8923_v4 = vld [vmem:[#allocation5 + $0x10d0] sm:$0xf0]  ;;  %v9326_v55 = vor.u32 %v10803_v60, %v9323_v61 }
 0x163   :  { %v10735_v5 = vld [vmem:[#allocation5 + $0x11c4] sm:$0xf]  ;;  %5317 = vmatpush.bf16.msrb.mxu0 %v8318_v54  ;;  %v9051_v6 = vld [vmem:[#allocation5 + $0x11d0] sm:$0xf0]  ;;  %v8926_v15 = vor.u32 %v10703_v3, %v8923_v4 }
 0x164   :  { %v10767_v8 = vld [vmem:[#allocation5 + $0x12c4] sm:$0xf]  ;;  %v9179_v9 = vld [vmem:[#allocation5 + $0x12d0] sm:$0xf0]  ;;  %5330 = vmatpush.bf16.msrb.mxu1 %v8446_v59  ;;  %v9054_v17 = vor.u32 %v10735_v5, %v9051_v6  ;;  %v5111_v59 = vpop.f32.mrf.mxu0 }
 0x165   :  { %5343 = vmatpush.bf16.msrb.mxu2 %v8574_v53  ;;  %v10799_v10 = vld [vmem:[#allocation5 + $0x13c4] sm:$0xf]  ;;  %v9307_v13 = vld [vmem:[#allocation5 + $0x13d0] sm:$0xf0]  ;;  %v9182_v21 = vor.u32 %v10767_v8, %v9179_v9  ;;  %v5112_v61 = vadd.f32 %v5111_v59, %v11406_v1 }
 0x166   :  { %5356 = vmatpush.bf16.msrb.mxu3 %v8702_v62  ;;  %v10699_v24 = vld [vmem:[#allocation5 + $0x10a4] sm:$0xf]  ;;  %v8907_v26 = vld [vmem:[#allocation5 + $0x10b0] sm:$0xf0]  ;;  %5318 = vmatmul.bf16.vlgmr.msrb.gmra.mxu0 %v11346_v23  ;;  %v9310_v32 = vor.u32 %v10799_v10, %v9307_v13 }
 0x167   :  { %5362 = vmatpush.bf16.msra.mxu0 %v8942_v63  ;;  %v10731_v27 = vld [vmem:[#allocation5 + $0x11a4] sm:$0xf]  ;;  %v9035_v34 = vld [vmem:[#allocation5 + $0x11b0] sm:$0xf0]  ;;  %5331 = vmatmul.bf16.vlgmr.msrb.gmra.mxu1 %v11350_v31  ;;  %v8910_v14 = vor.u32 %v10699_v24, %v8907_v26  ;;  %v5124_v63 = vpop.f32.mrf.mxu1 }
 0x168   :  { %5375 = vmatpush.bf16.msra.mxu1 %v9070_v0  ;;  %v10763_v36 = vld [vmem:[#allocation5 + $0x12a4] sm:$0xf]  ;;  %v9163_v39 = vld [vmem:[#allocation5 + $0x12b0] sm:$0xf0]  ;;  %5344 = vmatmul.bf16.vlgmr.msrb.gmra.mxu2 %v11348_v28  ;;  %v9038_v47 = vor.u32 %v10731_v27, %v9035_v34  ;;  %v5125_v6 = vadd.f32 %v5124_v63, %v5112_v61 }
 0x169   :  { %5388 = vmatpush.bf16.msra.mxu2 %v9198_v2  ;;  %v10795_v40 = vld [vmem:[#allocation5 + $0x13a4] sm:$0xf]  ;;  %v9291_v43 = vld [vmem:[#allocation5 + $0x13b0] sm:$0xf0]  ;;  %5357 = vmatmul.bf16.vlgmr.msrb.gmra.mxu3 %v11352_v35  ;;  %v9166_v48 = vor.u32 %v10763_v36, %v9163_v39 }
 0x16a   :  { %5401 = vmatpush.bf16.msra.mxu3 %v9326_v55  ;;  %v10695_v50 = vld [vmem:[#allocation5 + $0x1084] sm:$0xf]  ;;  %v8891_v51 = vld [vmem:[#allocation5 + $0x1090] sm:$0xf0]  ;;  %v9294_v54 = vor.u32 %v10795_v40, %v9291_v43 }
 0x16b   :  { %5363 = vmatpush.bf16.msra.mxu0 %v8926_v15  ;;  %v10727_v52 = vld [vmem:[#allocation5 + $0x1184] sm:$0xf]  ;;  %v9019_v56 = vld [vmem:[#allocation5 + $0x1190] sm:$0xf0]  ;;  %v8894_v62 = vor.u32 %v10695_v50, %v8891_v51  ;;  %v5137_v34 = vpop.f32.mrf.mxu2 }
 0x16c   :  { %5376 = vmatpush.bf16.msra.mxu1 %v9054_v17  ;;  %v10759_v57 = vld [vmem:[#allocation5 + $0x1284] sm:$0xf]  ;;  %v9147_v58 = vld [vmem:[#allocation5 + $0x1290] sm:$0xf0]  ;;  %v9022_v0 = vor.u32 %v10727_v52, %v9019_v56  ;;  %v5138_v43 = vadd.f32 %v5137_v34, %v5125_v6  ;;  %v5113_v50 = vpop.f32.mrf.mxu0 }
 0x16d   :  { %5389 = vmatpush.bf16.msra.mxu2 %v9182_v21  ;;  %v10791_v53 = vld [vmem:[#allocation5 + $0x1384] sm:$0xf]  ;;  %v9275_v60 = vld [vmem:[#allocation5 + $0x1390] sm:$0xf0]  ;;  %v9150_v2 = vor.u32 %v10759_v57, %v9147_v58 }
 0x16e   :  { %5402 = vmatpush.bf16.msra.mxu3 %v9310_v32  ;;  %v10691_v3 = vld [vmem:[#allocation5 + $0x1064] sm:$0xf]  ;;  %v8875_v4 = vld [vmem:[#allocation5 + $0x1070] sm:$0xf0]  ;;  %v9278_v55 = vor.u32 %v10791_v53, %v9275_v60 }
 0x16f   :  { %5364 = vmatpush.bf16.msra.mxu0 %v8910_v14  ;;  %v10723_v5 = vld [vmem:[#allocation5 + $0x1164] sm:$0xf]  ;;  %v9003_v8 = vld [vmem:[#allocation5 + $0x1170] sm:$0xf0]  ;;  %v8878_v17 = vor.u32 %v10691_v3, %v8875_v4  ;;  %v5150_v14 = vpop.f32.mrf.mxu3  ;;  %v5126_v52 = vpop.f32.mrf.mxu1 }
 0x170   :  { %5377 = vmatpush.bf16.msra.mxu1 %v9038_v47  ;;  %v10755_v9 = vld [vmem:[#allocation5 + $0x1264] sm:$0xf]  ;;  %v9131_v10 = vld [vmem:[#allocation5 + $0x1270] sm:$0xf0]  ;;  %v9006_v1 = vor.u32 %v10723_v5, %v9003_v8 }
 0x171   :  { %5390 = vmatpush.bf16.msra.mxu2 %v9166_v48  ;;  %v10787_v13 = vld [vmem:[#allocation5 + $0x1364] sm:$0xf]  ;;  %v9259_v15 = vld [vmem:[#allocation5 + $0x1370] sm:$0xf0]  ;;  %v9134_v21 = vor.u32 %v10755_v9, %v9131_v10 }
 0x172   :  { %5403 = vmatpush.bf16.msra.mxu3 %v9294_v54  ;;  %v10687_v24 = vld [vmem:[#allocation5 + $0x1044] sm:$0xf]  ;;  %v8859_v26 = vld [vmem:[#allocation5 + $0x1050] sm:$0xf0]  ;;  %v9262_v32 = vor.u32 %v10787_v13, %v9259_v15  ;;  %v11413_v54 = vadd.f32 %v5150_v14, %v5138_v43 }
 0x173   :  { %5365 = vmatpush.bf16.msra.mxu0 %v8894_v62  ;;  %v10719_v27 = vld [vmem:[#allocation5 + $0x1144] sm:$0xf]  ;;  %v8987_v36 = vld [vmem:[#allocation5 + $0x1150] sm:$0xf0]  ;;  %v8862_v51 = vor.u32 %v10687_v24, %v8859_v26 }
 0x174   :  { %5378 = vmatpush.bf16.msra.mxu1 %v9022_v0  ;;  %v10751_v39 = vld [vmem:[#allocation5 + $0x1244] sm:$0xf]  ;;  %v9115_v40 = vld [vmem:[#allocation5 + $0x1250] sm:$0xf0]  ;;  %v8990_v56 = vor.u32 %v10719_v27, %v8987_v36 }
 0x175   :  { %5391 = vmatpush.bf16.msra.mxu2 %v9150_v2  ;;  %v10783_v47 = vld [vmem:[#allocation5 + $0x1344] sm:$0xf]  ;;  %v9243_v48 = vld [vmem:[#allocation5 + $0x1350] sm:$0xf0]  ;;  %v9118_v57 = vor.u32 %v10751_v39, %v9115_v40 }
 0x176   :  { %5404 = vmatpush.bf16.msra.mxu3 %v9278_v55  ;;  %v10683_v58 = vld [vmem:[#allocation5 + $0x1024] sm:$0xf]  ;;  %v8843_v59 = vld [vmem:[#allocation5 + $0x1030] sm:$0xf0]  ;;  %v9246_v60 = vor.u32 %v10783_v47, %v9243_v48 }
 0x177   :  { %5366 = vmatpush.bf16.msra.mxu0 %v8878_v17  ;;  %v10715_v53 = vld [vmem:[#allocation5 + $0x1124] sm:$0xf]  ;;  %v8971_v61 = vld [vmem:[#allocation5 + $0x1130] sm:$0xf0]  ;;  %v8846_v3 = vor.u32 %v10683_v58, %v8843_v59 }
 0x178   :  { %5379 = vmatpush.bf16.msra.mxu1 %v9006_v1  ;;  %v10747_v62 = vld [vmem:[#allocation5 + $0x1224] sm:$0xf]  ;;  %v9099_v63 = vld [vmem:[#allocation5 + $0x1230] sm:$0xf0]  ;;  %v8974_v55 = vor.u32 %v10715_v53, %v8971_v61 }
 0x179   :  { %5392 = vmatpush.bf16.msra.mxu2 %v9134_v21  ;;  %v10779_v0 = vld [vmem:[#allocation5 + $0x1324] sm:$0xf]  ;;  %v9227_v2 = vld [vmem:[#allocation5 + $0x1330] sm:$0xf0]  ;;  %v9102_v6 = vor.u32 %v10747_v62, %v9099_v63  ;;  %v5139_v21 = vpop.f32.mrf.mxu2 }
 0x17a   :  { %5405 = vmatpush.bf16.msra.mxu3 %v9262_v32  ;;  %v10679_v4 = vld [vmem:[#allocation5 + $0x1004] sm:$0xf]  ;;  %v8827_v5 = vld [vmem:[#allocation5 + $0x1010] sm:$0xf0]  ;;  %v9230_v13 = vor.u32 %v10779_v0, %v9227_v2  ;;  %v5152_v32 = vpop.f32.mrf.mxu3 }
 0x17b   :  { %5367 = vmatpush.bf16.msra.mxu0 %v8862_v51  ;;  %v10711_v8 = vld [vmem:[#allocation5 + $0x1104] sm:$0xf]  ;;  %v8955_v9 = vld [vmem:[#allocation5 + $0x1110] sm:$0xf0]  ;;  %v8830_v34 = vor.u32 %v10679_v4, %v8827_v5 }
 0x17c   :  { %5380 = vmatpush.bf16.msra.mxu1 %v8990_v56  ;;  %v10743_v10 = vld [vmem:[#allocation5 + $0x1204] sm:$0xf]  ;;  %v9083_v15 = vld [vmem:[#allocation5 + $0x1210] sm:$0xf0]  ;;  %v8958_v43 = vor.u32 %v10711_v8, %v8955_v9 }
 0x17d   :  { %5393 = vmatpush.bf16.msra.mxu2 %v9118_v57  ;;  %v10775_v17 = vld [vmem:[#allocation5 + $0x1304] sm:$0xf]  ;;  %v9211_v1 = vld [vmem:[#allocation5 + $0x1310] sm:$0xf0]  ;;  %v9086_v14 = vor.u32 %v10743_v10, %v9083_v15 }
 0x17e   :  { %5406 = vmatpush.bf16.msra.mxu3 %v9246_v60  ;;  %v10835_v24 = vld [vmem:[#allocation5 + $0x14e4] sm:$0xf]  ;;  %v9451_v26 = vld [vmem:[#allocation5 + $0x14f0] sm:$0xf0]  ;;  %v9214_v50 = vor.u32 %v10775_v17, %v9211_v1 }
 0x17f   :  { %v10867_v27 = vld [vmem:[#allocation5 + $0x15e4] sm:$0xf]  ;;  %5368 = vmatpush.bf16.msra.mxu0 %v8846_v3  ;;  %v9579_v36 = vld [vmem:[#allocation5 + $0x15f0] sm:$0xf0]  ;;  %v9454_v51 = vor.u32 %v10835_v24, %v9451_v26 }
 0x180   :  { %v10899_v39 = vld [vmem:[#allocation5 + $0x16e4] sm:$0xf]  ;;  %v9707_v40 = vld [vmem:[#allocation5 + $0x16f0] sm:$0xf0]  ;;  %5381 = vmatpush.bf16.msra.mxu1 %v8974_v55  ;;  %v9582_v52 = vor.u32 %v10867_v27, %v9579_v36 }
 0x181   :  { %5394 = vmatpush.bf16.msra.mxu2 %v9102_v6  ;;  %v10931_v47 = vld [vmem:[#allocation5 + $0x17e4] sm:$0xf]  ;;  %v9835_v48 = vld [vmem:[#allocation5 + $0x17f0] sm:$0xf0]  ;;  %v9710_v56 = vor.u32 %v10899_v39, %v9707_v40 }
 0x182   :  { %5407 = vmatpush.bf16.msra.mxu3 %v9230_v13  ;;  %v10831_v57 = vld [vmem:[#allocation5 + $0x14c4] sm:$0xf]  ;;  %v9435_v58 = vld [vmem:[#allocation5 + $0x14d0] sm:$0xf0]  ;;  %v9838_v53 = vor.u32 %v10931_v47, %v9835_v48 }
 0x183   :  { %v10863_v59 = vld [vmem:[#allocation5 + $0x15c4] sm:$0xf]  ;;  %5369 = vmatpush.bf16.msra.mxu0 %v8830_v34  ;;  %v9563_v60 = vld [vmem:[#allocation5 + $0x15d0] sm:$0xf0]  ;;  %v9438_v2 = vor.u32 %v10831_v57, %v9435_v58  ;;  %v11030_v34 = vld [vmem:[#allocation7] sm:$0xf] }
 0x184   :  { %v10895_v61 = vld [vmem:[#allocation5 + $0x16c4] sm:$0xf]  ;;  %v9691_v62 = vld [vmem:[#allocation5 + $0x16d0] sm:$0xf0]  ;;  %5382 = vmatpush.bf16.msra.mxu1 %v8958_v43  ;;  %v9566_v3 = vor.u32 %v10863_v59, %v9563_v60  ;;  %v911_v36 = vperm.slane %v11030_v34, 1  ;;  %v5176_v60 = vpop.f32.mrf.mxu1 }
 0x185   :  { %5395 = vmatpush.bf16.msra.mxu2 %v9086_v14  ;;  %v10927_v63 = vld [vmem:[#allocation5 + $0x17c4] sm:$0xf]  ;;  %v9819_v0 = vld [vmem:[#allocation5 + $0x17d0] sm:$0xf0]  ;;  %v9694_v4 = vor.u32 %v10895_v61, %v9691_v62 }
 0x186   :  { %5408 = vmatpush.bf16.msra.mxu3 %v9214_v50  ;;  %v10827_v5 = vld [vmem:[#allocation5 + $0x14a4] sm:$0xf]  ;;  %v9419_v55 = vld [vmem:[#allocation5 + $0x14b0] sm:$0xf0]  ;;  %5370 = vmatmul.bf16.vlgmr.msra.gmra.mxu0 %v11358_v37  ;;  %v9822_v8 = vor.u32 %v10927_v63, %v9819_v0 }
 0x187   :  { %5414 = vmatpush.bf16.msrb.mxu0 %v9454_v51  ;;  %v10859_v6 = vld [vmem:[#allocation5 + $0x15a4] sm:$0xf]  ;;  %v9547_v9 = vld [vmem:[#allocation5 + $0x15b0] sm:$0xf0]  ;;  %5383 = vmatmul.bf16.vlgmr.msra.gmra.mxu1 %v11362_v46  ;;  %v9422_v1 = vor.u32 %v10827_v5, %v9419_v55  ;;  %v5163_v51 = vpop.f32.mrf.mxu0 }
 0x188   :  { %5427 = vmatpush.bf16.msrb.mxu1 %v9582_v52  ;;  %v10891_v10 = vld [vmem:[#allocation5 + $0x16a4] sm:$0xf]  ;;  %v9675_v13 = vld [vmem:[#allocation5 + $0x16b0] sm:$0xf0]  ;;  %5396 = vmatmul.bf16.vlgmr.msra.gmra.mxu2 %v11360_v45  ;;  %v9550_v24 = vor.u32 %v10859_v6, %v9547_v9 }
 0x189   :  { %5440 = vmatpush.bf16.msrb.mxu2 %v9710_v56  ;;  %v10923_v15 = vld [vmem:[#allocation5 + $0x17a4] sm:$0xf]  ;;  %v9803_v17 = vld [vmem:[#allocation5 + $0x17b0] sm:$0xf0]  ;;  %5409 = vmatmul.bf16.vlgmr.msra.gmra.mxu3 %v11364_v49  ;;  %v9678_v26 = vor.u32 %v10891_v10, %v9675_v13 }
 0x18a   :  { %5453 = vmatpush.bf16.msrb.mxu3 %v9838_v53  ;;  %v10823_v21 = vld [vmem:[#allocation5 + $0x1484] sm:$0xf]  ;;  %v9403_v27 = vld [vmem:[#allocation5 + $0x1490] sm:$0xf0]  ;;  %v9806_v39 = vor.u32 %v10923_v15, %v9803_v17  ;;  %v5164_v53 = vadd.f32 %v5163_v51, %v911_v36 }
 0x18b   :  { %5415 = vmatpush.bf16.msrb.mxu0 %v9438_v2  ;;  %v10855_v32 = vld [vmem:[#allocation5 + $0x1584] sm:$0xf]  ;;  %v9531_v40 = vld [vmem:[#allocation5 + $0x1590] sm:$0xf0]  ;;  %v9406_v50 = vor.u32 %v10823_v21, %v9403_v27  ;;  %v5189_v13 = vpop.f32.mrf.mxu2 }
 0x18c   :  { %5428 = vmatpush.bf16.msrb.mxu1 %v9566_v3  ;;  %v10887_v43 = vld [vmem:[#allocation5 + $0x1684] sm:$0xf]  ;;  %v9659_v14 = vld [vmem:[#allocation5 + $0x1690] sm:$0xf0]  ;;  %v9534_v52 = vor.u32 %v10855_v32, %v9531_v40 }
 0x18d   :  { %5441 = vmatpush.bf16.msrb.mxu2 %v9694_v4  ;;  %v10919_v47 = vld [vmem:[#allocation5 + $0x1784] sm:$0xf]  ;;  %v9787_v48 = vld [vmem:[#allocation5 + $0x1790] sm:$0xf0]  ;;  %v9662_v56 = vor.u32 %v10887_v43, %v9659_v14  ;;  %v5177_v4 = vadd.f32 %v5176_v60, %v5164_v53 }
 0x18e   :  { %5454 = vmatpush.bf16.msrb.mxu3 %v9822_v8  ;;  %v10819_v57 = vld [vmem:[#allocation5 + $0x1464] sm:$0xf]  ;;  %v9387_v58 = vld [vmem:[#allocation5 + $0x1470] sm:$0xf0]  ;;  %v9790_v61 = vor.u32 %v10919_v47, %v9787_v48 }
 0x18f   :  { %5416 = vmatpush.bf16.msrb.mxu0 %v9422_v1  ;;  %v10851_v59 = vld [vmem:[#allocation5 + $0x1564] sm:$0xf]  ;;  %v9515_v62 = vld [vmem:[#allocation5 + $0x1570] sm:$0xf0]  ;;  %v9390_v5 = vor.u32 %v10819_v57, %v9387_v58 }
 0x190   :  { %5429 = vmatpush.bf16.msrb.mxu1 %v9550_v24  ;;  %v10883_v63 = vld [vmem:[#allocation5 + $0x1664] sm:$0xf]  ;;  %v9643_v0 = vld [vmem:[#allocation5 + $0x1670] sm:$0xf0]  ;;  %v9518_v55 = vor.u32 %v10851_v59, %v9515_v62  ;;  %v5190_v24 = vadd.f32 %v5189_v13, %v5177_v4  ;;  %v10198_v13 = vld [vmem:[#allocation5 + $0xf4] sm:$0xf0] }
 0x191   :  { %5442 = vmatpush.bf16.msrb.mxu2 %v9678_v26  ;;  %v10915_v2 = vld [vmem:[#allocation5 + $0x1764] sm:$0xf]  ;;  %v9771_v3 = vld [vmem:[#allocation5 + $0x1770] sm:$0xf0]  ;;  %v9646_v6 = vor.u32 %v10883_v63, %v9643_v0  ;;  %v5202_v26 = vpop.f32.mrf.mxu3 }
 0x192   :  { %5455 = vmatpush.bf16.msrb.mxu3 %v9806_v39  ;;  %v10815_v8 = vld [vmem:[#allocation5 + $0x1444] sm:$0xf]  ;;  %v9371_v9 = vld [vmem:[#allocation5 + $0x1450] sm:$0xf0]  ;;  %v9774_v15 = vor.u32 %v10915_v2, %v9771_v3  ;;  %v11419_v36 = vadd.f32 %v5202_v26, %v5190_v24  ;;  %v5165_v39 = vpop.f32.mrf.mxu0  ;;  %v10262_v24 = vld [vmem:[#allocation5 + $0x2f4] sm:$0xf0] }
 0x193   :  { %5417 = vmatpush.bf16.msrb.mxu0 %v9406_v50  ;;  %v10847_v10 = vld [vmem:[#allocation5 + $0x1544] sm:$0xf]  ;;  %v9499_v17 = vld [vmem:[#allocation5 + $0x1550] sm:$0xf0]  ;;  %v9374_v34 = vor.u32 %v10815_v8, %v9371_v9  ;;  %v5178_v50 = vpop.f32.mrf.mxu1  ;;  %v5191_v4 = vpop.f32.mrf.mxu2 }
 0x194   :  { %5430 = vmatpush.bf16.msrb.mxu1 %v9534_v52  ;;  %v10879_v1 = vld [vmem:[#allocation5 + $0x1644] sm:$0xf]  ;;  %v9627_v21 = vld [vmem:[#allocation5 + $0x1650] sm:$0xf0]  ;;  %v9502_v40 = vor.u32 %v10847_v10, %v9499_v17  ;;  %v6897_v10 = vld [vmem:[#allocation5 + $0xe8] sm:$0xf] }
 0x195   :  { %5443 = vmatpush.bf16.msrb.mxu2 %v9662_v56  ;;  %v10911_v27 = vld [vmem:[#allocation5 + $0x1744] sm:$0xf]  ;;  %v9755_v32 = vld [vmem:[#allocation5 + $0x1750] sm:$0xf0]  ;;  %v9630_v43 = vor.u32 %v10879_v1, %v9627_v21  ;;  %v10230_v1 = vld [vmem:[#allocation5 + $0x1f4] sm:$0xf0] }
 0x196   :  { %5456 = vmatpush.bf16.msrb.mxu3 %v9790_v61  ;;  %v10811_v14 = vld [vmem:[#allocation5 + $0x1424] sm:$0xf]  ;;  %v9355_v47 = vld [vmem:[#allocation5 + $0x1430] sm:$0xf0]  ;;  %v9758_v51 = vor.u32 %v10911_v27, %v9755_v32  ;;  %v7153_v21 = vld [vmem:[#allocation5 + $0x2e8] sm:$0xf] }
 0x197   :  { %5418 = vmatpush.bf16.msrb.mxu0 %v9390_v5  ;;  %v10843_v48 = vld [vmem:[#allocation5 + $0x1524] sm:$0xf]  ;;  %v9483_v52 = vld [vmem:[#allocation5 + $0x1530] sm:$0xf0]  ;;  %v9358_v53 = vor.u32 %v10811_v14, %v9355_v47  ;;  %v7281_v32 = vld [vmem:[#allocation5 + $0x3e8] sm:$0xf]  ;;  %v7154_v14 = vor.u32 %v10262_v24, %v7153_v21 }
 0x198   :  { %5431 = vmatpush.bf16.msrb.mxu1 %v9518_v55  ;;  %v10875_v56 = vld [vmem:[#allocation5 + $0x1624] sm:$0xf]  ;;  %v9611_v57 = vld [vmem:[#allocation5 + $0x1630] sm:$0xf0]  ;;  %v9486_v62 = vor.u32 %v10843_v48, %v9483_v52  ;;  %v6881_v47 = vld [vmem:[#allocation5 + $0xc8] sm:$0xf] }
 0x199   :  { %5444 = vmatpush.bf16.msrb.mxu2 %v9646_v6  ;;  %v10907_v58 = vld [vmem:[#allocation5 + $0x1724] sm:$0xf]  ;;  %v9739_v59 = vld [vmem:[#allocation5 + $0x1730] sm:$0xf0]  ;;  %v9614_v63 = vor.u32 %v10875_v56, %v9611_v57  ;;  %v5204_v9 = vpop.f32.mrf.mxu3  ;;  %v10194_v48 = vld [vmem:[#allocation5 + $0xd4] sm:$0xf0] }
 0x19a   :  { %5457 = vmatpush.bf16.msrb.mxu3 %v9774_v15  ;;  %v10807_v60 = vld [vmem:[#allocation5 + $0x1404] sm:$0xf]  ;;  %v9339_v61 = vld [vmem:[#allocation5 + $0x1410] sm:$0xf0]  ;;  %v9742_v5 = vor.u32 %v10907_v58, %v9739_v59  ;;  %v7025_v15 = vld [vmem:[#allocation5 + $0x1e8] sm:$0xf] }
 0x19b   :  { %5419 = vmatpush.bf16.msrb.mxu0 %v9374_v34  ;;  %v10839_v0 = vld [vmem:[#allocation5 + $0x1504] sm:$0xf]  ;;  %v9467_v2 = vld [vmem:[#allocation5 + $0x1510] sm:$0xf0]  ;;  %v9342_v17 = vor.u32 %v10807_v60, %v9339_v61  ;;  %v10294_v34 = vld [vmem:[#allocation5 + $0x3f4] sm:$0xf0] }
 0x19c   :  { %5432 = vmatpush.bf16.msrb.mxu1 %v9502_v40  ;;  %v10871_v3 = vld [vmem:[#allocation5 + $0x1604] sm:$0xf]  ;;  %v9595_v55 = vld [vmem:[#allocation5 + $0x1610] sm:$0xf0]  ;;  %v9470_v26 = vor.u32 %v10839_v0, %v9467_v2  ;;  %v6898_v40 = vor.u32 %v10198_v13, %v6897_v10  ;;  %v7009_v50 = vld [vmem:[#allocation5 + $0x1c8] sm:$0xf] }
 0x19d   :  { %5445 = vmatpush.bf16.msrb.mxu2 %v9630_v43  ;;  %v10903_v6 = vld [vmem:[#allocation5 + $0x1704] sm:$0xf]  ;;  %v9723_v8 = vld [vmem:[#allocation5 + $0x1710] sm:$0xf0]  ;;  %v9598_v27 = vor.u32 %v10871_v3, %v9595_v55  ;;  %v7026_v43 = vor.u32 %v10230_v1, %v7025_v15  ;;  %v10226_v52 = vld [vmem:[#allocation5 + $0x1d4] sm:$0xf0] }
 0x19e   :  { %5458 = vmatpush.bf16.msrb.mxu3 %v9758_v51  ;;  %v9726_v39 = vor.u32 %v10903_v6, %v9723_v8  ;;  %v7282_v51 = vor.u32 %v10294_v34, %v7281_v32  ;;  %v7137_v56 = vld [vmem:[#allocation5 + $0x2c8] sm:$0xf]  ;;  %v10258_v57 = vld [vmem:[#allocation5 + $0x2d4] sm:$0xf0]  ;;  %v7010_v60 = vor.u32 %v10226_v52, %v7009_v50 }
 0x19f   :  { %5420 = vmatpush.bf16.msrb.mxu0 %v9358_v53  ;;  %v7265_v58 = vld [vmem:[#allocation5 + $0x3c8] sm:$0xf]  ;;  %v10290_v59 = vld [vmem:[#allocation5 + $0x3d4] sm:$0xf0]  ;;  %v6882_v53 = vor.u32 %v10194_v48, %v6881_v47  ;;  %v7138_v61 = vor.u32 %v10258_v57, %v7137_v56 }
 0x1a0   :  { %5433 = vmatpush.bf16.msrb.mxu1 %v9486_v62  ;;  %v6865_v62 = vld [vmem:[#allocation5 + $0xa8] sm:$0xf]  ;;  %v7266_v2 = vor.u32 %v10290_v59, %v7265_v58  ;;  %v10222_v3 = vld [vmem:[#allocation5 + $0x1b4] sm:$0xf0] }
 0x1a1   :  { %5446 = vmatpush.bf16.msrb.mxu2 %v9614_v63  ;;  %v10190_v63 = vld [vmem:[#allocation5 + $0xb4] sm:$0xf0]  ;;  %v6993_v0 = vld [vmem:[#allocation5 + $0x1a8] sm:$0xf] }
 0x1a2   :  { %5459 = vmatpush.bf16.msrb.mxu3 %v9742_v5  ;;  %v7121_v4 = vld [vmem:[#allocation5 + $0x2a8] sm:$0xf]  ;;  %v10254_v5 = vld [vmem:[#allocation5 + $0x2b4] sm:$0xf0]  ;;  %v6866_v8 = vor.u32 %v10190_v63, %v6865_v62  ;;  %v6994_v9 = vor.u32 %v10222_v3, %v6993_v0 }
 0x1a3   :  { %5421 = vmatpush.bf16.msrb.mxu0 %v9342_v17  ;;  %v7249_v55 = vld [vmem:[#allocation5 + $0x3a8] sm:$0xf]  ;;  %v10286_v6 = vld [vmem:[#allocation5 + $0x3b4] sm:$0xf0]  ;;  %v7122_v10 = vor.u32 %v10254_v5, %v7121_v4 }
 0x1a4   :  { %5434 = vmatpush.bf16.msrb.mxu1 %v9470_v26  ;;  %v6849_v13 = vld [vmem:[#allocation5 + $0x88] sm:$0xf]  ;;  %v10186_v15 = vld [vmem:[#allocation5 + $0x94] sm:$0xf0]  ;;  %v7250_v1 = vor.u32 %v10286_v6, %v7249_v55 }
 0x1a5   :  { %5447 = vmatpush.bf16.msrb.mxu2 %v9598_v27  ;;  %v6977_v17 = vld [vmem:[#allocation5 + $0x188] sm:$0xf]  ;;  %v10218_v21 = vld [vmem:[#allocation5 + $0x194] sm:$0xf0]  ;;  %v6850_v34 = vor.u32 %v10186_v15, %v6849_v13 }
 0x1a6   :  { %5460 = vmatpush.bf16.msrb.mxu3 %v9726_v39  ;;  %5422 = vmatmul.bf16.vlgmr.msrb.gmra.mxu0 %v11372_v7  ;;  %v7105_v24 = vld [vmem:[#allocation5 + $0x288] sm:$0xf]  ;;  %v10250_v26 = vld [vmem:[#allocation5 + $0x294] sm:$0xf0]  ;;  %v5215_v39 = vpop.f32.mrf.mxu0 }
 0x1a7   :  { %5466 = vmatpush.bf16.msra.mxu0 %v6898_v40  ;;  %5435 = vmatmul.bf16.vlgmr.msrb.gmra.mxu1 %v11376_v12  ;;  %v7233_v27 = vld [vmem:[#allocation5 + $0x388] sm:$0xf]  ;;  %v10282_v32 = vld [vmem:[#allocation5 + $0x394] sm:$0xf0]  ;;  %v6978_v40 = vor.u32 %v10218_v21, %v6977_v17  ;;  %v5216_v50 = vadd.f32 %v5215_v39, %v11419_v36 }
 0x1a8   :  { %5479 = vmatpush.bf16.msra.mxu1 %v7026_v43  ;;  %5448 = vmatmul.bf16.vlgmr.msrb.gmra.mxu2 %v11374_v11  ;;  %v7106_v43 = vor.u32 %v10250_v26, %v7105_v24  ;;  %v10182_v47 = vld [vmem:[#allocation5 + $0x74] sm:$0xf0]  ;;  %v6961_v48 = vld [vmem:[#allocation5 + $0x168] sm:$0xf]  ;;  %v7234_v52 = vor.u32 %v10282_v32, %v7233_v27 }
 0x1a9   :  { %5492 = vmatpush.bf16.msra.mxu2 %v7154_v14  ;;  %5461 = vmatmul.bf16.vlgmr.msrb.gmra.mxu3 %v11378_v16  ;;  %v6833_v14 = vld [vmem:[#allocation5 + $0x68] sm:$0xf]  ;;  %v10214_v56 = vld [vmem:[#allocation5 + $0x174] sm:$0xf0] }
 0x1aa   :  { %5505 = vmatpush.bf16.msra.mxu3 %v7282_v51  ;;  %v5228_v51 = vpop.f32.mrf.mxu1  ;;  %v7089_v57 = vld [vmem:[#allocation5 + $0x268] sm:$0xf]  ;;  %v10246_v58 = vld [vmem:[#allocation5 + $0x274] sm:$0xf0]  ;;  %v6962_v62 = vor.u32 %v10214_v56, %v6961_v48 }
 0x1ab   :  { %5467 = vmatpush.bf16.msra.mxu0 %v6882_v53  ;;  %v7217_v59 = vld [vmem:[#allocation5 + $0x368] sm:$0xf]  ;;  %v10278_v53 = vld [vmem:[#allocation5 + $0x374] sm:$0xf0]  ;;  %v7090_v63 = vor.u32 %v10246_v58, %v7089_v57  ;;  %v5241_v4 = vpop.f32.mrf.mxu2 }
 0x1ac   :  { %5480 = vmatpush.bf16.msra.mxu1 %v7010_v60  ;;  %v5229_v60 = vadd.f32 %v5228_v51, %v5216_v50  ;;  %v6817_v0 = vld [vmem:[#allocation5 + $0x48] sm:$0xf]  ;;  %v7218_v36 = vor.u32 %v10278_v53, %v7217_v59  ;;  %v10210_v5 = vld [vmem:[#allocation5 + $0x154] sm:$0xf0] }
 0x1ad   :  { %5493 = vmatpush.bf16.msra.mxu2 %v7138_v61  ;;  %v6834_v61 = vor.u32 %v10182_v47, %v6833_v14  ;;  %v6945_v3 = vld [vmem:[#allocation5 + $0x148] sm:$0xf]  ;;  %v10242_v6 = vld [vmem:[#allocation5 + $0x254] sm:$0xf0] }
 0x1ae   :  { %5506 = vmatpush.bf16.msra.mxu3 %v7266_v2  ;;  %v10178_v2 = vld [vmem:[#allocation5 + $0x54] sm:$0xf0]  ;;  %v7073_v55 = vld [vmem:[#allocation5 + $0x248] sm:$0xf]  ;;  %v6946_v21 = vor.u32 %v10210_v5, %v6945_v3 }
 0x1af   :  { %5468 = vmatpush.bf16.msra.mxu0 %v6866_v8  ;;  %v5242_v8 = vadd.f32 %v5241_v4, %v5229_v60  ;;  %v10274_v13 = vld [vmem:[#allocation5 + $0x354] sm:$0xf0]  ;;  %v6818_v15 = vor.u32 %v10178_v2, %v6817_v0  ;;  %v7074_v24 = vor.u32 %v10242_v6, %v7073_v55  ;;  %v6801_v26 = vld [vmem:[#allocation5 + $0x28] sm:$0xf] }
 0x1b0   :  { %5481 = vmatpush.bf16.msra.mxu1 %v6994_v9  ;;  %v5254_v9 = vpop.f32.mrf.mxu3  ;;  %v10174_v27 = vld [vmem:[#allocation5 + $0x34] sm:$0xf0]  ;;  %v6929_v32 = vld [vmem:[#allocation5 + $0x128] sm:$0xf] }
 0x1b1   :  { %5494 = vmatpush.bf16.msra.mxu2 %v7122_v10  ;;  %v7201_v10 = vld [vmem:[#allocation5 + $0x348] sm:$0xf]  ;;  %v11426_v17 = vadd.f32 %v5254_v9, %v5242_v8  ;;  %v10238_v14 = vld [vmem:[#allocation5 + $0x234] sm:$0xf0]  ;;  %v6802_v50 = vor.u32 %v10174_v27, %v6801_v26 }
 0x1b2   :  { %5507 = vmatpush.bf16.msra.mxu3 %v7250_v1  ;;  %v5217_v1 = vpop.f32.mrf.mxu0  ;;  %v7202_v39 = vor.u32 %v10274_v13, %v7201_v10  ;;  %v7185_v47 = vld [vmem:[#allocation5 + $0x328] sm:$0xf]  ;;  %v10270_v48 = vld [vmem:[#allocation5 + $0x334] sm:$0xf0] }
 0x1b3   :  { %5469 = vmatpush.bf16.msra.mxu0 %v6850_v34  ;;  %v5230_v34 = vpop.f32.mrf.mxu1  ;;  %v6785_v51 = vld [vmem:[#allocation5 + $0x8] sm:$0xf]  ;;  %v10202_v59 = vld [vmem:[#allocation5 + $0x114] sm:$0xf0]  ;;  %v5243_v60 = vpop.f32.mrf.mxu2 }
 0x1b4   :  { %5482 = vmatpush.bf16.msra.mxu1 %v6978_v40  ;;  %v10206_v40 = vld [vmem:[#allocation5 + $0x134] sm:$0xf0]  ;;  %v6913_v58 = vld [vmem:[#allocation5 + $0x108] sm:$0xf] }
 0x1b5   :  { %5495 = vmatpush.bf16.msra.mxu2 %v7106_v43  ;;  %v7057_v43 = vld [vmem:[#allocation5 + $0x228] sm:$0xf]  ;;  %v6930_v56 = vor.u32 %v10206_v40, %v6929_v32  ;;  %v10266_v0 = vld [vmem:[#allocation5 + $0x314] sm:$0xf0]  ;;  %v6914_v9 = vor.u32 %v10202_v59, %v6913_v58 }
 0x1b6   :  { %5508 = vmatpush.bf16.msra.mxu3 %v7234_v52  ;;  %v10170_v52 = vld [vmem:[#allocation5 + $0x14] sm:$0xf0]  ;;  %v7058_v57 = vor.u32 %v10238_v14, %v7057_v43  ;;  %v7041_v53 = vld [vmem:[#allocation5 + $0x208] sm:$0xf] }
 0x1b7   :  { %5470 = vmatpush.bf16.msra.mxu0 %v6834_v61  ;;  %v7186_v61 = vor.u32 %v10270_v48, %v7185_v47  ;;  %v7409_v3 = vld [vmem:[#allocation5 + $0x4e8] sm:$0xf]  ;;  %v10326_v4 = vld [vmem:[#allocation5 + $0x4f4] sm:$0xf0]  ;;  %v6786_v5 = vor.u32 %v10170_v52, %v6785_v51 }
 0x1b8   :  { %5483 = vmatpush.bf16.msra.mxu1 %v6962_v62  ;;  %v10234_v62 = vld [vmem:[#allocation5 + $0x214] sm:$0xf0]  ;;  %v5256_v2 = vpop.f32.mrf.mxu3  ;;  %v7665_v6 = vld [vmem:[#allocation5 + $0x6e8] sm:$0xf] }
 0x1b9   :  { %5496 = vmatpush.bf16.msra.mxu2 %v7090_v63  ;;  %v7169_v63 = vld [vmem:[#allocation5 + $0x308] sm:$0xf]  ;;  %v10358_v55 = vld [vmem:[#allocation5 + $0x5f4] sm:$0xf0]  ;;  %v7042_v10 = vor.u32 %v10234_v62, %v7041_v53 }
 0x1ba   :  { %5509 = vmatpush.bf16.msra.mxu3 %v7218_v36  ;;  %v7537_v36 = vld [vmem:[#allocation5 + $0x5e8] sm:$0xf]  ;;  %v10390_v8 = vld [vmem:[#allocation5 + $0x6f4] sm:$0xf0]  ;;  %v7170_v1 = vor.u32 %v10266_v0, %v7169_v63 }
 0x1bb   :  { %5471 = vmatpush.bf16.msra.mxu0 %v6818_v15  ;;  %v7793_v13 = vld [vmem:[#allocation5 + $0x7e8] sm:$0xf]  ;;  %v10422_v15 = vld [vmem:[#allocation5 + $0x7f4] sm:$0xf0]  ;;  %v7666_v26 = vor.u32 %v10390_v8, %v7665_v6 }
 0x1bc   :  { %5484 = vmatpush.bf16.msra.mxu1 %v6946_v21  ;;  %v7410_v21 = vor.u32 %v10326_v4, %v7409_v3  ;;  %v7393_v27 = vld [vmem:[#allocation5 + $0x4c8] sm:$0xf]  ;;  %v10322_v32 = vld [vmem:[#allocation5 + $0x4d4] sm:$0xf0] }
 0x1bd   :  { %5497 = vmatpush.bf16.msra.mxu2 %v7074_v24  ;;  %v7538_v24 = vor.u32 %v10358_v55, %v7537_v36  ;;  %v7521_v34 = vld [vmem:[#allocation5 + $0x5c8] sm:$0xf]  ;;  %v10354_v40 = vld [vmem:[#allocation5 + $0x5d4] sm:$0xf0] }
 0x1be   :  { %5510 = vmatpush.bf16.msra.mxu3 %v7202_v39  ;;  %v7794_v39 = vor.u32 %v10422_v15, %v7793_v13  ;;  %v7649_v43 = vld [vmem:[#allocation5 + $0x6c8] sm:$0xf]  ;;  %v10386_v14 = vld [vmem:[#allocation5 + $0x6d4] sm:$0xf0]  ;;  %v7522_v51 = vor.u32 %v10354_v40, %v7521_v34 }
 0x1bf   :  { %5472 = vmatpush.bf16.msra.mxu0 %v6802_v50  ;;  %v7777_v47 = vld [vmem:[#allocation5 + $0x7c8] sm:$0xf]  ;;  %v10418_v48 = vld [vmem:[#allocation5 + $0x7d4] sm:$0xf0]  ;;  %v7394_v50 = vor.u32 %v10322_v32, %v7393_v27  ;;  %v7650_v52 = vor.u32 %v10386_v14, %v7649_v43 }
 0x1c0   :  { %5485 = vmatpush.bf16.msra.mxu1 %v6930_v56  ;;  %v7377_v56 = vld [vmem:[#allocation5 + $0x4a8] sm:$0xf]  ;;  %v7778_v59 = vor.u32 %v10418_v48, %v7777_v47  ;;  %v10350_v53 = vld [vmem:[#allocation5 + $0x5b4] sm:$0xf0] }
 0x1c1   :  { %5498 = vmatpush.bf16.msra.mxu2 %v7058_v57  ;;  %v10318_v57 = vld [vmem:[#allocation5 + $0x4b4] sm:$0xf0]  ;;  %v7505_v58 = vld [vmem:[#allocation5 + $0x5a8] sm:$0xf] }
 0x1c2   :  { %5511 = vmatpush.bf16.msra.mxu3 %v7186_v61  ;;  %v7633_v60 = vld [vmem:[#allocation5 + $0x6a8] sm:$0xf]  ;;  %v10382_v61 = vld [vmem:[#allocation5 + $0x6b4] sm:$0xf0]  ;;  %v7378_v0 = vor.u32 %v10318_v57, %v7377_v56  ;;  %v7506_v2 = vor.u32 %v10350_v53, %v7505_v58 }
 0x1c3   :  { %5473 = vmatpush.bf16.msra.mxu0 %v6786_v5  ;;  %v7761_v62 = vld [vmem:[#allocation5 + $0x7a8] sm:$0xf]  ;;  %v10414_v63 = vld [vmem:[#allocation5 + $0x7b4] sm:$0xf0]  ;;  %v7634_v3 = vor.u32 %v10382_v61, %v7633_v60 }
 0x1c4   :  { %5486 = vmatpush.bf16.msra.mxu1 %v6914_v9  ;;  %v7361_v4 = vld [vmem:[#allocation5 + $0x488] sm:$0xf]  ;;  %v10314_v36 = vld [vmem:[#allocation5 + $0x494] sm:$0xf0]  ;;  %v7762_v55 = vor.u32 %v10414_v63, %v7761_v62 }
 0x1c5   :  { %5499 = vmatpush.bf16.msra.mxu2 %v7042_v10  ;;  %v7489_v5 = vld [vmem:[#allocation5 + $0x588] sm:$0xf]  ;;  %v10346_v6 = vld [vmem:[#allocation5 + $0x594] sm:$0xf0]  ;;  %v5267_v10 = vpop.f32.mrf.mxu0 }
 0x1c6   :  { %5512 = vmatpush.bf16.msra.mxu3 %v7170_v1  ;;  %5474 = vmatmul.bf16.vlgmr.msra.gmra.mxu0 %v11312_v19  ;;  %v7617_v8 = vld [vmem:[#allocation5 + $0x688] sm:$0xf]  ;;  %v10378_v9 = vld [vmem:[#allocation5 + $0x694] sm:$0xf0]  ;;  %v5268_v1 = vadd.f32 %v5267_v10, %v11426_v17 }
 0x1c7   :  { %5518 = vmatpush.bf16.msrb.mxu0 %v7410_v21  ;;  %5487 = vmatmul.bf16.vlgmr.msra.gmra.mxu1 %v11316_v22  ;;  %v7745_v13 = vld [vmem:[#allocation5 + $0x788] sm:$0xf]  ;;  %v10410_v15 = vld [vmem:[#allocation5 + $0x794] sm:$0xf0]  ;;  %v7362_v21 = vor.u32 %v10314_v36, %v7361_v4  ;;  %v7618_v27 = vor.u32 %v10378_v9, %v7617_v8 }
 0x1c8   :  { %5531 = vmatpush.bf16.msrb.mxu1 %v7538_v24  ;;  %5500 = vmatmul.bf16.vlgmr.msra.gmra.mxu2 %v11310_v18  ;;  %v5280_v24 = vpop.f32.mrf.mxu1  ;;  %v7345_v32 = vld [vmem:[#allocation5 + $0x468] sm:$0xf]  ;;  %v10310_v34 = vld [vmem:[#allocation5 + $0x474] sm:$0xf0]  ;;  %v7746_v40 = vor.u32 %v10410_v15, %v7745_v13 }
 0x1c9   :  { %5544 = vmatpush.bf16.msrb.mxu2 %v7666_v26  ;;  %5513 = vmatmul.bf16.vlgmr.msra.gmra.mxu3 %v11314_v20  ;;  %v7490_v26 = vor.u32 %v10346_v6, %v7489_v5  ;;  %v5281_v43 = vadd.f32 %v5280_v24, %v5268_v1  ;;  %v10342_v14 = vld [vmem:[#allocation5 + $0x574] sm:$0xf0]  ;;  %v7601_v47 = vld [vmem:[#allocation5 + $0x668] sm:$0xf] }
 0x1ca   :  { %5557 = vmatpush.bf16.msrb.mxu3 %v7794_v39  ;;  %v7473_v39 = vld [vmem:[#allocation5 + $0x568] sm:$0xf]  ;;  %v10374_v48 = vld [vmem:[#allocation5 + $0x674] sm:$0xf0] }
 0x1cb   :  { %5519 = vmatpush.bf16.msrb.mxu0 %v7394_v50  ;;  %v7729_v50 = vld [vmem:[#allocation5 + $0x768] sm:$0xf]  ;;  %v7474_v17 = vor.u32 %v10342_v14, %v7473_v39  ;;  %v7602_v56 = vor.u32 %v10374_v48, %v7601_v47  ;;  %v10306_v58 = vld [vmem:[#allocation5 + $0x454] sm:$0xf0]  ;;  %v5293_v60 = vpop.f32.mrf.mxu2 }
 0x1cc   :  { %5532 = vmatpush.bf16.msrb.mxu1 %v7522_v51  ;;  %v10406_v51 = vld [vmem:[#allocation5 + $0x774] sm:$0xf0]  ;;  %v7329_v57 = vld [vmem:[#allocation5 + $0x448] sm:$0xf] }
 0x1cd   :  { %5545 = vmatpush.bf16.msrb.mxu2 %v7650_v52  ;;  %v7346_v52 = vor.u32 %v10310_v34, %v7345_v32  ;;  %v7730_v53 = vor.u32 %v10406_v51, %v7729_v50  ;;  %v10338_v61 = vld [vmem:[#allocation5 + $0x554] sm:$0xf0]  ;;  %v7585_v62 = vld [vmem:[#allocation5 + $0x648] sm:$0xf]  ;;  %v5269_v36 = vpop.f32.mrf.mxu0  ;;  %v7330_v5 = vor.u32 %v10306_v58, %v7329_v57 }
 0x1ce   :  { %5558 = vmatpush.bf16.msrb.mxu3 %v7778_v59  ;;  %v7457_v59 = vld [vmem:[#allocation5 + $0x548] sm:$0xf]  ;;  %v10370_v63 = vld [vmem:[#allocation5 + $0x654] sm:$0xf0] }
 0x1cf   :  { %5520 = vmatpush.bf16.msrb.mxu0 %v7378_v0  ;;  %v5294_v0 = vadd.f32 %v5293_v60, %v5281_v43  ;;  %v10402_v4 = vld [vmem:[#allocation5 + $0x754] sm:$0xf0]  ;;  %v7458_v8 = vor.u32 %v10338_v61, %v7457_v59  ;;  %v7586_v9 = vor.u32 %v10370_v63, %v7585_v62  ;;  %v7313_v10 = vld [vmem:[#allocation5 + $0x428] sm:$0xf] }
 0x1d0   :  { %5533 = vmatpush.bf16.msrb.mxu1 %v7506_v2  ;;  %v5306_v2 = vpop.f32.mrf.mxu3  ;;  %v10302_v13 = vld [vmem:[#allocation5 + $0x434] sm:$0xf0]  ;;  %v7441_v15 = vld [vmem:[#allocation5 + $0x528] sm:$0xf] }
 0x1d1   :  { %5546 = vmatpush.bf16.msrb.mxu2 %v7634_v3  ;;  %v7713_v3 = vld [vmem:[#allocation5 + $0x748] sm:$0xf]  ;;  %v11433_v6 = vadd.f32 %v5306_v2, %v5294_v0  ;;  %v10398_v32 = vld [vmem:[#allocation5 + $0x734] sm:$0xf0]  ;;  %v7314_v34 = vor.u32 %v10302_v13, %v7313_v10 }
 0x1d2   :  { %5559 = vmatpush.bf16.msrb.mxu3 %v7762_v55  ;;  %v5282_v55 = vpop.f32.mrf.mxu1  ;;  %v7714_v1 = vor.u32 %v10402_v4, %v7713_v3  ;;  %v7569_v24 = vld [vmem:[#allocation5 + $0x628] sm:$0xf]  ;;  %v10330_v48 = vld [vmem:[#allocation5 + $0x514] sm:$0xf0] }
 0x1d3   :  { %5521 = vmatpush.bf16.msrb.mxu0 %v7362_v21  ;;  %v10334_v21 = vld [vmem:[#allocation5 + $0x534] sm:$0xf0]  ;;  %v7297_v39 = vld [vmem:[#allocation5 + $0x408] sm:$0xf]  ;;  %v5295_v57 = vpop.f32.mrf.mxu2 }
 0x1d4   :  { %5534 = vmatpush.bf16.msrb.mxu1 %v7490_v26  ;;  %v10366_v26 = vld [vmem:[#allocation5 + $0x634] sm:$0xf0]  ;;  %v7442_v43 = vor.u32 %v10334_v21, %v7441_v15  ;;  %v7425_v47 = vld [vmem:[#allocation5 + $0x508] sm:$0xf] }
 0x1d5   :  { %5547 = vmatpush.bf16.msrb.mxu2 %v7618_v27  ;;  %v7697_v27 = vld [vmem:[#allocation5 + $0x728] sm:$0xf]  ;;  %v7570_v14 = vor.u32 %v10366_v26, %v7569_v24  ;;  %v10454_v59 = vld [vmem:[#allocation5 + $0x8f4] sm:$0xf0]  ;;  %v7426_v2 = vor.u32 %v10330_v48, %v7425_v47 }
 0x1d6   :  { %5560 = vmatpush.bf16.msrb.mxu3 %v7746_v40  ;;  %v10298_v40 = vld [vmem:[#allocation5 + $0x414] sm:$0xf0]  ;;  %v7553_v50 = vld [vmem:[#allocation5 + $0x608] sm:$0xf]  ;;  %v7698_v51 = vor.u32 %v10398_v32, %v7697_v27 }
 0x1d7   :  { %5522 = vmatpush.bf16.msrb.mxu0 %v7346_v52  ;;  %v10362_v52 = vld [vmem:[#allocation5 + $0x614] sm:$0xf0]  ;;  %v7921_v58 = vld [vmem:[#allocation5 + $0x8e8] sm:$0xf]  ;;  %v7298_v61 = vor.u32 %v10298_v40, %v7297_v39 }
 0x1d8   :  { %5535 = vmatpush.bf16.msrb.mxu1 %v7474_v17  ;;  %v7681_v17 = vld [vmem:[#allocation5 + $0x708] sm:$0xf]  ;;  %v5308_v60 = vpop.f32.mrf.mxu3  ;;  %v10486_v62 = vld [vmem:[#allocation5 + $0x9f4] sm:$0xf0]  ;;  %v7554_v3 = vor.u32 %v10362_v52, %v7553_v50  ;;  %v7922_v55 = vor.u32 %v10454_v59, %v7921_v58 }
 0x1d9   :  { %5548 = vmatpush.bf16.msrb.mxu2 %v7602_v56  ;;  %v10394_v56 = vld [vmem:[#allocation5 + $0x714] sm:$0xf0]  ;;  %v8177_v63 = vld [vmem:[#allocation5 + $0xae8] sm:$0xf] }
 0x1da   :  { %5561 = vmatpush.bf16.msrb.mxu3 %v7730_v53  ;;  %v8049_v53 = vld [vmem:[#allocation5 + $0x9e8] sm:$0xf]  ;;  %v10518_v0 = vld [vmem:[#allocation5 + $0xaf4] sm:$0xf0] }
 0x1db   :  { %5523 = vmatpush.bf16.msrb.mxu0 %v7330_v5  ;;  %v8305_v4 = vld [vmem:[#allocation5 + $0xbe8] sm:$0xf]  ;;  %v10550_v36 = vld [vmem:[#allocation5 + $0xbf4] sm:$0xf0]  ;;  %v7682_v5 = vor.u32 %v10394_v56, %v7681_v17 }
 0x1dc   :  { %5536 = vmatpush.bf16.msrb.mxu1 %v7458_v8  ;;  %v8050_v8 = vor.u32 %v10486_v62, %v8049_v53  ;;  %v7905_v10 = vld [vmem:[#allocation5 + $0x8c8] sm:$0xf]  ;;  %v10450_v13 = vld [vmem:[#allocation5 + $0x8d4] sm:$0xf0] }
 0x1dd   :  { %5549 = vmatpush.bf16.msrb.mxu2 %v7586_v9  ;;  %v8178_v9 = vor.u32 %v10518_v0, %v8177_v63  ;;  %v8033_v15 = vld [vmem:[#allocation5 + $0x9c8] sm:$0xf]  ;;  %v10482_v21 = vld [vmem:[#allocation5 + $0x9d4] sm:$0xf0] }
 0x1de   :  { %5562 = vmatpush.bf16.msrb.mxu3 %v7714_v1  ;;  %v8306_v1 = vor.u32 %v10550_v36, %v8305_v4  ;;  %v8161_v24 = vld [vmem:[#allocation5 + $0xac8] sm:$0xf]  ;;  %v10514_v26 = vld [vmem:[#allocation5 + $0xad4] sm:$0xf0]  ;;  %v8034_v39 = vor.u32 %v10482_v21, %v8033_v15 }
 0x1df   :  { %5524 = vmatpush.bf16.msrb.mxu0 %v7314_v34  ;;  %v8289_v27 = vld [vmem:[#allocation5 + $0xbc8] sm:$0xf]  ;;  %v10546_v32 = vld [vmem:[#allocation5 + $0xbd4] sm:$0xf0]  ;;  %v7906_v34 = vor.u32 %v10450_v13, %v7905_v10  ;;  %v8162_v40 = vor.u32 %v10514_v26, %v8161_v24 }
 0x1e0   :  { %5537 = vmatpush.bf16.msrb.mxu1 %v7442_v43  ;;  %v7889_v43 = vld [vmem:[#allocation5 + $0x8a8] sm:$0xf]  ;;  %v8290_v48 = vor.u32 %v10546_v32, %v8289_v27  ;;  %v10478_v50 = vld [vmem:[#allocation5 + $0x9b4] sm:$0xf0] }
 0x1e1   :  { %5550 = vmatpush.bf16.msrb.mxu2 %v7570_v14  ;;  %v10446_v14 = vld [vmem:[#allocation5 + $0x8b4] sm:$0xf0]  ;;  %v8017_v47 = vld [vmem:[#allocation5 + $0x9a8] sm:$0xf] }
 0x1e2   :  { %5563 = vmatpush.bf16.msrb.mxu3 %v7698_v51  ;;  %v8145_v51 = vld [vmem:[#allocation5 + $0xaa8] sm:$0xf]  ;;  %v10510_v52 = vld [vmem:[#allocation5 + $0xab4] sm:$0xf0]  ;;  %v7890_v57 = vor.u32 %v10446_v14, %v7889_v43  ;;  %v8018_v58 = vor.u32 %v10478_v50, %v8017_v47 }
 0x1e3   :  { %5525 = vmatpush.bf16.msrb.mxu0 %v7298_v61  ;;  %v8273_v17 = vld [vmem:[#allocation5 + $0xba8] sm:$0xf]  ;;  %v10542_v56 = vld [vmem:[#allocation5 + $0xbb4] sm:$0xf0]  ;;  %v8146_v59 = vor.u32 %v10510_v52, %v8145_v51 }
 0x1e4   :  { %5538 = vmatpush.bf16.msrb.mxu1 %v7426_v2  ;;  %v7873_v53 = vld [vmem:[#allocation5 + $0x888] sm:$0xf]  ;;  %v10442_v60 = vld [vmem:[#allocation5 + $0x894] sm:$0xf0]  ;;  %v8274_v62 = vor.u32 %v10542_v56, %v8273_v17 }
 0x1e5   :  { %5551 = vmatpush.bf16.msrb.mxu2 %v7554_v3  ;;  %v8001_v61 = vld [vmem:[#allocation5 + $0x988] sm:$0xf]  ;;  %v10474_v63 = vld [vmem:[#allocation5 + $0x994] sm:$0xf0]  ;;  %v5319_v3 = vpop.f32.mrf.mxu0 }
 0x1e6   :  { %5564 = vmatpush.bf16.msrb.mxu3 %v7682_v5  ;;  %5526 = vmatmul.bf16.vlgmr.msrb.gmra.mxu0 %v11324_v41  ;;  %v8129_v0 = vld [vmem:[#allocation5 + $0xa88] sm:$0xf]  ;;  %v10506_v2 = vld [vmem:[#allocation5 + $0xa94] sm:$0xf0]  ;;  %v5320_v5 = vadd.f32 %v5319_v3, %v11433_v6 }
 0x1e7   :  { %5570 = vmatpush.bf16.msra.mxu0 %v7922_v55  ;;  %5539 = vmatmul.bf16.vlgmr.msrb.gmra.mxu1 %v11328_v44  ;;  %v8257_v4 = vld [vmem:[#allocation5 + $0xb88] sm:$0xf]  ;;  %v10538_v36 = vld [vmem:[#allocation5 + $0xb94] sm:$0xf0]  ;;  %v7874_v55 = vor.u32 %v10442_v60, %v7873_v53  ;;  %v8130_v10 = vor.u32 %v10506_v2, %v8129_v0 }
 0x1e8   :  { %5583 = vmatpush.bf16.msra.mxu1 %v8050_v8  ;;  %5552 = vmatmul.bf16.vlgmr.msrb.gmra.mxu2 %v11322_v38  ;;  %v5332_v8 = vpop.f32.mrf.mxu1  ;;  %v7857_v13 = vld [vmem:[#allocation5 + $0x868] sm:$0xf]  ;;  %v10438_v15 = vld [vmem:[#allocation5 + $0x874] sm:$0xf0]  ;;  %v8258_v21 = vor.u32 %v10538_v36, %v8257_v4 }
 0x1e9   :  { %5596 = vmatpush.bf16.msra.mxu2 %v8178_v9  ;;  %5565 = vmatmul.bf16.vlgmr.msrb.gmra.mxu3 %v11326_v42  ;;  %v8002_v9 = vor.u32 %v10474_v63, %v8001_v61  ;;  %v5333_v24 = vadd.f32 %v5332_v8, %v5320_v5  ;;  %v10470_v26 = vld [vmem:[#allocation5 + $0x974] sm:$0xf0]  ;;  %v8113_v27 = vld [vmem:[#allocation5 + $0xa68] sm:$0xf] }
 0x1ea   :  { %5609 = vmatpush.bf16.msra.mxu3 %v8306_v1  ;;  %v7985_v1 = vld [vmem:[#allocation5 + $0x968] sm:$0xf]  ;;  %v10502_v32 = vld [vmem:[#allocation5 + $0xa74] sm:$0xf0] }
 0x1eb   :  { %5571 = vmatpush.bf16.msra.mxu0 %v7906_v34  ;;  %v8241_v34 = vld [vmem:[#allocation5 + $0xb68] sm:$0xf]  ;;  %v7986_v6 = vor.u32 %v10470_v26, %v7985_v1  ;;  %v8114_v43 = vor.u32 %v10502_v32, %v8113_v27  ;;  %v10434_v47 = vld [vmem:[#allocation5 + $0x854] sm:$0xf0]  ;;  %v5345_v51 = vpop.f32.mrf.mxu2 }
 0x1ec   :  { %5584 = vmatpush.bf16.msra.mxu1 %v8034_v39  ;;  %v10534_v39 = vld [vmem:[#allocation5 + $0xb74] sm:$0xf0]  ;;  %v7841_v14 = vld [vmem:[#allocation5 + $0x848] sm:$0xf] }
 0x1ed   :  { %5597 = vmatpush.bf16.msra.mxu2 %v8162_v40  ;;  %v7858_v40 = vor.u32 %v10438_v15, %v7857_v13  ;;  %v8242_v50 = vor.u32 %v10534_v39, %v8241_v34  ;;  %v10466_v52 = vld [vmem:[#allocation5 + $0x954] sm:$0xf0]  ;;  %v8097_v17 = vld [vmem:[#allocation5 + $0xa48] sm:$0xf]  ;;  %v5321_v60 = vpop.f32.mrf.mxu0  ;;  %v7842_v61 = vor.u32 %v10434_v47, %v7841_v14 }
 0x1ee   :  { %5610 = vmatpush.bf16.msra.mxu3 %v8290_v48  ;;  %v7969_v48 = vld [vmem:[#allocation5 + $0x948] sm:$0xf]  ;;  %v10498_v56 = vld [vmem:[#allocation5 + $0xa54] sm:$0xf0] }
 0x1ef   :  { %5572 = vmatpush.bf16.msra.mxu0 %v7890_v57  ;;  %v5346_v57 = vadd.f32 %v5345_v51, %v5333_v24  ;;  %v10530_v53 = vld [vmem:[#allocation5 + $0xb54] sm:$0xf0]  ;;  %v7970_v0 = vor.u32 %v10466_v52, %v7969_v48  ;;  %v8098_v2 = vor.u32 %v10498_v56, %v8097_v17  ;;  %v7825_v3 = vld [vmem:[#allocation5 + $0x828] sm:$0xf] }
 0x1f0   :  { %5585 = vmatpush.bf16.msra.mxu1 %v8018_v58  ;;  %v5358_v58 = vpop.f32.mrf.mxu3  ;;  %v10430_v4 = vld [vmem:[#allocation5 + $0x834] sm:$0xf0]  ;;  %v7953_v36 = vld [vmem:[#allocation5 + $0x928] sm:$0xf] }
 0x1f1   :  { %5598 = vmatpush.bf16.msra.mxu2 %v8146_v59  ;;  %v8225_v59 = vld [vmem:[#allocation5 + $0xb48] sm:$0xf]  ;;  %v11440_v63 = vadd.f32 %v5358_v58, %v5346_v57  ;;  %v10526_v13 = vld [vmem:[#allocation5 + $0xb34] sm:$0xf0]  ;;  %v7826_v15 = vor.u32 %v10430_v4, %v7825_v3 }
 0x1f2   :  { %5611 = vmatpush.bf16.msra.mxu3 %v8274_v62  ;;  %v5334_v62 = vpop.f32.mrf.mxu1  ;;  %v8226_v5 = vor.u32 %v10530_v53, %v8225_v59  ;;  %v8081_v8 = vld [vmem:[#allocation5 + $0xa28] sm:$0xf]  ;;  %v10458_v32 = vld [vmem:[#allocation5 + $0x914] sm:$0xf0] }
 0x1f3   :  { %5573 = vmatpush.bf16.msra.mxu0 %v7874_v55  ;;  %v10462_v55 = vld [vmem:[#allocation5 + $0x934] sm:$0xf0]  ;;  %v7809_v1 = vld [vmem:[#allocation5 + $0x808] sm:$0xf]  ;;  %v5347_v14 = vpop.f32.mrf.mxu2 }
 0x1f4   :  { %5586 = vmatpush.bf16.msra.mxu1 %v8002_v9  ;;  %v10494_v9 = vld [vmem:[#allocation5 + $0xa34] sm:$0xf0]  ;;  %v7954_v24 = vor.u32 %v10462_v55, %v7953_v36  ;;  %v7937_v27 = vld [vmem:[#allocation5 + $0x908] sm:$0xf] }
 0x1f5   :  { %5599 = vmatpush.bf16.msra.mxu2 %v8130_v10  ;;  %v8209_v10 = vld [vmem:[#allocation5 + $0xb28] sm:$0xf]  ;;  %v8082_v26 = vor.u32 %v10494_v9, %v8081_v8  ;;  %v10582_v48 = vld [vmem:[#allocation5 + $0xcf4] sm:$0xf0]  ;;  %v7938_v58 = vor.u32 %v10458_v32, %v7937_v27 }
 0x1f6   :  { %5612 = vmatpush.bf16.msra.mxu3 %v8258_v21  ;;  %v10426_v21 = vld [vmem:[#allocation5 + $0x814] sm:$0xf0]  ;;  %v8065_v34 = vld [vmem:[#allocation5 + $0xa08] sm:$0xf]  ;;  %v8210_v39 = vor.u32 %v10526_v13, %v8209_v10 }
 0x1f7   :  { %5574 = vmatpush.bf16.msra.mxu0 %v7858_v40  ;;  %v10490_v40 = vld [vmem:[#allocation5 + $0xa14] sm:$0xf0]  ;;  %v8433_v47 = vld [vmem:[#allocation5 + $0xce8] sm:$0xf]  ;;  %v7810_v52 = vor.u32 %v10426_v21, %v7809_v1 }
 0x1f8   :  { %5587 = vmatpush.bf16.msra.mxu1 %v7986_v6  ;;  %v8193_v6 = vld [vmem:[#allocation5 + $0xb08] sm:$0xf]  ;;  %v5360_v51 = vpop.f32.mrf.mxu3  ;;  %v10614_v17 = vld [vmem:[#allocation5 + $0xdf4] sm:$0xf0]  ;;  %v8066_v59 = vor.u32 %v10490_v40, %v8065_v34  ;;  %v8434_v62 = vor.u32 %v10582_v48, %v8433_v47 }
 0x1f9   :  { %5600 = vmatpush.bf16.msra.mxu2 %v8114_v43  ;;  %v10522_v43 = vld [vmem:[#allocation5 + $0xb14] sm:$0xf0]  ;;  %v8689_v56 = vld [vmem:[#allocation5 + $0xee8] sm:$0xf] }
 0x1fa   :  { %5613 = vmatpush.bf16.msra.mxu3 %v8242_v50  ;;  %v8561_v50 = vld [vmem:[#allocation5 + $0xde8] sm:$0xf]  ;;  %v10646_v57 = vld [vmem:[#allocation5 + $0xef4] sm:$0xf0] }
 0x1fb   :  { %5575 = vmatpush.bf16.msra.mxu0 %v7842_v61  ;;  %v8817_v53 = vld [vmem:[#allocation5 + $0xfe8] sm:$0xf]  ;;  %v10678_v60 = vld [vmem:[#allocation5 + $0xff4] sm:$0xf0]  ;;  %v8194_v61 = vor.u32 %v10522_v43, %v8193_v6 }
 0x1fc   :  { %5588 = vmatpush.bf16.msra.mxu1 %v7970_v0  ;;  %v8562_v0 = vor.u32 %v10614_v17, %v8561_v50  ;;  %v8417_v3 = vld [vmem:[#allocation5 + $0xcc8] sm:$0xf]  ;;  %v10578_v4 = vld [vmem:[#allocation5 + $0xcd4] sm:$0xf0] }
 0x1fd   :  { %5601 = vmatpush.bf16.msra.mxu2 %v8098_v2  ;;  %v8690_v2 = vor.u32 %v10646_v57, %v8689_v56  ;;  %v8545_v36 = vld [vmem:[#allocation5 + $0xdc8] sm:$0xf]  ;;  %v10610_v55 = vld [vmem:[#allocation5 + $0xdd4] sm:$0xf0] }
 0x1fe   :  { %5614 = vmatpush.bf16.msra.mxu3 %v8226_v5  ;;  %v8818_v5 = vor.u32 %v10678_v60, %v8817_v53  ;;  %v8673_v8 = vld [vmem:[#allocation5 + $0xec8] sm:$0xf]  ;;  %v10642_v9 = vld [vmem:[#allocation5 + $0xed4] sm:$0xf0]  ;;  %v8546_v1 = vor.u32 %v10610_v55, %v8545_v36 }
 0x1ff   :  { %5576 = vmatpush.bf16.msra.mxu0 %v7826_v15  ;;  %v8801_v10 = vld [vmem:[#allocation5 + $0xfc8] sm:$0xf]  ;;  %v10674_v13 = vld [vmem:[#allocation5 + $0xfd4] sm:$0xf0]  ;;  %v8418_v15 = vor.u32 %v10578_v4, %v8417_v3  ;;  %v8674_v21 = vor.u32 %v10642_v9, %v8673_v8 }
 0x200   :  { %5589 = vmatpush.bf16.msra.mxu1 %v7954_v24  ;;  %v8401_v24 = vld [vmem:[#allocation5 + $0xca8] sm:$0xf]  ;;  %v8802_v32 = vor.u32 %v10674_v13, %v8801_v10  ;;  %v10606_v34 = vld [vmem:[#allocation5 + $0xdb4] sm:$0xf0] }
 0x201   :  { %5602 = vmatpush.bf16.msra.mxu2 %v8082_v26  ;;  %v10574_v26 = vld [vmem:[#allocation5 + $0xcb4] sm:$0xf0]  ;;  %v8529_v27 = vld [vmem:[#allocation5 + $0xda8] sm:$0xf] }
 0x202   :  { %5615 = vmatpush.bf16.msra.mxu3 %v8210_v39  ;;  %v8657_v39 = vld [vmem:[#allocation5 + $0xea8] sm:$0xf]  ;;  %v10638_v40 = vld [vmem:[#allocation5 + $0xeb4] sm:$0xf0]  ;;  %v8402_v14 = vor.u32 %v10574_v26, %v8401_v24  ;;  %v8530_v47 = vor.u32 %v10606_v34, %v8529_v27 }
 0x203   :  { %5577 = vmatpush.bf16.msra.mxu0 %v7810_v52  ;;  %v8785_v6 = vld [vmem:[#allocation5 + $0xfa8] sm:$0xf]  ;;  %v10670_v43 = vld [vmem:[#allocation5 + $0xfb4] sm:$0xf0]  ;;  %v8658_v48 = vor.u32 %v10638_v40, %v8657_v39 }
 0x204   :  { %5590 = vmatpush.bf16.msra.mxu1 %v7938_v58  ;;  %v8385_v50 = vld [vmem:[#allocation5 + $0xc88] sm:$0xf]  ;;  %v10570_v51 = vld [vmem:[#allocation5 + $0xc94] sm:$0xf0]  ;;  %v8786_v17 = vor.u32 %v10670_v43, %v8785_v6 }
 0x205   :  { %5603 = vmatpush.bf16.msra.mxu2 %v8066_v59  ;;  %v8513_v52 = vld [vmem:[#allocation5 + $0xd88] sm:$0xf]  ;;  %v10602_v56 = vld [vmem:[#allocation5 + $0xd94] sm:$0xf0]  ;;  %v5371_v59 = vpop.f32.mrf.mxu0 }
 0x206   :  { %5616 = vmatpush.bf16.msra.mxu3 %v8194_v61  ;;  %5578 = vmatmul.bf16.vlgmr.msra.gmra.mxu0 %v11334_v25  ;;  %v8641_v57 = vld [vmem:[#allocation5 + $0xe88] sm:$0xf]  ;;  %v10634_v58 = vld [vmem:[#allocation5 + $0xe94] sm:$0xf0]  ;;  %v5372_v61 = vadd.f32 %v5371_v59, %v11440_v63 }
 0x207   :  { %5622 = vmatpush.bf16.msrb.mxu0 %v8434_v62  ;;  %5591 = vmatmul.bf16.vlgmr.msra.gmra.mxu1 %v11338_v30  ;;  %v8769_v53 = vld [vmem:[#allocation5 + $0xf88] sm:$0xf]  ;;  %v10666_v60 = vld [vmem:[#allocation5 + $0xf94] sm:$0xf0]  ;;  %v8386_v62 = vor.u32 %v10570_v51, %v8385_v50  ;;  %v8642_v3 = vor.u32 %v10634_v58, %v8641_v57 }
 0x208   :  { %5635 = vmatpush.bf16.msrb.mxu1 %v8562_v0  ;;  %5604 = vmatmul.bf16.vlgmr.msra.gmra.mxu2 %v11336_v29  ;;  %v5384_v0 = vpop.f32.mrf.mxu1  ;;  %v8369_v4 = vld [vmem:[#allocation5 + $0xc68] sm:$0xf]  ;;  %v10566_v36 = vld [vmem:[#allocation5 + $0xc74] sm:$0xf0]  ;;  %v8770_v55 = vor.u32 %v10666_v60, %v8769_v53 }
 0x209   :  { %5648 = vmatpush.bf16.msrb.mxu2 %v8690_v2  ;;  %5617 = vmatmul.bf16.vlgmr.msra.gmra.mxu3 %v11340_v33  ;;  %v8514_v2 = vor.u32 %v10602_v56, %v8513_v52  ;;  %v5385_v8 = vadd.f32 %v5384_v0, %v5372_v61  ;;  %v10598_v9 = vld [vmem:[#allocation5 + $0xd74] sm:$0xf0]  ;;  %v8625_v10 = vld [vmem:[#allocation5 + $0xe68] sm:$0xf] }
 0x20a   :  { %5661 = vmatpush.bf16.msrb.mxu3 %v8818_v5  ;;  %v8497_v5 = vld [vmem:[#allocation5 + $0xd68] sm:$0xf]  ;;  %v10630_v13 = vld [vmem:[#allocation5 + $0xe74] sm:$0xf0] }
 0x20b   :  { %5623 = vmatpush.bf16.msrb.mxu0 %v8418_v15  ;;  %v8753_v15 = vld [vmem:[#allocation5 + $0xf68] sm:$0xf]  ;;  %v8498_v63 = vor.u32 %v10598_v9, %v8497_v5  ;;  %v8626_v24 = vor.u32 %v10630_v13, %v8625_v10  ;;  %v10562_v27 = vld [vmem:[#allocation5 + $0xc54] sm:$0xf0]  ;;  %v5397_v39 = vpop.f32.mrf.mxu2 }
 0x20c   :  { %5636 = vmatpush.bf16.msrb.mxu1 %v8546_v1  ;;  %v10662_v1 = vld [vmem:[#allocation5 + $0xf74] sm:$0xf0]  ;;  %v8353_v26 = vld [vmem:[#allocation5 + $0xc48] sm:$0xf] }
 0x20d   :  { %5649 = vmatpush.bf16.msrb.mxu2 %v8674_v21  ;;  %v8370_v21 = vor.u32 %v10566_v36, %v8369_v4  ;;  %v8754_v34 = vor.u32 %v10662_v1, %v8753_v15  ;;  %v10594_v40 = vld [vmem:[#allocation5 + $0xd54] sm:$0xf0]  ;;  %v8609_v6 = vld [vmem:[#allocation5 + $0xe48] sm:$0xf]  ;;  %v5373_v51 = vpop.f32.mrf.mxu0  ;;  %v8354_v52 = vor.u32 %v10562_v27, %v8353_v26 }
 0x20e   :  { %5662 = vmatpush.bf16.msrb.mxu3 %v8802_v32  ;;  %v8481_v32 = vld [vmem:[#allocation5 + $0xd48] sm:$0xf]  ;;  %v10626_v43 = vld [vmem:[#allocation5 + $0xe54] sm:$0xf0] }
 0x20f   :  { %5624 = vmatpush.bf16.msrb.mxu0 %v8402_v14  ;;  %v5398_v14 = vadd.f32 %v5397_v39, %v5385_v8  ;;  %v10658_v50 = vld [vmem:[#allocation5 + $0xf54] sm:$0xf0]  ;;  %v8482_v57 = vor.u32 %v10594_v40, %v8481_v32  ;;  %v8610_v58 = vor.u32 %v10626_v43, %v8609_v6  ;;  %v8337_v59 = vld [vmem:[#allocation5 + $0xc28] sm:$0xf] }
 0x210   :  { %5637 = vmatpush.bf16.msrb.mxu1 %v8530_v47  ;;  %v5410_v47 = vpop.f32.mrf.mxu3  ;;  %v10558_v53 = vld [vmem:[#allocation5 + $0xc34] sm:$0xf0]  ;;  %v8465_v60 = vld [vmem:[#allocation5 + $0xd28] sm:$0xf] }
 0x211   :  { %5650 = vmatpush.bf16.msrb.mxu2 %v8658_v48  ;;  %v8737_v48 = vld [vmem:[#allocation5 + $0xf48] sm:$0xf]  ;;  %v11447_v56 = vadd.f32 %v5410_v47, %v5398_v14  ;;  %v10654_v4 = vld [vmem:[#allocation5 + $0xf34] sm:$0xf0]  ;;  %v8338_v36 = vor.u32 %v10558_v53, %v8337_v59 }
 0x212   :  { %5663 = vmatpush.bf16.msrb.mxu3 %v8786_v17  ;;  %v5386_v17 = vpop.f32.mrf.mxu1  ;;  %v8738_v61 = vor.u32 %v10658_v50, %v8737_v48  ;;  %v8593_v0 = vld [vmem:[#allocation5 + $0xe28] sm:$0xf]  ;;  %v10586_v13 = vld [vmem:[#allocation5 + $0xd14] sm:$0xf0] }
 0x213   :  { %5625 = vmatpush.bf16.msrb.mxu0 %v8386_v62  ;;  %v10590_v62 = vld [vmem:[#allocation5 + $0xd34] sm:$0xf0]  ;;  %v8321_v5 = vld [vmem:[#allocation5 + $0xc08] sm:$0xf]  ;;  %v5399_v26 = vpop.f32.mrf.mxu2 }
 0x214   :  { %5638 = vmatpush.bf16.msrb.mxu1 %v8514_v2  ;;  %v10622_v2 = vld [vmem:[#allocation5 + $0xe34] sm:$0xf0]  ;;  %v8466_v8 = vor.u32 %v10590_v62, %v8465_v60  ;;  %v8449_v10 = vld [vmem:[#allocation5 + $0xd08] sm:$0xf] }
 0x215   :  { %5651 = vmatpush.bf16.msrb.mxu2 %v8642_v3  ;;  %v8721_v3 = vld [vmem:[#allocation5 + $0xf28] sm:$0xf]  ;;  %v8594_v9 = vor.u32 %v10622_v2, %v8593_v0  ;;  %v10710_v32 = vld [vmem:[#allocation5 + $0x10f4] sm:$0xf0]  ;;  %v8450_v47 = vor.u32 %v10586_v13, %v8449_v10 }
 0x216   :  { %5664 = vmatpush.bf16.msrb.mxu3 %v8770_v55  ;;  %v10554_v55 = vld [vmem:[#allocation5 + $0xc14] sm:$0xf0]  ;;  %v8577_v15 = vld [vmem:[#allocation5 + $0xe08] sm:$0xf]  ;;  %v8722_v1 = vor.u32 %v10654_v4, %v8721_v3 }
 0x217   :  { %5626 = vmatpush.bf16.msrb.mxu0 %v8370_v21  ;;  %v10618_v21 = vld [vmem:[#allocation5 + $0xe14] sm:$0xf0]  ;;  %v8945_v27 = vld [vmem:[#allocation5 + $0x10e8] sm:$0xf]  ;;  %v8322_v40 = vor.u32 %v10554_v55, %v8321_v5 }
 0x218   :  { %5639 = vmatpush.bf16.msrb.mxu1 %v8498_v63  ;;  %v8705_v63 = vld [vmem:[#allocation5 + $0xf08] sm:$0xf]  ;;  %v5412_v39 = vpop.f32.mrf.mxu3  ;;  %v10742_v6 = vld [vmem:[#allocation5 + $0x11f4] sm:$0xf0]  ;;  %v8578_v48 = vor.u32 %v10618_v21, %v8577_v15  ;;  %v8946_v17 = vor.u32 %v10710_v32, %v8945_v27 }
 0x219   :  { %5652 = vmatpush.bf16.msrb.mxu2 %v8626_v24  ;;  %v10650_v24 = vld [vmem:[#allocation5 + $0xf14] sm:$0xf0]  ;;  %v9201_v43 = vld [vmem:[#allocation5 + $0x12e8] sm:$0xf] }
 0x21a   :  { %5665 = vmatpush.bf16.msrb.mxu3 %v8754_v34  ;;  %v9073_v34 = vld [vmem:[#allocation5 + $0x11e8] sm:$0xf]  ;;  %v10774_v14 = vld [vmem:[#allocation5 + $0x12f4] sm:$0xf0] }
 0x21b   :  { %5627 = vmatpush.bf16.msrb.mxu0 %v8354_v52  ;;  %v9329_v50 = vld [vmem:[#allocation5 + $0x13e8] sm:$0xf]  ;;  %v10806_v51 = vld [vmem:[#allocation5 + $0x13f4] sm:$0xf0]  ;;  %v8706_v52 = vor.u32 %v10650_v24, %v8705_v63 }
 0x21c   :  { %5640 = vmatpush.bf16.msrb.mxu1 %v8482_v57  ;;  %v9074_v57 = vor.u32 %v10742_v6, %v9073_v34  ;;  %v8929_v59 = vld [vmem:[#allocation5 + $0x10c8] sm:$0xf]  ;;  %v10706_v53 = vld [vmem:[#allocation5 + $0x10d4] sm:$0xf0] }
 0x21d   :  { %5653 = vmatpush.bf16.msrb.mxu2 %v8610_v58  ;;  %v9202_v58 = vor.u32 %v10774_v14, %v9201_v43  ;;  %v9057_v60 = vld [vmem:[#allocation5 + $0x11c8] sm:$0xf]  ;;  %v10738_v62 = vld [vmem:[#allocation5 + $0x11d4] sm:$0xf0] }
 0x21e   :  { %5666 = vmatpush.bf16.msrb.mxu3 %v8738_v61  ;;  %v9330_v61 = vor.u32 %v10806_v51, %v9329_v50  ;;  %v9185_v0 = vld [vmem:[#allocation5 + $0x12c8] sm:$0xf]  ;;  %v10770_v2 = vld [vmem:[#allocation5 + $0x12d4] sm:$0xf0]  ;;  %v9058_v5 = vor.u32 %v10738_v62, %v9057_v60 }
 0x21f   :  { %5628 = vmatpush.bf16.msrb.mxu0 %v8338_v36  ;;  %v9313_v3 = vld [vmem:[#allocation5 + $0x13c8] sm:$0xf]  ;;  %v10802_v4 = vld [vmem:[#allocation5 + $0x13d4] sm:$0xf0]  ;;  %v8930_v36 = vor.u32 %v10706_v53, %v8929_v59  ;;  %v9186_v55 = vor.u32 %v10770_v2, %v9185_v0 }
 0x220   :  { %5641 = vmatpush.bf16.msrb.mxu1 %v8466_v8  ;;  %v8913_v8 = vld [vmem:[#allocation5 + $0x10a8] sm:$0xf]  ;;  %v9314_v13 = vor.u32 %v10802_v4, %v9313_v3  ;;  %v10734_v15 = vld [vmem:[#allocation5 + $0x11b4] sm:$0xf0] }
 0x221   :  { %5654 = vmatpush.bf16.msrb.mxu2 %v8594_v9  ;;  %v10702_v9 = vld [vmem:[#allocation5 + $0x10b4] sm:$0xf0]  ;;  %v9041_v10 = vld [vmem:[#allocation5 + $0x11a8] sm:$0xf] }
 0x222   :  { %5667 = vmatpush.bf16.msrb.mxu3 %v8722_v1  ;;  %v9169_v1 = vld [vmem:[#allocation5 + $0x12a8] sm:$0xf]  ;;  %v10766_v21 = vld [vmem:[#allocation5 + $0x12b4] sm:$0xf0]  ;;  %v8914_v26 = vor.u32 %v10702_v9, %v8913_v8  ;;  %v9042_v27 = vor.u32 %v10734_v15, %v9041_v10 }
 0x223   :  { %5629 = vmatpush.bf16.msrb.mxu0 %v8322_v40  ;;  %v9297_v63 = vld [vmem:[#allocation5 + $0x13a8] sm:$0xf]  ;;  %v10798_v24 = vld [vmem:[#allocation5 + $0x13b4] sm:$0xf0]  ;;  %v9170_v32 = vor.u32 %v10766_v21, %v9169_v1 }
 0x224   :  { %5642 = vmatpush.bf16.msrb.mxu1 %v8450_v47  ;;  %v8897_v34 = vld [vmem:[#allocation5 + $0x1088] sm:$0xf]  ;;  %v10698_v39 = vld [vmem:[#allocation5 + $0x1094] sm:$0xf0]  ;;  %v9298_v6 = vor.u32 %v10798_v24, %v9297_v63 }
 0x225   :  { %5655 = vmatpush.bf16.msrb.mxu2 %v8578_v48  ;;  %v9025_v40 = vld [vmem:[#allocation5 + $0x1188] sm:$0xf]  ;;  %v10730_v43 = vld [vmem:[#allocation5 + $0x1194] sm:$0xf0]  ;;  %v5423_v48 = vpop.f32.mrf.mxu0 }
 0x226   :  { %5668 = vmatpush.bf16.msrb.mxu3 %v8706_v52  ;;  %5630 = vmatmul.bf16.vlgmr.msrb.gmra.mxu0 %v11346_v23  ;;  %v9153_v14 = vld [vmem:[#allocation5 + $0x1288] sm:$0xf]  ;;  %v10762_v47 = vld [vmem:[#allocation5 + $0x1294] sm:$0xf0]  ;;  %v5424_v52 = vadd.f32 %v5423_v48, %v11447_v56 }
 0x227   :  { %5674 = vmatpush.bf16.msra.mxu0 %v8946_v17  ;;  %5643 = vmatmul.bf16.vlgmr.msrb.gmra.mxu1 %v11350_v31  ;;  %v9281_v50 = vld [vmem:[#allocation5 + $0x1388] sm:$0xf]  ;;  %v10794_v51 = vld [vmem:[#allocation5 + $0x1394] sm:$0xf0]  ;;  %v8898_v17 = vor.u32 %v10698_v39, %v8897_v34  ;;  %v9154_v59 = vor.u32 %v10762_v47, %v9153_v14 }
 0x228   :  { %5687 = vmatpush.bf16.msra.mxu1 %v9074_v57  ;;  %5656 = vmatmul.bf16.vlgmr.msrb.gmra.mxu2 %v11348_v28  ;;  %v5436_v57 = vpop.f32.mrf.mxu1  ;;  %v8881_v53 = vld [vmem:[#allocation5 + $0x1068] sm:$0xf]  ;;  %v10694_v60 = vld [vmem:[#allocation5 + $0x1074] sm:$0xf0]  ;;  %v9282_v62 = vor.u32 %v10794_v51, %v9281_v50 }
 0x229   :  { %5700 = vmatpush.bf16.msra.mxu2 %v9202_v58  ;;  %5669 = vmatmul.bf16.vlgmr.msrb.gmra.mxu3 %v11352_v35  ;;  %v9026_v58 = vor.u32 %v10730_v43, %v9025_v40  ;;  %v5437_v0 = vadd.f32 %v5436_v57, %v5424_v52  ;;  %v10726_v2 = vld [vmem:[#allocation5 + $0x1174] sm:$0xf0]  ;;  %v9137_v3 = vld [vmem:[#allocation5 + $0x1268] sm:$0xf] }
 0x22a   :  { %5713 = vmatpush.bf16.msra.mxu3 %v9330_v61  ;;  %v9009_v61 = vld [vmem:[#allocation5 + $0x1168] sm:$0xf]  ;;  %v10758_v4 = vld [vmem:[#allocation5 + $0x1274] sm:$0xf0] }
 0x22b   :  { %5675 = vmatpush.bf16.msra.mxu0 %v8930_v36  ;;  %v9265_v36 = vld [vmem:[#allocation5 + $0x1368] sm:$0xf]  ;;  %v9010_v56 = vor.u32 %v10726_v2, %v9009_v61  ;;  %v9138_v8 = vor.u32 %v10758_v4, %v9137_v3  ;;  %v10690_v10 = vld [vmem:[#allocation5 + $0x1054] sm:$0xf0]  ;;  %v5449_v1 = vpop.f32.mrf.mxu2 }
 0x22c   :  { %5688 = vmatpush.bf16.msra.mxu1 %v9058_v5  ;;  %v10790_v5 = vld [vmem:[#allocation5 + $0x1374] sm:$0xf0]  ;;  %v8865_v9 = vld [vmem:[#allocation5 + $0x1048] sm:$0xf] }
 0x22d   :  { %5701 = vmatpush.bf16.msra.mxu2 %v9186_v55  ;;  %v8882_v55 = vor.u32 %v10694_v60, %v8881_v53  ;;  %v9266_v15 = vor.u32 %v10790_v5, %v9265_v36  ;;  %v10722_v21 = vld [vmem:[#allocation5 + $0x1154] sm:$0xf0]  ;;  %v9121_v63 = vld [vmem:[#allocation5 + $0x1248] sm:$0xf]  ;;  %v5425_v39 = vpop.f32.mrf.mxu0  ;;  %v8866_v40 = vor.u32 %v10690_v10, %v8865_v9 }
 0x22e   :  { %5714 = vmatpush.bf16.msra.mxu3 %v9314_v13  ;;  %v8993_v13 = vld [vmem:[#allocation5 + $0x1148] sm:$0xf]  ;;  %v10754_v24 = vld [vmem:[#allocation5 + $0x1254] sm:$0xf0] }
 0x22f   :  { %5676 = vmatpush.bf16.msra.mxu0 %v8914_v26  ;;  %v5450_v26 = vadd.f32 %v5449_v1, %v5437_v0  ;;  %v10786_v34 = vld [vmem:[#allocation5 + $0x1354] sm:$0xf0]  ;;  %v8994_v14 = vor.u32 %v10722_v21, %v8993_v13  ;;  %v9122_v47 = vor.u32 %v10754_v24, %v9121_v63  ;;  %v8849_v48 = vld [vmem:[#allocation5 + $0x1028] sm:$0xf] }
 0x230   :  { %5689 = vmatpush.bf16.msra.mxu1 %v9042_v27  ;;  %v5462_v27 = vpop.f32.mrf.mxu3  ;;  %v10686_v50 = vld [vmem:[#allocation5 + $0x1034] sm:$0xf0]  ;;  %v8977_v51 = vld [vmem:[#allocation5 + $0x1128] sm:$0xf] }
 0x231   :  { %5702 = vmatpush.bf16.msra.mxu2 %v9170_v32  ;;  %v9249_v32 = vld [vmem:[#allocation5 + $0x1348] sm:$0xf]  ;;  %v11454_v43 = vadd.f32 %v5462_v27, %v5450_v26  ;;  %v10782_v53 = vld [vmem:[#allocation5 + $0x1334] sm:$0xf0]  ;;  %v8850_v60 = vor.u32 %v10686_v50, %v8849_v48 }
 0x232   :  { %5715 = vmatpush.bf16.msra.mxu3 %v9298_v6  ;;  %v5438_v6 = vpop.f32.mrf.mxu1  ;;  %v9250_v52 = vor.u32 %v10786_v34, %v9249_v32  ;;  %v9105_v57 = vld [vmem:[#allocation5 + $0x1228] sm:$0xf]  ;;  %v10714_v4 = vld [vmem:[#allocation5 + $0x1114] sm:$0xf0] }
 0x233   :  { %5677 = vmatpush.bf16.msra.mxu0 %v8898_v17  ;;  %v10718_v17 = vld [vmem:[#allocation5 + $0x1134] sm:$0xf0]  ;;  %v8833_v61 = vld [vmem:[#allocation5 + $0x1008] sm:$0xf]  ;;  %v5451_v9 = vpop.f32.mrf.mxu2 }
 0x234   :  { %5690 = vmatpush.bf16.msra.mxu1 %v9026_v58  ;;  %v10750_v58 = vld [vmem:[#allocation5 + $0x1234] sm:$0xf0]  ;;  %v8978_v0 = vor.u32 %v10718_v17, %v8977_v51  ;;  %v8961_v3 = vld [vmem:[#allocation5 + $0x1108] sm:$0xf] }
 0x235   :  { %5703 = vmatpush.bf16.msra.mxu2 %v9154_v59  ;;  %v9233_v59 = vld [vmem:[#allocation5 + $0x1328] sm:$0xf]  ;;  %v9106_v2 = vor.u32 %v10750_v58, %v9105_v57  ;;  %v10838_v13 = vld [vmem:[#allocation5 + $0x14f4] sm:$0xf0]  ;;  %v8962_v27 = vor.u32 %v10714_v4, %v8961_v3 }
 0x236   :  { %5716 = vmatpush.bf16.msra.mxu3 %v9282_v62  ;;  %v10682_v62 = vld [vmem:[#allocation5 + $0x1014] sm:$0xf0]  ;;  %v9089_v36 = vld [vmem:[#allocation5 + $0x1208] sm:$0xf]  ;;  %v9234_v5 = vor.u32 %v10782_v53, %v9233_v59 }
 0x237   :  { %5678 = vmatpush.bf16.msra.mxu0 %v8882_v55  ;;  %v10746_v55 = vld [vmem:[#allocation5 + $0x1214] sm:$0xf0]  ;;  %v9457_v10 = vld [vmem:[#allocation5 + $0x14e8] sm:$0xf]  ;;  %v8834_v21 = vor.u32 %v10682_v62, %v8833_v61 }
 0x238   :  { %5691 = vmatpush.bf16.msra.mxu1 %v9010_v56  ;;  %v9217_v56 = vld [vmem:[#allocation5 + $0x1308] sm:$0xf]  ;;  %v5464_v1 = vpop.f32.mrf.mxu3  ;;  %v10870_v63 = vld [vmem:[#allocation5 + $0x15f4] sm:$0xf0]  ;;  %v9090_v32 = vor.u32 %v10746_v55, %v9089_v36  ;;  %v9458_v6 = vor.u32 %v10838_v13, %v9457_v10 }
 0x239   :  { %5704 = vmatpush.bf16.msra.mxu2 %v9138_v8  ;;  %v10778_v8 = vld [vmem:[#allocation5 + $0x1314] sm:$0xf0]  ;;  %v9713_v24 = vld [vmem:[#allocation5 + $0x16e8] sm:$0xf] }
 0x23a   :  { %5717 = vmatpush.bf16.msra.mxu3 %v9266_v15  ;;  %v9585_v15 = vld [vmem:[#allocation5 + $0x15e8] sm:$0xf]  ;;  %v10902_v26 = vld [vmem:[#allocation5 + $0x16f4] sm:$0xf0] }
 0x23b   :  { %5679 = vmatpush.bf16.msra.mxu0 %v8866_v40  ;;  %v9841_v34 = vld [vmem:[#allocation5 + $0x17e8] sm:$0xf]  ;;  %v10934_v39 = vld [vmem:[#allocation5 + $0x17f4] sm:$0xf0]  ;;  %v9218_v40 = vor.u32 %v10778_v8, %v9217_v56 }
 0x23c   :  { %5692 = vmatpush.bf16.msra.mxu1 %v8994_v14  ;;  %v9586_v14 = vor.u32 %v10870_v63, %v9585_v15  ;;  %v9441_v48 = vld [vmem:[#allocation5 + $0x14c8] sm:$0xf]  ;;  %v10834_v50 = vld [vmem:[#allocation5 + $0x14d4] sm:$0xf0]  ;;  %v11031_v63 = vld [vmem:[#allocation7] sm:$0xf] }
 0x23d   :  { %5705 = vmatpush.bf16.msra.mxu2 %v9122_v47  ;;  %v9714_v47 = vor.u32 %v10902_v26, %v9713_v24  ;;  %v9569_v51 = vld [vmem:[#allocation5 + $0x15c8] sm:$0xf]  ;;  %v10866_v17 = vld [vmem:[#allocation5 + $0x15d4] sm:$0xf0]  ;;  %v912_v24 = vperm.slane %v11031_v63, 2 }
 0x23e   :  { %5718 = vmatpush.bf16.msra.mxu3 %v9250_v52  ;;  %v9842_v52 = vor.u32 %v10934_v39, %v9841_v34  ;;  %v9697_v57 = vld [vmem:[#allocation5 + $0x16c8] sm:$0xf]  ;;  %v10898_v58 = vld [vmem:[#allocation5 + $0x16d4] sm:$0xf0]  ;;  %v9570_v61 = vor.u32 %v10866_v17, %v9569_v51 }
 0x23f   :  { %5680 = vmatpush.bf16.msra.mxu0 %v8850_v60  ;;  %v9825_v59 = vld [vmem:[#allocation5 + $0x17c8] sm:$0xf]  ;;  %v10930_v53 = vld [vmem:[#allocation5 + $0x17d4] sm:$0xf0]  ;;  %v9442_v60 = vor.u32 %v10834_v50, %v9441_v48  ;;  %v9698_v62 = vor.u32 %v10898_v58, %v9697_v57 }
 0x240   :  { %5693 = vmatpush.bf16.msra.mxu1 %v8978_v0  ;;  %v9425_v0 = vld [vmem:[#allocation5 + $0x14a8] sm:$0xf]  ;;  %v9826_v4 = vor.u32 %v10930_v53, %v9825_v59  ;;  %v10862_v36 = vld [vmem:[#allocation5 + $0x15b4] sm:$0xf0] }
 0x241   :  { %5706 = vmatpush.bf16.msra.mxu2 %v9106_v2  ;;  %v10830_v2 = vld [vmem:[#allocation5 + $0x14b4] sm:$0xf0]  ;;  %v9553_v3 = vld [vmem:[#allocation5 + $0x15a8] sm:$0xf] }
 0x242   :  { %5719 = vmatpush.bf16.msra.mxu3 %v9234_v5  ;;  %v9681_v5 = vld [vmem:[#allocation5 + $0x16a8] sm:$0xf]  ;;  %v10894_v55 = vld [vmem:[#allocation5 + $0x16b4] sm:$0xf0]  ;;  %v9426_v9 = vor.u32 %v10830_v2, %v9425_v0  ;;  %v9554_v13 = vor.u32 %v10862_v36, %v9553_v3 }
 0x243   :  { %5681 = vmatpush.bf16.msra.mxu0 %v8834_v21  ;;  %v9809_v56 = vld [vmem:[#allocation5 + $0x17a8] sm:$0xf]  ;;  %v10926_v8 = vld [vmem:[#allocation5 + $0x17b4] sm:$0xf0]  ;;  %v9682_v15 = vor.u32 %v10894_v55, %v9681_v5 }
 0x244   :  { %5694 = vmatpush.bf16.msra.mxu1 %v8962_v27  ;;  %v9409_v10 = vld [vmem:[#allocation5 + $0x1488] sm:$0xf]  ;;  %v10826_v1 = vld [vmem:[#allocation5 + $0x1494] sm:$0xf0]  ;;  %v9810_v26 = vor.u32 %v10926_v8, %v9809_v56  ;;  %v5488_v57 = vpop.f32.mrf.mxu1 }
 0x245   :  { %5707 = vmatpush.bf16.msra.mxu2 %v9090_v32  ;;  %v9537_v21 = vld [vmem:[#allocation5 + $0x1588] sm:$0xf]  ;;  %v10858_v27 = vld [vmem:[#allocation5 + $0x1594] sm:$0xf0] }
 0x246   :  { %5720 = vmatpush.bf16.msra.mxu3 %v9218_v40  ;;  %5682 = vmatmul.bf16.vlgmr.msra.gmra.mxu0 %v11358_v37  ;;  %v9665_v32 = vld [vmem:[#allocation5 + $0x1688] sm:$0xf]  ;;  %v10890_v34 = vld [vmem:[#allocation5 + $0x1694] sm:$0xf0] }
 0x247   :  { %5726 = vmatpush.bf16.msrb.mxu0 %v9458_v6  ;;  %5695 = vmatmul.bf16.vlgmr.msra.gmra.mxu1 %v11362_v46  ;;  %v9793_v39 = vld [vmem:[#allocation5 + $0x1788] sm:$0xf]  ;;  %v10922_v40 = vld [vmem:[#allocation5 + $0x1794] sm:$0xf0]  ;;  %v9410_v6 = vor.u32 %v10826_v1, %v9409_v10  ;;  %v9666_v48 = vor.u32 %v10890_v34, %v9665_v32 }
 0x248   :  { %5739 = vmatpush.bf16.msrb.mxu1 %v9586_v14  ;;  %5708 = vmatmul.bf16.vlgmr.msra.gmra.mxu2 %v11360_v45  ;;  %v5475_v14 = vpop.f32.mrf.mxu0  ;;  %v9393_v50 = vld [vmem:[#allocation5 + $0x1468] sm:$0xf]  ;;  %v10822_v51 = vld [vmem:[#allocation5 + $0x1474] sm:$0xf0]  ;;  %v9794_v58 = vor.u32 %v10922_v40, %v9793_v39 }
 0x249   :  { %5752 = vmatpush.bf16.msrb.mxu2 %v9714_v47  ;;  %5721 = vmatmul.bf16.vlgmr.msra.gmra.mxu3 %v11364_v49  ;;  %v9538_v47 = vor.u32 %v10858_v27, %v9537_v21  ;;  %v5476_v17 = vadd.f32 %v5475_v14, %v912_v24  ;;  %v10854_v59 = vld [vmem:[#allocation5 + $0x1574] sm:$0xf0]  ;;  %v9649_v53 = vld [vmem:[#allocation5 + $0x1668] sm:$0xf]  ;;  %v9394_v2 = vor.u32 %v10822_v51, %v9393_v50 }
 0x24a   :  { %5765 = vmatpush.bf16.msrb.mxu3 %v9842_v52  ;;  %v9521_v52 = vld [vmem:[#allocation5 + $0x1568] sm:$0xf]  ;;  %v10818_v5 = vld [vmem:[#allocation5 + $0x1454] sm:$0xf0] }
 0x24b   :  { %5727 = vmatpush.bf16.msrb.mxu0 %v9442_v60  ;;  %v10886_v60 = vld [vmem:[#allocation5 + $0x1674] sm:$0xf0]  ;;  %v5489_v0 = vadd.f32 %v5488_v57, %v5476_v17  ;;  %v9522_v3 = vor.u32 %v10854_v59, %v9521_v52  ;;  %v9377_v36 = vld [vmem:[#allocation5 + $0x1448] sm:$0xf]  ;;  %v5501_v56 = vpop.f32.mrf.mxu2 }
 0x24c   :  { %5740 = vmatpush.bf16.msrb.mxu1 %v9570_v61  ;;  %v9777_v61 = vld [vmem:[#allocation5 + $0x1768] sm:$0xf]  ;;  %v5514_v1 = vpop.f32.mrf.mxu3  ;;  %v10914_v63 = vld [vmem:[#allocation5 + $0x1754] sm:$0xf0]  ;;  %v9378_v24 = vor.u32 %v10818_v5, %v9377_v36  ;;  %v5490_v14 = vpop.f32.mrf.mxu1 }
 0x24d   :  { %5753 = vmatpush.bf16.msrb.mxu2 %v9698_v62  ;;  %v10918_v62 = vld [vmem:[#allocation5 + $0x1774] sm:$0xf0]  ;;  %v9505_v55 = vld [vmem:[#allocation5 + $0x1548] sm:$0xf]  ;;  %v6883_v14 = vld [vmem:[#allocation5 + $0xd8] sm:$0xf0] }
 0x24e   :  { %5766 = vmatpush.bf16.msrb.mxu3 %v9826_v4  ;;  %v9650_v4 = vor.u32 %v10886_v60, %v9649_v53  ;;  %v9778_v8 = vor.u32 %v10918_v62, %v9777_v61  ;;  %v9633_v10 = vld [vmem:[#allocation5 + $0x1648] sm:$0xf]  ;;  %v10814_v40 = vld [vmem:[#allocation5 + $0x1434] sm:$0xf0] }
 0x24f   :  { %5728 = vmatpush.bf16.msrb.mxu0 %v9426_v9  ;;  %v10850_v9 = vld [vmem:[#allocation5 + $0x1554] sm:$0xf0]  ;;  %v9761_v21 = vld [vmem:[#allocation5 + $0x1748] sm:$0xf] }
 0x250   :  { %5741 = vmatpush.bf16.msrb.mxu1 %v9554_v13  ;;  %v10882_v13 = vld [vmem:[#allocation5 + $0x1654] sm:$0xf0]  ;;  %v5477_v27 = vpop.f32.mrf.mxu0  ;;  %v9506_v32 = vor.u32 %v10850_v9, %v9505_v55  ;;  %v9361_v39 = vld [vmem:[#allocation5 + $0x1428] sm:$0xf]  ;;  %v10228_v9 = vld [vmem:[#allocation5 + $0x1ec] sm:$0xf] }
 0x251   :  { %5754 = vmatpush.bf16.msrb.mxu2 %v9682_v15  ;;  %v5502_v15 = vadd.f32 %v5501_v56, %v5489_v0  ;;  %v9634_v34 = vor.u32 %v10882_v13, %v9633_v10  ;;  %v9617_v50 = vld [vmem:[#allocation5 + $0x1628] sm:$0xf]  ;;  %v10878_v51 = vld [vmem:[#allocation5 + $0x1634] sm:$0xf0]  ;;  %v9362_v57 = vor.u32 %v10814_v40, %v9361_v39  ;;  %v10196_v56 = vld [vmem:[#allocation5 + $0xec] sm:$0xf] }
 0x252   :  { %5767 = vmatpush.bf16.msrb.mxu3 %v9810_v26  ;;  %v9745_v52 = vld [vmem:[#allocation5 + $0x1728] sm:$0xf]  ;;  %v10910_v17 = vld [vmem:[#allocation5 + $0x1734] sm:$0xf0]  ;;  %v9618_v60 = vor.u32 %v10878_v51, %v9617_v50  ;;  %v7027_v13 = vld [vmem:[#allocation5 + $0x1f8] sm:$0xf0] }
 0x253   :  { %5729 = vmatpush.bf16.msrb.mxu0 %v9410_v6  ;;  %v11460_v26 = vadd.f32 %v5514_v1, %v5502_v15  ;;  %v9489_v6 = vld [vmem:[#allocation5 + $0x1528] sm:$0xf]  ;;  %v10810_v59 = vld [vmem:[#allocation5 + $0x1414] sm:$0xf0]  ;;  %v10260_v15 = vld [vmem:[#allocation5 + $0x2ec] sm:$0xf]  ;;  %v7030_v39 = vor.u32 %v10228_v9, %v7027_v13 }
 0x254   :  { %5742 = vmatpush.bf16.msrb.mxu1 %v9538_v47  ;;  %v9762_v47 = vor.u32 %v10914_v63, %v9761_v21  ;;  %v9473_v61 = vld [vmem:[#allocation5 + $0x1508] sm:$0xf]  ;;  %v10842_v62 = vld [vmem:[#allocation5 + $0x1514] sm:$0xf0]  ;;  %v5516_v55 = vpop.f32.mrf.mxu3  ;;  %v7155_v1 = vld [vmem:[#allocation5 + $0x2f8] sm:$0xf0] }
 0x255   :  { %5755 = vmatpush.bf16.msrb.mxu2 %v9666_v48  ;;  %v10846_v48 = vld [vmem:[#allocation5 + $0x1534] sm:$0xf0]  ;;  %v9601_v0 = vld [vmem:[#allocation5 + $0x1608] sm:$0xf]  ;;  %v9474_v21 = vor.u32 %v10842_v62, %v9473_v61  ;;  %v7283_v27 = vld [vmem:[#allocation5 + $0x3f8] sm:$0xf0]  ;;  %v7158_v40 = vor.u32 %v10260_v15, %v7155_v1 }
 0x256   :  { %5768 = vmatpush.bf16.msrb.mxu3 %v9794_v58  ;;  %v9345_v58 = vld [vmem:[#allocation5 + $0x1408] sm:$0xf]  ;;  %v9490_v53 = vor.u32 %v10846_v48, %v9489_v6  ;;  %v10906_v5 = vld [vmem:[#allocation5 + $0x1714] sm:$0xf0]  ;;  %v10192_v6 = vld [vmem:[#allocation5 + $0xcc] sm:$0xf] }
 0x257   :  { %5730 = vmatpush.bf16.msrb.mxu0 %v9394_v2  ;;  %v5503_v2 = vpop.f32.mrf.mxu2  ;;  %v9729_v36 = vld [vmem:[#allocation5 + $0x1708] sm:$0xf]  ;;  %v9346_v10 = vor.u32 %v10810_v59, %v9345_v58  ;;  %v7011_v50 = vld [vmem:[#allocation5 + $0x1d8] sm:$0xf0]  ;;  %v10256_v51 = vld [vmem:[#allocation5 + $0x2cc] sm:$0xf]  ;;  %v6886_v58 = vor.u32 %v10192_v6, %v6883_v14 }
 0x258   :  { %5743 = vmatpush.bf16.msrb.mxu1 %v9522_v3  ;;  %v9746_v3 = vor.u32 %v10910_v17, %v9745_v52  ;;  %v7139_v52 = vld [vmem:[#allocation5 + $0x2d8] sm:$0xf0]  ;;  %v10288_v17 = vld [vmem:[#allocation5 + $0x3cc] sm:$0xf] }
 0x259   :  { %5756 = vmatpush.bf16.msrb.mxu2 %v9650_v4  ;;  %v10874_v4 = vld [vmem:[#allocation5 + $0x1614] sm:$0xf0]  ;;  %v6867_v61 = vld [vmem:[#allocation5 + $0xb8] sm:$0xf0]  ;;  %v10220_v62 = vld [vmem:[#allocation5 + $0x1ac] sm:$0xf] }
 0x25a   :  { %5769 = vmatpush.bf16.msrb.mxu3 %v9778_v8  ;;  %v6899_v8 = vld [vmem:[#allocation5 + $0xf8] sm:$0xf0]  ;;  %v9602_v63 = vor.u32 %v10874_v4, %v9601_v0  ;;  %v10184_v9 = vld [vmem:[#allocation5 + $0x8c] sm:$0xf] }
 0x25b   :  { %5731 = vmatpush.bf16.msrb.mxu0 %v9378_v24  ;;  %v10292_v24 = vld [vmem:[#allocation5 + $0x3ec] sm:$0xf]  ;;  %v6995_v2 = vld [vmem:[#allocation5 + $0x1b8] sm:$0xf0] }
 0x25c   :  { %5744 = vmatpush.bf16.msrb.mxu1 %v9506_v32  ;;  %v9730_v32 = vor.u32 %v10906_v5, %v9729_v36  ;;  %v7286_v48 = vor.u32 %v10292_v24, %v7283_v27  ;;  %v7123_v4 = vld [vmem:[#allocation5 + $0x2b8] sm:$0xf0]  ;;  %v10284_v36 = vld [vmem:[#allocation5 + $0x3ac] sm:$0xf] }
 0x25d   :  { %5757 = vmatpush.bf16.msrb.mxu2 %v9634_v34  ;;  %v6902_v34 = vor.u32 %v10196_v56, %v6899_v8  ;;  %v7251_v5 = vld [vmem:[#allocation5 + $0x3b8] sm:$0xf0]  ;;  %v6998_v56 = vor.u32 %v10220_v62, %v6995_v2  ;;  %v10216_v13 = vld [vmem:[#allocation5 + $0x18c] sm:$0xf] }
 0x25e   :  { %5770 = vmatpush.bf16.msrb.mxu3 %v9762_v47  ;;  %v10224_v47 = vld [vmem:[#allocation5 + $0x1cc] sm:$0xf]  ;;  %v7254_v15 = vor.u32 %v10284_v36, %v7251_v5  ;;  %v6979_v1 = vld [vmem:[#allocation5 + $0x198] sm:$0xf0] }
 0x25f   :  { %5732 = vmatpush.bf16.msrb.mxu0 %v9362_v57  ;;  %v7267_v57 = vld [vmem:[#allocation5 + $0x3d8] sm:$0xf0]  ;;  %v7014_v59 = vor.u32 %v10224_v47, %v7011_v50  ;;  %v10280_v24 = vld [vmem:[#allocation5 + $0x38c] sm:$0xf] }
 0x260   :  { %5745 = vmatpush.bf16.msrb.mxu1 %v9490_v53  ;;  %v7142_v53 = vor.u32 %v10256_v51, %v7139_v52  ;;  %v7270_v0 = vor.u32 %v10288_v17, %v7267_v57  ;;  %v7235_v27 = vld [vmem:[#allocation5 + $0x398] sm:$0xf0]  ;;  %v10180_v6 = vld [vmem:[#allocation5 + $0x6c] sm:$0xf] }
 0x261   :  { %5758 = vmatpush.bf16.msrb.mxu2 %v9618_v60  ;;  %v10188_v60 = vld [vmem:[#allocation5 + $0xac] sm:$0xf]  ;;  %v6835_v14 = vld [vmem:[#allocation5 + $0x78] sm:$0xf0]  ;;  %v7238_v51 = vor.u32 %v10280_v24, %v7235_v27 }
 0x262   :  { %5771 = vmatpush.bf16.msrb.mxu3 %v9746_v3  ;;  %v10252_v3 = vld [vmem:[#allocation5 + $0x2ac] sm:$0xf]  ;;  %v6870_v55 = vor.u32 %v10188_v60, %v6867_v61  ;;  %v6963_v52 = vld [vmem:[#allocation5 + $0x178] sm:$0xf0]  ;;  %v6838_v60 = vor.u32 %v10180_v6, %v6835_v14 }
 0x263   :  { %5733 = vmatpush.bf16.msrb.mxu0 %v9346_v10  ;;  %v7126_v8 = vor.u32 %v10252_v3, %v7123_v4  ;;  %v6851_v10 = vld [vmem:[#allocation5 + $0x98] sm:$0xf0]  ;;  %v10212_v47 = vld [vmem:[#allocation5 + $0x16c] sm:$0xf] }
 0x264   :  { %5746 = vmatpush.bf16.msrb.mxu1 %v9474_v21  ;;  %v10248_v21 = vld [vmem:[#allocation5 + $0x28c] sm:$0xf]  ;;  %v5540_v50 = vpop.f32.mrf.mxu1  ;;  %v7091_v57 = vld [vmem:[#allocation5 + $0x278] sm:$0xf0]  ;;  %v6966_v61 = vor.u32 %v10212_v47, %v6963_v52 }
 0x265   :  { %5759 = vmatpush.bf16.msrb.mxu2 %v9602_v63  ;;  %v7107_v63 = vld [vmem:[#allocation5 + $0x298] sm:$0xf0]  ;;  %v10244_v17 = vld [vmem:[#allocation5 + $0x26c] sm:$0xf] }
 0x266   :  { %5772 = vmatpush.bf16.msrb.mxu3 %v9730_v32  ;;  %5734 = vmatmul.bf16.vlgmr.msrb.gmra.mxu0 %v11372_v7  ;;  %v6854_v32 = vor.u32 %v10184_v9, %v6851_v10  ;;  %v7094_v62 = vor.u32 %v10244_v17, %v7091_v57  ;;  %v6819_v2 = vld [vmem:[#allocation5 + $0x58] sm:$0xf0]  ;;  %v10208_v3 = vld [vmem:[#allocation5 + $0x14c] sm:$0xf] }
 0x267   :  { %5778 = vmatpush.bf16.msra.mxu0 %v6902_v34  ;;  %5747 = vmatmul.bf16.vlgmr.msrb.gmra.mxu1 %v11376_v12  ;;  %v5527_v34 = vpop.f32.mrf.mxu0  ;;  %v6947_v36 = vld [vmem:[#allocation5 + $0x158] sm:$0xf0]  ;;  %v10240_v5 = vld [vmem:[#allocation5 + $0x24c] sm:$0xf] }
 0x268   :  { %5791 = vmatpush.bf16.msra.mxu1 %v7030_v39  ;;  %5760 = vmatmul.bf16.vlgmr.msrb.gmra.mxu2 %v11374_v11  ;;  %v6982_v39 = vor.u32 %v10216_v13, %v6979_v1  ;;  %v10272_v9 = vld [vmem:[#allocation5 + $0x34c] sm:$0xf]  ;;  %v7203_v10 = vld [vmem:[#allocation5 + $0x358] sm:$0xf0] }
 0x269   :  { %5804 = vmatpush.bf16.msra.mxu2 %v7158_v40  ;;  %5773 = vmatmul.bf16.vlgmr.msrb.gmra.mxu3 %v11378_v16  ;;  %v7110_v40 = vor.u32 %v10248_v21, %v7107_v63  ;;  %v6950_v21 = vor.u32 %v10208_v3, %v6947_v36  ;;  %v10172_v24 = vld [vmem:[#allocation5 + $0x2c] sm:$0xf]  ;;  %v6803_v27 = vld [vmem:[#allocation5 + $0x38] sm:$0xf0] }
 0x26a   :  { %5817 = vmatpush.bf16.msra.mxu3 %v7286_v48  ;;  %v5528_v48 = vadd.f32 %v5527_v34, %v11460_v26  ;;  %v10236_v6 = vld [vmem:[#allocation5 + $0x22c] sm:$0xf]  ;;  %v7059_v14 = vld [vmem:[#allocation5 + $0x238] sm:$0xf0] }
 0x26b   :  { %5779 = vmatpush.bf16.msra.mxu0 %v6886_v58  ;;  %v10276_v58 = vld [vmem:[#allocation5 + $0x36c] sm:$0xf]  ;;  %v5553_v4 = vpop.f32.mrf.mxu2  ;;  %v6787_v52 = vld [vmem:[#allocation5 + $0x18] sm:$0xf0]  ;;  %v7062_v57 = vor.u32 %v10236_v6, %v7059_v14 }
 0x26c   :  { %5792 = vmatpush.bf16.msra.mxu1 %v7014_v59  ;;  %v7219_v59 = vld [vmem:[#allocation5 + $0x378] sm:$0xf0]  ;;  %v5542_v34 = vpop.f32.mrf.mxu1  ;;  %v10268_v47 = vld [vmem:[#allocation5 + $0x32c] sm:$0xf] }
 0x26d   :  { %5805 = vmatpush.bf16.msra.mxu2 %v7142_v53  ;;  %v5541_v53 = vadd.f32 %v5540_v50, %v5528_v48  ;;  %v7222_v26 = vor.u32 %v10276_v58, %v7219_v59  ;;  %v7187_v48 = vld [vmem:[#allocation5 + $0x338] sm:$0xf0]  ;;  %v6806_v50 = vor.u32 %v10172_v24, %v6803_v27  ;;  %v10200_v58 = vld [vmem:[#allocation5 + $0x10c] sm:$0xf] }
 0x26e   :  { %5818 = vmatpush.bf16.msra.mxu3 %v7270_v0  ;;  %v10176_v0 = vld [vmem:[#allocation5 + $0x4c] sm:$0xf]  ;;  %v6915_v59 = vld [vmem:[#allocation5 + $0x118] sm:$0xf0] }
 0x26f   :  { %5780 = vmatpush.bf16.msra.mxu0 %v6870_v55  ;;  %v7075_v55 = vld [vmem:[#allocation5 + $0x258] sm:$0xf0]  ;;  %v6822_v13 = vor.u32 %v10176_v0, %v6819_v2  ;;  %v5529_v1 = vpop.f32.mrf.mxu0  ;;  %v10264_v0 = vld [vmem:[#allocation5 + $0x30c] sm:$0xf] }
 0x270   :  { %5793 = vmatpush.bf16.msra.mxu1 %v6998_v56  ;;  %v5554_v56 = vadd.f32 %v5553_v4, %v5541_v53  ;;  %v7078_v63 = vor.u32 %v10240_v5, %v7075_v55  ;;  %v10232_v53 = vld [vmem:[#allocation5 + $0x20c] sm:$0xf]  ;;  %v7171_v2 = vld [vmem:[#allocation5 + $0x318] sm:$0xf0] }
 0x271   :  { %5806 = vmatpush.bf16.msra.mxu2 %v7126_v8  ;;  %v5566_v8 = vpop.f32.mrf.mxu3  ;;  %v10324_v4 = vld [vmem:[#allocation5 + $0x4ec] sm:$0xf]  ;;  %v7539_v55 = vld [vmem:[#allocation5 + $0x5f8] sm:$0xf0] }
 0x272   :  { %5819 = vmatpush.bf16.msra.mxu3 %v7254_v15  ;;  %v11467_v15 = vadd.f32 %v5566_v8, %v5554_v56  ;;  %v10356_v36 = vld [vmem:[#allocation5 + $0x5ec] sm:$0xf]  ;;  %v7667_v8 = vld [vmem:[#allocation5 + $0x6f8] sm:$0xf0] }
 0x273   :  { %5781 = vmatpush.bf16.msra.mxu0 %v6854_v32  ;;  %v10204_v32 = vld [vmem:[#allocation5 + $0x12c] sm:$0xf]  ;;  %v7795_v1 = vld [vmem:[#allocation5 + $0x7f8] sm:$0xf0]  ;;  %v7542_v24 = vor.u32 %v10356_v36, %v7539_v55 }
 0x274   :  { %5794 = vmatpush.bf16.msra.mxu1 %v6982_v39  ;;  %v7206_v39 = vor.u32 %v10272_v9, %v7203_v10  ;;  %v10388_v56 = vld [vmem:[#allocation5 + $0x6ec] sm:$0xf]  ;;  %v6918_v9 = vor.u32 %v10200_v58, %v6915_v59  ;;  %v7395_v34 = vld [vmem:[#allocation5 + $0x4d8] sm:$0xf0] }
 0x275   :  { %5807 = vmatpush.bf16.msra.mxu2 %v7110_v40  ;;  %v6931_v40 = vld [vmem:[#allocation5 + $0x138] sm:$0xf0]  ;;  %v7670_v27 = vor.u32 %v10388_v56, %v7667_v8  ;;  %v10384_v14 = vld [vmem:[#allocation5 + $0x6cc] sm:$0xf] }
 0x276   :  { %5820 = vmatpush.bf16.msra.mxu3 %v7238_v51  ;;  %v10168_v51 = vld [vmem:[#allocation5 + $0xc] sm:$0xf]  ;;  %v6934_v17 = vor.u32 %v10204_v32, %v6931_v40  ;;  %v7523_v6 = vld [vmem:[#allocation5 + $0x5d8] sm:$0xf0] }
 0x277   :  { %5782 = vmatpush.bf16.msra.mxu0 %v6838_v60  ;;  %v5555_v60 = vpop.f32.mrf.mxu2  ;;  %v6790_v5 = vor.u32 %v10168_v51, %v6787_v52  ;;  %v10320_v32 = vld [vmem:[#allocation5 + $0x4cc] sm:$0xf]  ;;  %v7379_v58 = vld [vmem:[#allocation5 + $0x4b8] sm:$0xf0] }
 0x278   :  { %5795 = vmatpush.bf16.msra.mxu1 %v6966_v61  ;;  %v7190_v61 = vor.u32 %v10268_v47, %v7187_v48  ;;  %v7651_v47 = vld [vmem:[#allocation5 + $0x6d8] sm:$0xf0]  ;;  %v10416_v48 = vld [vmem:[#allocation5 + $0x7cc] sm:$0xf]  ;;  %v7398_v51 = vor.u32 %v10320_v32, %v7395_v34 }
 0x279   :  { %5808 = vmatpush.bf16.msra.mxu2 %v7094_v62  ;;  %v7043_v62 = vld [vmem:[#allocation5 + $0x218] sm:$0xf0]  ;;  %v5568_v3 = vpop.f32.mrf.mxu3  ;;  %v10348_v59 = vld [vmem:[#allocation5 + $0x5ac] sm:$0xf] }
 0x27a   :  { %5821 = vmatpush.bf16.msra.mxu3 %v7222_v26  ;;  %v7411_v26 = vld [vmem:[#allocation5 + $0x4f8] sm:$0xf0]  ;;  %v7046_v10 = vor.u32 %v10232_v53, %v7043_v62  ;;  %v10312_v36 = vld [vmem:[#allocation5 + $0x48c] sm:$0xf] }
 0x27b   :  { %5783 = vmatpush.bf16.msra.mxu0 %v6822_v13  ;;  %v10420_v13 = vld [vmem:[#allocation5 + $0x7ec] sm:$0xf]  ;;  %v7507_v60 = vld [vmem:[#allocation5 + $0x5b8] sm:$0xf0] }
 0x27c   :  { %5796 = vmatpush.bf16.msra.mxu1 %v6950_v21  ;;  %v7174_v21 = vor.u32 %v10264_v0, %v7171_v2  ;;  %v7798_v40 = vor.u32 %v10420_v13, %v7795_v1  ;;  %v7635_v62 = vld [vmem:[#allocation5 + $0x6b8] sm:$0xf0]  ;;  %v10412_v0 = vld [vmem:[#allocation5 + $0x7ac] sm:$0xf] }
 0x27d   :  { %5809 = vmatpush.bf16.msra.mxu2 %v7078_v63  ;;  %v7414_v63 = vor.u32 %v10324_v4, %v7411_v26  ;;  %v7763_v2 = vld [vmem:[#allocation5 + $0x7b8] sm:$0xf0]  ;;  %v7510_v4 = vor.u32 %v10348_v59, %v7507_v60  ;;  %v10344_v55 = vld [vmem:[#allocation5 + $0x58c] sm:$0xf] }
 0x27e   :  { %5822 = vmatpush.bf16.msra.mxu3 %v7206_v39  ;;  %v10352_v39 = vld [vmem:[#allocation5 + $0x5cc] sm:$0xf]  ;;  %v7766_v56 = vor.u32 %v10412_v0, %v7763_v2  ;;  %v7747_v13 = vld [vmem:[#allocation5 + $0x798] sm:$0xf0] }
 0x27f   :  { %5784 = vmatpush.bf16.msra.mxu0 %v6806_v50  ;;  %v7779_v50 = vld [vmem:[#allocation5 + $0x7d8] sm:$0xf0]  ;;  %v7526_v52 = vor.u32 %v10352_v39, %v7523_v6  ;;  %v10376_v8 = vld [vmem:[#allocation5 + $0x68c] sm:$0xf] }
 0x280   :  { %5797 = vmatpush.bf16.msra.mxu1 %v6934_v17  ;;  %v7654_v17 = vor.u32 %v10384_v14, %v7651_v47  ;;  %v7782_v53 = vor.u32 %v10416_v48, %v7779_v50  ;;  %v10340_v32 = vld [vmem:[#allocation5 + $0x56c] sm:$0xf]  ;;  %v7603_v14 = vld [vmem:[#allocation5 + $0x678] sm:$0xf0] }
 0x281   :  { %5810 = vmatpush.bf16.msra.mxu2 %v7062_v57  ;;  %v10316_v57 = vld [vmem:[#allocation5 + $0x4ac] sm:$0xf]  ;;  %v7731_v48 = vld [vmem:[#allocation5 + $0x778] sm:$0xf0] }
 0x282   :  { %5823 = vmatpush.bf16.msra.mxu3 %v7190_v61  ;;  %v10380_v61 = vld [vmem:[#allocation5 + $0x6ac] sm:$0xf]  ;;  %v7382_v3 = vor.u32 %v10316_v57, %v7379_v58 }
 0x283   :  { %5785 = vmatpush.bf16.msra.mxu0 %v6790_v5  ;;  %v7638_v26 = vor.u32 %v10380_v61, %v7635_v62  ;;  %v7363_v5 = vld [vmem:[#allocation5 + $0x498] sm:$0xf0]  ;;  %v10372_v6 = vld [vmem:[#allocation5 + $0x66c] sm:$0xf] }
 0x284   :  { %5798 = vmatpush.bf16.msra.mxu1 %v6918_v9  ;;  %v7619_v9 = vld [vmem:[#allocation5 + $0x698] sm:$0xf0]  ;;  %v7366_v1 = vor.u32 %v10312_v36, %v7363_v5  ;;  %v10404_v47 = vld [vmem:[#allocation5 + $0x76c] sm:$0xf] }
 0x285   :  { %5811 = vmatpush.bf16.msra.mxu2 %v7046_v10  ;;  %v5579_v10 = vpop.f32.mrf.mxu0  ;;  %v10336_v57 = vld [vmem:[#allocation5 + $0x54c] sm:$0xf]  ;;  %v7734_v58 = vor.u32 %v10404_v47, %v7731_v48  ;;  %v7587_v61 = vld [vmem:[#allocation5 + $0x658] sm:$0xf0] }
 0x286   :  { %5824 = vmatpush.bf16.msra.mxu3 %v7174_v21  ;;  %5786 = vmatmul.bf16.vlgmr.msra.gmra.mxu0 %v11312_v19  ;;  %v10408_v19 = vld [vmem:[#allocation5 + $0x78c] sm:$0xf]  ;;  %v7683_v48 = vld [vmem:[#allocation5 + $0x718] sm:$0xf0] }
 0x287   :  { %5830 = vmatpush.bf16.msrb.mxu0 %v7414_v63  ;;  %5799 = vmatmul.bf16.vlgmr.msra.gmra.mxu1 %v11316_v22  ;;  %v5592_v22 = vpop.f32.mrf.mxu1  ;;  %v7622_v63 = vor.u32 %v10376_v8, %v7619_v9  ;;  %v7750_v34 = vor.u32 %v10408_v19, %v7747_v13  ;;  %v10368_v60 = vld [vmem:[#allocation5 + $0x64c] sm:$0xf]  ;;  %v7315_v8 = vld [vmem:[#allocation5 + $0x438] sm:$0xf0] }
 0x288   :  { %5843 = vmatpush.bf16.msrb.mxu1 %v7542_v24  ;;  %5812 = vmatmul.bf16.vlgmr.msra.gmra.mxu2 %v11310_v18  ;;  %v7491_v18 = vld [vmem:[#allocation5 + $0x598] sm:$0xf0]  ;;  %v10308_v24 = vld [vmem:[#allocation5 + $0x46c] sm:$0xf] }
 0x289   :  { %5856 = vmatpush.bf16.msrb.mxu2 %v7670_v27  ;;  %5825 = vmatmul.bf16.vlgmr.msra.gmra.mxu3 %v11314_v20  ;;  %v5580_v20 = vadd.f32 %v5579_v10, %v11467_v15  ;;  %v7494_v21 = vor.u32 %v10344_v55, %v7491_v18  ;;  %v7347_v27 = vld [vmem:[#allocation5 + $0x478] sm:$0xf0]  ;;  %v10400_v2 = vld [vmem:[#allocation5 + $0x74c] sm:$0xf] }
 0x28a   :  { %5869 = vmatpush.bf16.msrb.mxu3 %v7798_v40  ;;  %v7475_v40 = vld [vmem:[#allocation5 + $0x578] sm:$0xf0]  ;;  %v7350_v50 = vor.u32 %v10308_v24, %v7347_v27  ;;  %v10300_v18 = vld [vmem:[#allocation5 + $0x42c] sm:$0xf] }
 0x28b   :  { %5831 = vmatpush.bf16.msrb.mxu0 %v7398_v51  ;;  %v5593_v39 = vadd.f32 %v5592_v22, %v5580_v20  ;;  %v7478_v15 = vor.u32 %v10340_v32, %v7475_v40  ;;  %v7606_v51 = vor.u32 %v10372_v6, %v7603_v14  ;;  %v5605_v59 = vpop.f32.mrf.mxu2  ;;  %v10332_v9 = vld [vmem:[#allocation5 + $0x52c] sm:$0xf]  ;;  %v7443_v19 = vld [vmem:[#allocation5 + $0x538] sm:$0xf0] }
 0x28c   :  { %5844 = vmatpush.bf16.msrb.mxu1 %v7526_v52  ;;  %v10304_v52 = vld [vmem:[#allocation5 + $0x44c] sm:$0xf]  ;;  %v5618_v0 = vpop.f32.mrf.mxu3  ;;  %v7571_v20 = vld [vmem:[#allocation5 + $0x638] sm:$0xf0]  ;;  %v7446_v27 = vor.u32 %v10332_v9, %v7443_v19 }
 0x28d   :  { %5857 = vmatpush.bf16.msrb.mxu2 %v7654_v17  ;;  %v7331_v17 = vld [vmem:[#allocation5 + $0x458] sm:$0xf0]  ;;  %v5606_v62 = vadd.f32 %v5605_v59, %v5593_v39  ;;  %v10364_v13 = vld [vmem:[#allocation5 + $0x62c] sm:$0xf] }
 0x28e   :  { %5870 = vmatpush.bf16.msrb.mxu3 %v7782_v53  ;;  %v7459_v53 = vld [vmem:[#allocation5 + $0x558] sm:$0xf0]  ;;  %v7574_v32 = vor.u32 %v10364_v13, %v7571_v20  ;;  %v10360_v40 = vld [vmem:[#allocation5 + $0x60c] sm:$0xf] }
 0x28f   :  { %5832 = vmatpush.bf16.msrb.mxu0 %v7382_v3  ;;  %v7715_v3 = vld [vmem:[#allocation5 + $0x758] sm:$0xf0]  ;;  %v5594_v36 = vpop.f32.mrf.mxu1  ;;  %v11474_v5 = vadd.f32 %v5618_v0, %v5606_v62  ;;  %v7462_v55 = vor.u32 %v10336_v57, %v7459_v53  ;;  %v10392_v47 = vld [vmem:[#allocation5 + $0x70c] sm:$0xf] }
 0x290   :  { %5845 = vmatpush.bf16.msrb.mxu1 %v7510_v4  ;;  %v5581_v4 = vpop.f32.mrf.mxu0  ;;  %v7718_v10 = vor.u32 %v10400_v2, %v7715_v3  ;;  %v7699_v22 = vld [vmem:[#allocation5 + $0x738] sm:$0xf0]  ;;  %v10516_v59 = vld [vmem:[#allocation5 + $0xaec] sm:$0xf]  ;;  %v7686_v2 = vor.u32 %v10392_v47, %v7683_v48 }
 0x291   :  { %5858 = vmatpush.bf16.msrb.mxu2 %v7638_v26  ;;  %v7334_v26 = vor.u32 %v10304_v52, %v7331_v17  ;;  %v7299_v24 = vld [vmem:[#allocation5 + $0x418] sm:$0xf0]  ;;  %v10484_v52 = vld [vmem:[#allocation5 + $0x9ec] sm:$0xf] }
 0x292   :  { %5871 = vmatpush.bf16.msrb.mxu3 %v7766_v56  ;;  %v7590_v56 = vor.u32 %v10368_v60, %v7587_v61  ;;  %v7427_v39 = vld [vmem:[#allocation5 + $0x518] sm:$0xf0]  ;;  %v10548_v62 = vld [vmem:[#allocation5 + $0xbec] sm:$0xf] }
 0x293   :  { %5833 = vmatpush.bf16.msrb.mxu0 %v7366_v1  ;;  %v10396_v1 = vld [vmem:[#allocation5 + $0x72c] sm:$0xf]  ;;  %v7555_v14 = vld [vmem:[#allocation5 + $0x618] sm:$0xf0] }
 0x294   :  { %5846 = vmatpush.bf16.msrb.mxu1 %v7494_v21  ;;  %v7318_v21 = vor.u32 %v10300_v18, %v7315_v8  ;;  %v7702_v6 = vor.u32 %v10396_v1, %v7699_v22  ;;  %v5620_v17 = vpop.f32.mrf.mxu3  ;;  %v8179_v53 = vld [vmem:[#allocation5 + $0xaf8] sm:$0xf0]  ;;  %v7558_v61 = vor.u32 %v10360_v40, %v7555_v14  ;;  %v10448_v36 = vld [vmem:[#allocation5 + $0x8cc] sm:$0xf] }
 0x295   :  { %5859 = vmatpush.bf16.msrb.mxu2 %v7622_v63  ;;  %v10296_v63 = vld [vmem:[#allocation5 + $0x40c] sm:$0xf]  ;;  %v8307_v0 = vld [vmem:[#allocation5 + $0xbf8] sm:$0xf0] }
 0x296   :  { %5872 = vmatpush.bf16.msrb.mxu3 %v7750_v34  ;;  %v10328_v34 = vld [vmem:[#allocation5 + $0x50c] sm:$0xf]  ;;  %v7302_v57 = vor.u32 %v10296_v63, %v7299_v24  ;;  %v8310_v18 = vor.u32 %v10548_v62, %v8307_v0  ;;  %v8035_v8 = vld [vmem:[#allocation5 + $0x9d8] sm:$0xf0] }
 0x297   :  { %5834 = vmatpush.bf16.msrb.mxu0 %v7350_v50  ;;  %v5607_v50 = vpop.f32.mrf.mxu2  ;;  %v7430_v60 = vor.u32 %v10328_v34, %v7427_v39  ;;  %v10512_v9 = vld [vmem:[#allocation5 + $0xacc] sm:$0xf]  ;;  %v8291_v13 = vld [vmem:[#allocation5 + $0xbd8] sm:$0xf0] }
 0x298   :  { %5847 = vmatpush.bf16.msrb.mxu1 %v7478_v15  ;;  %v10452_v15 = vld [vmem:[#allocation5 + $0x8ec] sm:$0xf]  ;;  %v7891_v63 = vld [vmem:[#allocation5 + $0x8b8] sm:$0xf0] }
 0x299   :  { %5860 = vmatpush.bf16.msrb.mxu2 %v7606_v51  ;;  %v7923_v51 = vld [vmem:[#allocation5 + $0x8f8] sm:$0xf0]  ;;  %v10544_v19 = vld [vmem:[#allocation5 + $0xbcc] sm:$0xf] }
 0x29a   :  { %5873 = vmatpush.bf16.msrb.mxu3 %v7734_v58  ;;  %v8051_v58 = vld [vmem:[#allocation5 + $0x9f8] sm:$0xf0]  ;;  %v7926_v3 = vor.u32 %v10452_v15, %v7923_v51  ;;  %v10476_v24 = vld [vmem:[#allocation5 + $0x9ac] sm:$0xf] }
 0x29b   :  { %5835 = vmatpush.bf16.msrb.mxu0 %v7334_v26  ;;  %v8054_v4 = vor.u32 %v10484_v52, %v8051_v58  ;;  %v8182_v26 = vor.u32 %v10516_v59, %v8179_v53  ;;  %v10508_v34 = vld [vmem:[#allocation5 + $0xaac] sm:$0xf]  ;;  %v8147_v39 = vld [vmem:[#allocation5 + $0xab8] sm:$0xf0] }
 0x29c   :  { %5848 = vmatpush.bf16.msrb.mxu1 %v7462_v55  ;;  %v7907_v55 = vld [vmem:[#allocation5 + $0x8d8] sm:$0xf0]  ;;  %v10540_v40 = vld [vmem:[#allocation5 + $0xbac] sm:$0xf]  ;;  %v8150_v48 = vor.u32 %v10508_v34, %v8147_v39 }
 0x29d   :  { %5861 = vmatpush.bf16.msrb.mxu2 %v7590_v56  ;;  %v10480_v56 = vld [vmem:[#allocation5 + $0x9cc] sm:$0xf]  ;;  %v7910_v20 = vor.u32 %v10448_v36, %v7907_v55  ;;  %v7875_v15 = vld [vmem:[#allocation5 + $0x898] sm:$0xf0] }
 0x29e   :  { %5874 = vmatpush.bf16.msrb.mxu3 %v7718_v10  ;;  %v8163_v10 = vld [vmem:[#allocation5 + $0xad8] sm:$0xf0]  ;;  %v8038_v1 = vor.u32 %v10480_v56, %v8035_v8  ;;  %v10440_v50 = vld [vmem:[#allocation5 + $0x88c] sm:$0xf] }
 0x29f   :  { %5836 = vmatpush.bf16.msrb.mxu0 %v7318_v21  ;;  %v8166_v22 = vor.u32 %v10512_v9, %v8163_v10  ;;  %v10444_v21 = vld [vmem:[#allocation5 + $0x8ac] sm:$0xf]  ;;  %v8003_v52 = vld [vmem:[#allocation5 + $0x998] sm:$0xf0]  ;;  %v7878_v53 = vor.u32 %v10440_v50, %v7875_v15 }
 0x2a0   :  { %5849 = vmatpush.bf16.msrb.mxu1 %v7446_v27  ;;  %v8294_v27 = vor.u32 %v10544_v19, %v8291_v13  ;;  %v7894_v14 = vor.u32 %v10444_v21, %v7891_v63  ;;  %v10504_v17 = vld [vmem:[#allocation5 + $0xa8c] sm:$0xf]  ;;  %v8259_v59 = vld [vmem:[#allocation5 + $0xb98] sm:$0xf0] }
 0x2a1   :  { %5862 = vmatpush.bf16.msrb.mxu2 %v7574_v32  ;;  %v8019_v32 = vld [vmem:[#allocation5 + $0x9b8] sm:$0xf0]  ;;  %v10436_v62 = vld [vmem:[#allocation5 + $0x86c] sm:$0xf] }
 0x2a2   :  { %5875 = vmatpush.bf16.msrb.mxu3 %v7702_v6  ;;  %v8275_v6 = vld [vmem:[#allocation5 + $0xbb8] sm:$0xf0]  ;;  %v8022_v47 = vor.u32 %v10476_v24, %v8019_v32  ;;  %v10500_v36 = vld [vmem:[#allocation5 + $0xa6c] sm:$0xf] }
 0x2a3   :  { %5837 = vmatpush.bf16.msrb.mxu0 %v7302_v57  ;;  %v8278_v51 = vor.u32 %v10540_v40, %v8275_v6  ;;  %v8131_v57 = vld [vmem:[#allocation5 + $0xa98] sm:$0xf0]  ;;  %v5631_v58 = vpop.f32.mrf.mxu0  ;;  %v10532_v56 = vld [vmem:[#allocation5 + $0xb6c] sm:$0xf] }
 0x2a4   :  { %5850 = vmatpush.bf16.msrb.mxu1 %v7430_v60  ;;  %v7859_v0 = vld [vmem:[#allocation5 + $0x878] sm:$0xf0]  ;;  %v10432_v10 = vld [vmem:[#allocation5 + $0x84c] sm:$0xf] }
 0x2a5   :  { %5863 = vmatpush.bf16.msrb.mxu2 %v7558_v61  ;;  %v8134_v61 = vor.u32 %v10504_v17, %v8131_v57  ;;  %v8115_v55 = vld [vmem:[#allocation5 + $0xa78] sm:$0xf0]  ;;  %v7862_v8 = vor.u32 %v10436_v62, %v7859_v0  ;;  %v10464_v13 = vld [vmem:[#allocation5 + $0x94c] sm:$0xf] }
 0x2a6   :  { %5876 = vmatpush.bf16.msrb.mxu3 %v7686_v2  ;;  %5838 = vmatmul.bf16.vlgmr.msrb.gmra.mxu0 %v11324_v41  ;;  %v10536_v41 = vld [vmem:[#allocation5 + $0xb8c] sm:$0xf]  ;;  %v8118_v9 = vor.u32 %v10500_v36, %v8115_v55  ;;  %v7843_v19 = vld [vmem:[#allocation5 + $0x858] sm:$0xf0] }
 0x2a7   :  { %5882 = vmatpush.bf16.msra.mxu0 %v7926_v3  ;;  %5851 = vmatmul.bf16.vlgmr.msrb.gmra.mxu1 %v11328_v44  ;;  %v5644_v44 = vpop.f32.mrf.mxu1  ;;  %v10468_v2 = vld [vmem:[#allocation5 + $0x96c] sm:$0xf]  ;;  %v8262_v3 = vor.u32 %v10536_v41, %v8259_v59  ;;  %v8099_v63 = vld [vmem:[#allocation5 + $0xa58] sm:$0xf0]  ;;  %v7846_v40 = vor.u32 %v10432_v10, %v7843_v19 }
 0x2a8   :  { %5895 = vmatpush.bf16.msra.mxu1 %v8054_v4  ;;  %5864 = vmatmul.bf16.vlgmr.msrb.gmra.mxu2 %v11322_v38  ;;  %v10472_v38 = vld [vmem:[#allocation5 + $0x98c] sm:$0xf]  ;;  %v8227_v34 = vld [vmem:[#allocation5 + $0xb58] sm:$0xf0] }
 0x2a9   :  { %5908 = vmatpush.bf16.msra.mxu2 %v8182_v26  ;;  %5877 = vmatmul.bf16.vlgmr.msrb.gmra.mxu3 %v11326_v42  ;;  %v5632_v42 = vadd.f32 %v5631_v58, %v11474_v5  ;;  %v8006_v60 = vor.u32 %v10472_v38, %v8003_v52  ;;  %v7987_v26 = vld [vmem:[#allocation5 + $0x978] sm:$0xf0]  ;;  %v10496_v21 = vld [vmem:[#allocation5 + $0xa4c] sm:$0xf] }
 0x2aa   :  { %5921 = vmatpush.bf16.msra.mxu3 %v8310_v18  ;;  %v8243_v18 = vld [vmem:[#allocation5 + $0xb78] sm:$0xf0]  ;;  %v7990_v5 = vor.u32 %v10468_v2, %v7987_v26  ;;  %v10528_v32 = vld [vmem:[#allocation5 + $0xb4c] sm:$0xf] }
 0x2ab   :  { %5883 = vmatpush.bf16.msra.mxu0 %v7910_v20  ;;  %v5645_v4 = vadd.f32 %v5644_v44, %v5632_v42  ;;  %v8246_v20 = vor.u32 %v10532_v56, %v8243_v18  ;;  %v5633_v39 = vpop.f32.mrf.mxu0  ;;  %v10428_v50 = vld [vmem:[#allocation5 + $0x82c] sm:$0xf]  ;;  %v7827_v15 = vld [vmem:[#allocation5 + $0x838] sm:$0xf0] }
 0x2ac   :  { %5896 = vmatpush.bf16.msra.mxu1 %v8038_v1  ;;  %v5657_v1 = vpop.f32.mrf.mxu2  ;;  %v10460_v38 = vld [vmem:[#allocation5 + $0x92c] sm:$0xf]  ;;  %v7955_v52 = vld [vmem:[#allocation5 + $0x938] sm:$0xf0]  ;;  %v7830_v59 = vor.u32 %v10428_v50, %v7827_v15 }
 0x2ad   :  { %5909 = vmatpush.bf16.msra.mxu2 %v8166_v22  ;;  %v7971_v22 = vld [vmem:[#allocation5 + $0x958] sm:$0xf0]  ;;  %v5658_v24 = vadd.f32 %v5657_v1, %v5645_v4  ;;  %v10492_v17 = vld [vmem:[#allocation5 + $0xa2c] sm:$0xf]  ;;  %v7958_v44 = vor.u32 %v10460_v38, %v7955_v52 }
 0x2ae   :  { %5922 = vmatpush.bf16.msra.mxu3 %v8294_v27  ;;  %v5670_v27 = vpop.f32.mrf.mxu3  ;;  %v8083_v57 = vld [vmem:[#allocation5 + $0xa38] sm:$0xf0]  ;;  %v10524_v58 = vld [vmem:[#allocation5 + $0xb2c] sm:$0xf] }
 0x2af   :  { %5884 = vmatpush.bf16.msra.mxu0 %v7894_v14  ;;  %v5646_v6 = vpop.f32.mrf.mxu1  ;;  %v11481_v14 = vadd.f32 %v5670_v27, %v5658_v24  ;;  %v8211_v41 = vld [vmem:[#allocation5 + $0xb38] sm:$0xf0]  ;;  %v10424_v42 = vld [vmem:[#allocation5 + $0x80c] sm:$0xf] }
 0x2b0   :  { %5897 = vmatpush.bf16.msra.mxu1 %v8022_v47  ;;  %v7974_v47 = vor.u32 %v10464_v13, %v7971_v22  ;;  %v7939_v62 = vld [vmem:[#allocation5 + $0x918] sm:$0xf0]  ;;  %v10488_v0 = vld [vmem:[#allocation5 + $0xa0c] sm:$0xf]  ;;  %v8214_v2 = vor.u32 %v10524_v58, %v8211_v41 }
 0x2b1   :  { %5910 = vmatpush.bf16.msra.mxu2 %v8150_v48  ;;  %v8102_v48 = vor.u32 %v10496_v21, %v8099_v63  ;;  %v10520_v4 = vld [vmem:[#allocation5 + $0xb0c] sm:$0xf]  ;;  %v8195_v26 = vld [vmem:[#allocation5 + $0xb18] sm:$0xf0] }
 0x2b2   :  { %5923 = vmatpush.bf16.msra.mxu3 %v8278_v51  ;;  %v8230_v51 = vor.u32 %v10528_v32, %v8227_v34  ;;  %v10580_v55 = vld [vmem:[#allocation5 + $0xcec] sm:$0xf]  ;;  %v8435_v56 = vld [vmem:[#allocation5 + $0xcf8] sm:$0xf0]  ;;  %v8198_v21 = vor.u32 %v10520_v4, %v8195_v26 }
 0x2b3   :  { %5885 = vmatpush.bf16.msra.mxu0 %v7878_v53  ;;  %v7811_v53 = vld [vmem:[#allocation5 + $0x818] sm:$0xf0]  ;;  %v10612_v18 = vld [vmem:[#allocation5 + $0xdec] sm:$0xf]  ;;  %v8438_v63 = vor.u32 %v10580_v55, %v8435_v56 }
 0x2b4   :  { %5898 = vmatpush.bf16.msra.mxu1 %v8006_v60  ;;  %v8086_v60 = vor.u32 %v10492_v17, %v8083_v57  ;;  %v5659_v36 = vpop.f32.mrf.mxu2  ;;  %v10644_v10 = vld [vmem:[#allocation5 + $0xeec] sm:$0xf]  ;;  %v8691_v19 = vld [vmem:[#allocation5 + $0xef8] sm:$0xf0] }
 0x2b5   :  { %5911 = vmatpush.bf16.msra.mxu2 %v8134_v61  ;;  %v10456_v61 = vld [vmem:[#allocation5 + $0x90c] sm:$0xf]  ;;  %v8819_v22 = vld [vmem:[#allocation5 + $0xff8] sm:$0xf0]  ;;  %v8694_v27 = vor.u32 %v10644_v10, %v8691_v19 }
 0x2b6   :  { %5924 = vmatpush.bf16.msra.mxu3 %v8262_v3  ;;  %v8067_v3 = vld [vmem:[#allocation5 + $0xa18] sm:$0xf0]  ;;  %v7942_v13 = vor.u32 %v10456_v61, %v7939_v62  ;;  %v10676_v1 = vld [vmem:[#allocation5 + $0xfec] sm:$0xf] }
 0x2b7   :  { %5886 = vmatpush.bf16.msra.mxu0 %v7862_v8  ;;  %v5672_v8 = vpop.f32.mrf.mxu3  ;;  %v10576_v32 = vld [vmem:[#allocation5 + $0xccc] sm:$0xf]  ;;  %v8419_v34 = vld [vmem:[#allocation5 + $0xcd8] sm:$0xf0] }
 0x2b8   :  { %5899 = vmatpush.bf16.msra.mxu1 %v7990_v5  ;;  %v7814_v5 = vor.u32 %v10424_v42, %v7811_v53  ;;  %v10608_v39 = vld [vmem:[#allocation5 + $0xdcc] sm:$0xf]  ;;  %v8547_v6 = vld [vmem:[#allocation5 + $0xdd8] sm:$0xf0]  ;;  %v8422_v38 = vor.u32 %v10576_v32, %v8419_v34 }
 0x2b9   :  { %5912 = vmatpush.bf16.msra.mxu2 %v8118_v9  ;;  %v8563_v9 = vld [vmem:[#allocation5 + $0xdf8] sm:$0xf0]  ;;  %v10672_v50 = vld [vmem:[#allocation5 + $0xfcc] sm:$0xf] }
 0x2ba   :  { %5925 = vmatpush.bf16.msra.mxu3 %v8246_v20  ;;  %v8070_v20 = vor.u32 %v10488_v0, %v8067_v3  ;;  %v8566_v24 = vor.u32 %v10612_v18, %v8563_v9  ;;  %v8803_v15 = vld [vmem:[#allocation5 + $0xfd8] sm:$0xf0]  ;;  %v10572_v17 = vld [vmem:[#allocation5 + $0xcac] sm:$0xf] }
 0x2bb   :  { %5887 = vmatpush.bf16.msra.mxu0 %v7846_v40  ;;  %v8822_v40 = vor.u32 %v10676_v1, %v8819_v22  ;;  %v8403_v57 = vld [vmem:[#allocation5 + $0xcb8] sm:$0xf0]  ;;  %v10604_v58 = vld [vmem:[#allocation5 + $0xdac] sm:$0xf]  ;;  %v8806_v41 = vor.u32 %v10672_v50, %v8803_v15 }
 0x2bc   :  { %5900 = vmatpush.bf16.msra.mxu1 %v7974_v47  ;;  %v10640_v47 = vld [vmem:[#allocation5 + $0xecc] sm:$0xf]  ;;  %v8659_v53 = vld [vmem:[#allocation5 + $0xeb8] sm:$0xf0]  ;;  %v8406_v61 = vor.u32 %v10572_v17, %v8403_v57 }
 0x2bd   :  { %5913 = vmatpush.bf16.msra.mxu2 %v8102_v48  ;;  %v8675_v48 = vld [vmem:[#allocation5 + $0xed8] sm:$0xf0]  ;;  %v10636_v42 = vld [vmem:[#allocation5 + $0xeac] sm:$0xf] }
 0x2be   :  { %5926 = vmatpush.bf16.msra.mxu3 %v8230_v51  ;;  %v8550_v51 = vor.u32 %v10608_v39, %v8547_v6  ;;  %v8678_v52 = vor.u32 %v10640_v47, %v8675_v48  ;;  %v8662_v0 = vor.u32 %v10636_v42, %v8659_v53  ;;  %v10600_v3 = vld [vmem:[#allocation5 + $0xd8c] sm:$0xf]  ;;  %v8515_v26 = vld [vmem:[#allocation5 + $0xd98] sm:$0xf0] }
 0x2bf   :  { %5888 = vmatpush.bf16.msra.mxu0 %v7830_v59  ;;  %v8531_v59 = vld [vmem:[#allocation5 + $0xdb8] sm:$0xf0]  ;;  %v10632_v36 = vld [vmem:[#allocation5 + $0xe8c] sm:$0xf] }
 0x2c0   :  { %5901 = vmatpush.bf16.msra.mxu1 %v7958_v44  ;;  %v10668_v44 = vld [vmem:[#allocation5 + $0xfac] sm:$0xf]  ;;  %v8534_v62 = vor.u32 %v10604_v58, %v8531_v59  ;;  %v8771_v56 = vld [vmem:[#allocation5 + $0xf98] sm:$0xf0] }
 0x2c1   :  { %5914 = vmatpush.bf16.msra.mxu2 %v8086_v60  ;;  %v8787_v60 = vld [vmem:[#allocation5 + $0xfb8] sm:$0xf0]  ;;  %v10564_v10 = vld [vmem:[#allocation5 + $0xc6c] sm:$0xf] }
 0x2c2   :  { %5927 = vmatpush.bf16.msra.mxu3 %v8214_v2  ;;  %v10568_v2 = vld [vmem:[#allocation5 + $0xc8c] sm:$0xf]  ;;  %v8790_v4 = vor.u32 %v10668_v44, %v8787_v60  ;;  %v8371_v19 = vld [vmem:[#allocation5 + $0xc78] sm:$0xf0] }
 0x2c3   :  { %5889 = vmatpush.bf16.msra.mxu0 %v7814_v5  ;;  %v5683_v55 = vpop.f32.mrf.mxu0  ;;  %v8518_v5 = vor.u32 %v10600_v3, %v8515_v26  ;;  %v8499_v22 = vld [vmem:[#allocation5 + $0xd78] sm:$0xf0]  ;;  %v8374_v32 = vor.u32 %v10564_v10, %v8371_v19  ;;  %v10560_v39 = vld [vmem:[#allocation5 + $0xc4c] sm:$0xf] }
 0x2c4   :  { %5902 = vmatpush.bf16.msra.mxu1 %v7942_v13  ;;  %v5696_v8 = vpop.f32.mrf.mxu1  ;;  %v10596_v13 = vld [vmem:[#allocation5 + $0xd6c] sm:$0xf]  ;;  %v8483_v50 = vld [vmem:[#allocation5 + $0xd58] sm:$0xf0] }
 0x2c5   :  { %5915 = vmatpush.bf16.msra.mxu2 %v8070_v20  ;;  %v10592_v6 = vld [vmem:[#allocation5 + $0xd4c] sm:$0xf]  ;;  %v8739_v57 = vld [vmem:[#allocation5 + $0xf58] sm:$0xf0] }
 0x2c6   :  { %5928 = vmatpush.bf16.msra.mxu3 %v8198_v21  ;;  %5890 = vmatmul.bf16.vlgmr.msra.gmra.mxu0 %v11334_v25  ;;  %v8387_v25 = vld [vmem:[#allocation5 + $0xc98] sm:$0xf0]  ;;  %v10628_v21 = vld [vmem:[#allocation5 + $0xe6c] sm:$0xf]  ;;  %v8486_v53 = vor.u32 %v10592_v6, %v8483_v50 }
 0x2c7   :  { %5934 = vmatpush.bf16.msrb.mxu0 %v8438_v63  ;;  %5903 = vmatmul.bf16.vlgmr.msra.gmra.mxu1 %v11338_v30  ;;  %v10664_v30 = vld [vmem:[#allocation5 + $0xf8c] sm:$0xf]  ;;  %v8390_v18 = vor.u32 %v10568_v2, %v8387_v25  ;;  %v8627_v63 = vld [vmem:[#allocation5 + $0xe78] sm:$0xf0] }
 0x2c8   :  { %5947 = vmatpush.bf16.msrb.mxu1 %v8566_v24  ;;  %5916 = vmatmul.bf16.vlgmr.msra.gmra.mxu2 %v11336_v29  ;;  %v8643_v29 = vld [vmem:[#allocation5 + $0xe98] sm:$0xf0]  ;;  %v8774_v20 = vor.u32 %v10664_v30, %v8771_v56  ;;  %v10660_v24 = vld [vmem:[#allocation5 + $0xf6c] sm:$0xf]  ;;  %v8630_v34 = vor.u32 %v10628_v21, %v8627_v63 }
 0x2c9   :  { %5960 = vmatpush.bf16.msrb.mxu2 %v8694_v27  ;;  %5929 = vmatmul.bf16.vlgmr.msra.gmra.mxu3 %v11340_v33  ;;  %v5684_v33 = vadd.f32 %v5683_v55, %v11481_v14  ;;  %v8646_v9 = vor.u32 %v10632_v36, %v8643_v29  ;;  %v8755_v27 = vld [vmem:[#allocation5 + $0xf78] sm:$0xf0]  ;;  %v8502_v14 = vor.u32 %v10596_v13, %v8499_v22  ;;  %v10624_v15 = vld [vmem:[#allocation5 + $0xe4c] sm:$0xf] }
 0x2ca   :  { %5973 = vmatpush.bf16.msrb.mxu3 %v8822_v40  ;;  %v8355_v40 = vld [vmem:[#allocation5 + $0xc58] sm:$0xf0]  ;;  %v8758_v47 = vor.u32 %v10660_v24, %v8755_v27  ;;  %v10656_v17 = vld [vmem:[#allocation5 + $0xf4c] sm:$0xf] }
 0x2cb   :  { %5935 = vmatpush.bf16.msrb.mxu0 %v8422_v38  ;;  %v5697_v1 = vadd.f32 %v5696_v8, %v5684_v33  ;;  %v5709_v48 = vpop.f32.mrf.mxu2  ;;  %v8611_v38 = vld [vmem:[#allocation5 + $0xe58] sm:$0xf0]  ;;  %v5685_v58 = vpop.f32.mrf.mxu0  ;;  %v10556_v60 = vld [vmem:[#allocation5 + $0xc2c] sm:$0xf] }
 0x2cc   :  { %5948 = vmatpush.bf16.msrb.mxu1 %v8550_v51  ;;  %v5698_v59 = vpop.f32.mrf.mxu1  ;;  %v8614_v44 = vor.u32 %v10624_v15, %v8611_v38  ;;  %v8467_v2 = vld [vmem:[#allocation5 + $0xd38] sm:$0xf0]  ;;  %v10620_v25 = vld [vmem:[#allocation5 + $0xe2c] sm:$0xf] }
 0x2cd   :  { %5961 = vmatpush.bf16.msrb.mxu2 %v8678_v52  ;;  %v5710_v51 = vadd.f32 %v5709_v48, %v5697_v1  ;;  %v5722_v52 = vpop.f32.mrf.mxu3  ;;  %v8595_v3 = vld [vmem:[#allocation5 + $0xe38] sm:$0xf0]  ;;  %v10552_v29 = vld [vmem:[#allocation5 + $0xc0c] sm:$0xf] }
 0x2ce   :  { %5974 = vmatpush.bf16.msrb.mxu3 %v8806_v41  ;;  %v8358_v41 = vor.u32 %v10560_v39, %v8355_v40  ;;  %v8723_v26 = vld [vmem:[#allocation5 + $0xf38] sm:$0xf0]  ;;  %v8598_v56 = vor.u32 %v10620_v25, %v8595_v3  ;;  %v10584_v33 = vld [vmem:[#allocation5 + $0xd0c] sm:$0xf] }
 0x2cf   :  { %5936 = vmatpush.bf16.msrb.mxu0 %v8406_v61  ;;  %v11488_v42 = vadd.f32 %v5722_v52, %v5710_v51  ;;  %v8339_v61 = vld [vmem:[#allocation5 + $0xc38] sm:$0xf0]  ;;  %v10616_v8 = vld [vmem:[#allocation5 + $0xe0c] sm:$0xf] }
 0x2d0   :  { %5949 = vmatpush.bf16.msrb.mxu1 %v8534_v62  ;;  %v10588_v62 = vld [vmem:[#allocation5 + $0xd2c] sm:$0xf]  ;;  %v8342_v36 = vor.u32 %v10556_v60, %v8339_v61  ;;  %v8323_v55 = vld [vmem:[#allocation5 + $0xc18] sm:$0xf0] }
 0x2d1   :  { %5962 = vmatpush.bf16.msrb.mxu2 %v8662_v0  ;;  %v8742_v0 = vor.u32 %v10656_v17, %v8739_v57  ;;  %v8470_v30 = vor.u32 %v10588_v62, %v8467_v2  ;;  %v10648_v10 = vld [vmem:[#allocation5 + $0xf0c] sm:$0xf]  ;;  %v8707_v19 = vld [vmem:[#allocation5 + $0xf18] sm:$0xf0]  ;;  %v8326_v63 = vor.u32 %v10552_v29, %v8323_v55 }
 0x2d2   :  { %5975 = vmatpush.bf16.msrb.mxu3 %v8790_v4  ;;  %v10652_v4 = vld [vmem:[#allocation5 + $0xf2c] sm:$0xf]  ;;  %v8947_v1 = vld [vmem:[#allocation5 + $0x10f8] sm:$0xf0]  ;;  %v8710_v6 = vor.u32 %v10648_v10, %v8707_v19 }
 0x2d3   :  { %5937 = vmatpush.bf16.msrb.mxu0 %v8390_v18  ;;  %v8451_v18 = vld [vmem:[#allocation5 + $0xd18] sm:$0xf0]  ;;  %v5711_v13 = vpop.f32.mrf.mxu2  ;;  %v10740_v22 = vld [vmem:[#allocation5 + $0x11ec] sm:$0xf] }
 0x2d4   :  { %5950 = vmatpush.bf16.msrb.mxu1 %v8518_v5  ;;  %v8726_v5 = vor.u32 %v10652_v4, %v8723_v26  ;;  %v9075_v24 = vld [vmem:[#allocation5 + $0x11f8] sm:$0xf0]  ;;  %v10772_v27 = vld [vmem:[#allocation5 + $0x12ec] sm:$0xf] }
 0x2d5   :  { %5963 = vmatpush.bf16.msrb.mxu2 %v8646_v9  ;;  %v8579_v9 = vld [vmem:[#allocation5 + $0xe18] sm:$0xf0]  ;;  %v5724_v21 = vpop.f32.mrf.mxu3  ;;  %v10804_v39 = vld [vmem:[#allocation5 + $0x13ec] sm:$0xf]  ;;  %v9078_v48 = vor.u32 %v10740_v22, %v9075_v24 }
 0x2d6   :  { %5976 = vmatpush.bf16.msrb.mxu3 %v8774_v20  ;;  %v10708_v20 = vld [vmem:[#allocation5 + $0x10ec] sm:$0xf]  ;;  %v9331_v40 = vld [vmem:[#allocation5 + $0x13f8] sm:$0xf0] }
 0x2d7   :  { %5938 = vmatpush.bf16.msrb.mxu0 %v8374_v32  ;;  %v9203_v32 = vld [vmem:[#allocation5 + $0x12f8] sm:$0xf0]  ;;  %v10704_v15 = vld [vmem:[#allocation5 + $0x10cc] sm:$0xf]  ;;  %v9334_v52 = vor.u32 %v10804_v39, %v9331_v40 }
 0x2d8   :  { %5951 = vmatpush.bf16.msrb.mxu1 %v8502_v14  ;;  %v8454_v14 = vor.u32 %v10584_v33, %v8451_v18  ;;  %v9206_v50 = vor.u32 %v10772_v27, %v9203_v32  ;;  %v8931_v38 = vld [vmem:[#allocation5 + $0x10d8] sm:$0xf0]  ;;  %v10736_v51 = vld [vmem:[#allocation5 + $0x11cc] sm:$0xf] }
 0x2d9   :  { %5964 = vmatpush.bf16.msrb.mxu2 %v8630_v34  ;;  %v8582_v34 = vor.u32 %v10616_v8, %v8579_v9  ;;  %v9059_v17 = vld [vmem:[#allocation5 + $0x11d8] sm:$0xf0]  ;;  %v10768_v57 = vld [vmem:[#allocation5 + $0x12cc] sm:$0xf] }
 0x2da   :  { %5977 = vmatpush.bf16.msrb.mxu3 %v8758_v47  ;;  %v8950_v47 = vor.u32 %v10708_v20, %v8947_v1  ;;  %v9187_v58 = vld [vmem:[#allocation5 + $0x12d8] sm:$0xf0]  ;;  %v10700_v61 = vld [vmem:[#allocation5 + $0x10ac] sm:$0xf] }
 0x2db   :  { %5939 = vmatpush.bf16.msrb.mxu0 %v8358_v41  ;;  %v10800_v41 = vld [vmem:[#allocation5 + $0x13cc] sm:$0xf]  ;;  %v9315_v59 = vld [vmem:[#allocation5 + $0x13d8] sm:$0xf0]  ;;  %v9190_v60 = vor.u32 %v10768_v57, %v9187_v58 }
 0x2dc   :  { %5952 = vmatpush.bf16.msrb.mxu1 %v8486_v53  ;;  %v8934_v53 = vor.u32 %v10704_v15, %v8931_v38  ;;  %v8915_v62 = vld [vmem:[#allocation5 + $0x10b8] sm:$0xf0]  ;;  %v9318_v2 = vor.u32 %v10800_v41, %v9315_v59  ;;  %v10764_v3 = vld [vmem:[#allocation5 + $0x12ac] sm:$0xf] }
 0x2dd   :  { %5965 = vmatpush.bf16.msrb.mxu2 %v8614_v44  ;;  %v9062_v44 = vor.u32 %v10736_v51, %v9059_v17  ;;  %v9043_v25 = vld [vmem:[#allocation5 + $0x11b8] sm:$0xf0]  ;;  %v10796_v26 = vld [vmem:[#allocation5 + $0x13ac] sm:$0xf]  ;;  %v8918_v29 = vor.u32 %v10700_v61, %v8915_v62 }
 0x2de   :  { %5978 = vmatpush.bf16.msrb.mxu3 %v8742_v0  ;;  %v10732_v0 = vld [vmem:[#allocation5 + $0x11ac] sm:$0xf]  ;;  %v9171_v4 = vld [vmem:[#allocation5 + $0x12b8] sm:$0xf0] }
 0x2df   :  { %5940 = vmatpush.bf16.msrb.mxu0 %v8342_v36  ;;  %v9299_v36 = vld [vmem:[#allocation5 + $0x13b8] sm:$0xf0]  ;;  %v9046_v55 = vor.u32 %v10732_v0, %v9043_v25  ;;  %v10728_v33 = vld [vmem:[#allocation5 + $0x118c] sm:$0xf] }
 0x2e0   :  { %5953 = vmatpush.bf16.msrb.mxu1 %v8470_v30  ;;  %v9174_v30 = vor.u32 %v10764_v3, %v9171_v4  ;;  %v9302_v18 = vor.u32 %v10796_v26, %v9299_v36  ;;  %v9027_v8 = vld [vmem:[#allocation5 + $0x1198] sm:$0xf0]  ;;  %v10692_v22 = vld [vmem:[#allocation5 + $0x106c] sm:$0xf] }
 0x2e1   :  { %5966 = vmatpush.bf16.msrb.mxu2 %v8598_v56  ;;  %v10696_v56 = vld [vmem:[#allocation5 + $0x108c] sm:$0xf]  ;;  %v9283_v10 = vld [vmem:[#allocation5 + $0x1398] sm:$0xf0]  ;;  %v9030_v20 = vor.u32 %v10728_v33, %v9027_v8 }
 0x2e2   :  { %5979 = vmatpush.bf16.msrb.mxu3 %v8726_v5  ;;  %v10760_v5 = vld [vmem:[#allocation5 + $0x128c] sm:$0xf]  ;;  %v8883_v21 = vld [vmem:[#allocation5 + $0x1078] sm:$0xf0] }
 0x2e3   :  { %5941 = vmatpush.bf16.msrb.mxu0 %v8326_v63  ;;  %v5735_v9 = vpop.f32.mrf.mxu0  ;;  %v10724_v63 = vld [vmem:[#allocation5 + $0x116c] sm:$0xf]  ;;  %v9011_v32 = vld [vmem:[#allocation5 + $0x1178] sm:$0xf0] }
 0x2e4   :  { %5954 = vmatpush.bf16.msrb.mxu1 %v8454_v14  ;;  %v5748_v13 = vpop.f32.mrf.mxu1  ;;  %v10756_v14 = vld [vmem:[#allocation5 + $0x126c] sm:$0xf]  ;;  %v9267_v40 = vld [vmem:[#allocation5 + $0x1378] sm:$0xf0] }
 0x2e5   :  { %5967 = vmatpush.bf16.msrb.mxu2 %v8582_v34  ;;  %v9139_v34 = vld [vmem:[#allocation5 + $0x1278] sm:$0xf0]  ;;  %v10788_v39 = vld [vmem:[#allocation5 + $0x136c] sm:$0xf] }
 0x2e6   :  { %5980 = vmatpush.bf16.msrb.mxu3 %v8710_v6  ;;  %5942 = vmatmul.bf16.vlgmr.msrb.gmra.mxu0 %v11346_v23  ;;  %v8899_v23 = vld [vmem:[#allocation5 + $0x1098] sm:$0xf0]  ;;  %v8886_v6 = vor.u32 %v10692_v22, %v8883_v21  ;;  %v10720_v15 = vld [vmem:[#allocation5 + $0x114c] sm:$0xf]  ;;  %v9270_v38 = vor.u32 %v10788_v39, %v9267_v40 }
 0x2e7   :  { %5986 = vmatpush.bf16.msra.mxu0 %v8950_v47  ;;  %5955 = vmatmul.bf16.vlgmr.msrb.gmra.mxu1 %v11350_v31  ;;  %v10792_v31 = vld [vmem:[#allocation5 + $0x138c] sm:$0xf]  ;;  %v8902_v19 = vor.u32 %v10696_v56, %v8899_v23  ;;  %v9142_v47 = vor.u32 %v10756_v14, %v9139_v34  ;;  %v9123_v57 = vld [vmem:[#allocation5 + $0x1258] sm:$0xf0] }
 0x2e8   :  { %5999 = vmatpush.bf16.msra.mxu1 %v9078_v48  ;;  %5968 = vmatmul.bf16.vlgmr.msrb.gmra.mxu2 %v11348_v28  ;;  %v9155_v28 = vld [vmem:[#allocation5 + $0x1298] sm:$0xf0]  ;;  %v9286_v24 = vor.u32 %v10792_v31, %v9283_v10  ;;  %v10688_v48 = vld [vmem:[#allocation5 + $0x104c] sm:$0xf] }
 0x2e9   :  { %6012 = vmatpush.bf16.msra.mxu2 %v9206_v50  ;;  %5981 = vmatmul.bf16.vlgmr.msrb.gmra.mxu3 %v11352_v35  ;;  %v5736_v35 = vadd.f32 %v5735_v9, %v11488_v42  ;;  %v9158_v1 = vor.u32 %v10760_v5, %v9155_v28  ;;  %v9014_v42 = vor.u32 %v10724_v63, %v9011_v32  ;;  %v8867_v50 = vld [vmem:[#allocation5 + $0x1058] sm:$0xf0]  ;;  %v10752_v17 = vld [vmem:[#allocation5 + $0x124c] sm:$0xf] }
 0x2ea   :  { %6025 = vmatpush.bf16.msra.mxu3 %v9334_v52  ;;  %v8995_v52 = vld [vmem:[#allocation5 + $0x1158] sm:$0xf0]  ;;  %v10784_v59 = vld [vmem:[#allocation5 + $0x134c] sm:$0xf] }
 0x2eb   :  { %5987 = vmatpush.bf16.msra.mxu0 %v8934_v53  ;;  %v5749_v27 = vadd.f32 %v5748_v13, %v5736_v35  ;;  %v5761_v51 = vpop.f32.mrf.mxu2  ;;  %v9251_v53 = vld [vmem:[#allocation5 + $0x1358] sm:$0xf0]  ;;  %v8998_v0 = vor.u32 %v10720_v15, %v8995_v52  ;;  %v10684_v25 = vld [vmem:[#allocation5 + $0x102c] sm:$0xf] }
 0x2ec   :  { %6000 = vmatpush.bf16.msra.mxu1 %v9062_v44  ;;  %v5774_v41 = vpop.f32.mrf.mxu3  ;;  %v5737_v44 = vpop.f32.mrf.mxu0  ;;  %v8851_v3 = vld [vmem:[#allocation5 + $0x1038] sm:$0xf0]  ;;  %v10716_v4 = vld [vmem:[#allocation5 + $0x112c] sm:$0xf]  ;;  %v9254_v26 = vor.u32 %v10784_v59, %v9251_v53 }
 0x2ed   :  { %6013 = vmatpush.bf16.msra.mxu2 %v9190_v60  ;;  %v5762_v58 = vadd.f32 %v5761_v51, %v5749_v27  ;;  %v8870_v60 = vor.u32 %v10688_v48, %v8867_v50  ;;  %v5750_v61 = vpop.f32.mrf.mxu1  ;;  %v8979_v36 = vld [vmem:[#allocation5 + $0x1138] sm:$0xf0]  ;;  %v8854_v23 = vor.u32 %v10684_v25, %v8851_v3  ;;  %v10680_v33 = vld [vmem:[#allocation5 + $0x100c] sm:$0xf] }
 0x2ee   :  { %6026 = vmatpush.bf16.msra.mxu3 %v9318_v2  ;;  %v9126_v2 = vor.u32 %v10752_v17, %v9123_v57  ;;  %v9235_v56 = vld [vmem:[#allocation5 + $0x1338] sm:$0xf0]  ;;  %v8982_v8 = vor.u32 %v10716_v4, %v8979_v36  ;;  %v10712_v28 = vld [vmem:[#allocation5 + $0x110c] sm:$0xf] }
 0x2ef   :  { %5988 = vmatpush.bf16.msra.mxu0 %v8918_v29  ;;  %v11495_v62 = vadd.f32 %v5774_v41, %v5762_v58  ;;  %v10748_v29 = vld [vmem:[#allocation5 + $0x122c] sm:$0xf]  ;;  %v8963_v9 = vld [vmem:[#allocation5 + $0x1118] sm:$0xf0] }
 0x2f0   :  { %6001 = vmatpush.bf16.msra.mxu1 %v9046_v55  ;;  %v9107_v55 = vld [vmem:[#allocation5 + $0x1238] sm:$0xf0]  ;;  %v10744_v31 = vld [vmem:[#allocation5 + $0x120c] sm:$0xf]  ;;  %v8966_v34 = vor.u32 %v10712_v28, %v8963_v9 }
 0x2f1   :  { %6014 = vmatpush.bf16.msra.mxu2 %v9174_v30  ;;  %v10780_v30 = vld [vmem:[#allocation5 + $0x132c] sm:$0xf]  ;;  %v9110_v5 = vor.u32 %v10748_v29, %v9107_v55  ;;  %v9091_v35 = vld [vmem:[#allocation5 + $0x1218] sm:$0xf0] }
 0x2f2   :  { %6027 = vmatpush.bf16.msra.mxu3 %v9302_v18  ;;  %v8835_v18 = vld [vmem:[#allocation5 + $0x1018] sm:$0xf0]  ;;  %v9238_v10 = vor.u32 %v10780_v30, %v9235_v56  ;;  %v10868_v21 = vld [vmem:[#allocation5 + $0x15ec] sm:$0xf]  ;;  %v9094_v39 = vor.u32 %v10744_v31, %v9091_v35 }
 0x2f3   :  { %5989 = vmatpush.bf16.msra.mxu0 %v8902_v19  ;;  %v10776_v19 = vld [vmem:[#allocation5 + $0x130c] sm:$0xf]  ;;  %v9219_v13 = vld [vmem:[#allocation5 + $0x1318] sm:$0xf0] }
 0x2f4   :  { %6002 = vmatpush.bf16.msra.mxu1 %v9030_v20  ;;  %v5763_v20 = vpop.f32.mrf.mxu2  ;;  %v9459_v22 = vld [vmem:[#allocation5 + $0x14f8] sm:$0xf0]  ;;  %v5776_v63 = vpop.f32.mrf.mxu3  ;;  %v10900_v32 = vld [vmem:[#allocation5 + $0x16ec] sm:$0xf] }
 0x2f5   :  { %6015 = vmatpush.bf16.msra.mxu2 %v9158_v1  ;;  %v10836_v1 = vld [vmem:[#allocation5 + $0x14ec] sm:$0xf]  ;;  %v9587_v27 = vld [vmem:[#allocation5 + $0x15f8] sm:$0xf0] }
 0x2f6   :  { %6028 = vmatpush.bf16.msra.mxu3 %v9286_v24  ;;  %v8838_v24 = vor.u32 %v10680_v33, %v8835_v18  ;;  %v9715_v14 = vld [vmem:[#allocation5 + $0x16f8] sm:$0xf0]  ;;  %v10932_v40 = vld [vmem:[#allocation5 + $0x17ec] sm:$0xf]  ;;  %v9590_v48 = vor.u32 %v10868_v21, %v9587_v27  ;;  %v11032_v18 = vld [vmem:[#allocation7] sm:$0xf] }
 0x2f7   :  { %5990 = vmatpush.bf16.msra.mxu0 %v8886_v6  ;;  %v9843_v6 = vld [vmem:[#allocation5 + $0x17f8] sm:$0xf0]  ;;  %v9718_v50 = vor.u32 %v10900_v32, %v9715_v14  ;;  %v10832_v15 = vld [vmem:[#allocation5 + $0x14cc] sm:$0xf] }
 0x2f8   :  { %6003 = vmatpush.bf16.msra.mxu1 %v9014_v42  ;;  %v9222_v42 = vor.u32 %v10776_v19, %v9219_v13  ;;  %v10864_v51 = vld [vmem:[#allocation5 + $0x15cc] sm:$0xf]  ;;  %v9846_v52 = vor.u32 %v10932_v40, %v9843_v6  ;;  %v9571_v17 = vld [vmem:[#allocation5 + $0x15d8] sm:$0xf0] }
 0x2f9   :  { %6016 = vmatpush.bf16.msra.mxu2 %v9142_v47  ;;  %v9462_v47 = vor.u32 %v10836_v1, %v9459_v22  ;;  %v10896_v57 = vld [vmem:[#allocation5 + $0x16cc] sm:$0xf]  ;;  %v9699_v58 = vld [vmem:[#allocation5 + $0x16d8] sm:$0xf0]  ;;  %v9574_v44 = vor.u32 %v10864_v51, %v9571_v17 }
 0x2fa   :  { %6029 = vmatpush.bf16.msra.mxu3 %v9270_v38  ;;  %v9443_v38 = vld [vmem:[#allocation5 + $0x14d8] sm:$0xf0]  ;;  %v10928_v41 = vld [vmem:[#allocation5 + $0x17cc] sm:$0xf] }
 0x2fb   :  { %5991 = vmatpush.bf16.msra.mxu0 %v8870_v60  ;;  %v9827_v59 = vld [vmem:[#allocation5 + $0x17d8] sm:$0xf0]  ;;  %v9446_v53 = vor.u32 %v10832_v15, %v9443_v38  ;;  %v9702_v60 = vor.u32 %v10896_v57, %v9699_v58  ;;  %v10828_v61 = vld [vmem:[#allocation5 + $0x14ac] sm:$0xf] }
 0x2fc   :  { %6004 = vmatpush.bf16.msra.mxu1 %v8998_v0  ;;  %v9427_v0 = vld [vmem:[#allocation5 + $0x14b8] sm:$0xf0]  ;;  %v9830_v25 = vor.u32 %v10928_v41, %v9827_v59  ;;  %v10892_v4 = vld [vmem:[#allocation5 + $0x16ac] sm:$0xf] }
 0x2fd   :  { %6017 = vmatpush.bf16.msra.mxu2 %v9126_v2  ;;  %v10860_v2 = vld [vmem:[#allocation5 + $0x15ac] sm:$0xf]  ;;  %v9555_v3 = vld [vmem:[#allocation5 + $0x15b8] sm:$0xf0]  ;;  %v9430_v55 = vor.u32 %v10828_v61, %v9427_v0 }
 0x2fe   :  { %6030 = vmatpush.bf16.msra.mxu3 %v9254_v26  ;;  %v9683_v26 = vld [vmem:[#allocation5 + $0x16b8] sm:$0xf0]  ;;  %v10924_v36 = vld [vmem:[#allocation5 + $0x17ac] sm:$0xf]  ;;  %v9558_v56 = vor.u32 %v10860_v2, %v9555_v3 }
 0x2ff   :  { %5992 = vmatpush.bf16.msra.mxu0 %v8854_v23  ;;  %v9811_v29 = vld [vmem:[#allocation5 + $0x17b8] sm:$0xf0]  ;;  %v10824_v30 = vld [vmem:[#allocation5 + $0x148c] sm:$0xf]  ;;  %v9686_v23 = vor.u32 %v10892_v4, %v9683_v26 }
 0x300   :  { %6005 = vmatpush.bf16.msra.mxu1 %v8982_v8  ;;  %v10856_v33 = vld [vmem:[#allocation5 + $0x158c] sm:$0xf]  ;;  %v913_v8 = vperm.slane %v11032_v18, 3  ;;  %v9795_v31 = vld [vmem:[#allocation5 + $0x1798] sm:$0xf0] }
 0x301   :  { %6018 = vmatpush.bf16.msra.mxu2 %v9110_v5  ;;  %v9814_v5 = vor.u32 %v10924_v36, %v9811_v29  ;;  %v10888_v28 = vld [vmem:[#allocation5 + $0x168c] sm:$0xf]  ;;  %v9395_v20 = vld [vmem:[#allocation5 + $0x1478] sm:$0xf0] }
 0x302   :  { %6031 = vmatpush.bf16.msra.mxu3 %v9238_v10  ;;  %v10920_v9 = vld [vmem:[#allocation5 + $0x178c] sm:$0xf]  ;;  %v9651_v32 = vld [vmem:[#allocation5 + $0x1678] sm:$0xf0] }
 0x303   :  { %5993 = vmatpush.bf16.msra.mxu0 %v8838_v24  ;;  %v5787_v10 = vpop.f32.mrf.mxu0  ;;  %v10820_v13 = vld [vmem:[#allocation5 + $0x146c] sm:$0xf]  ;;  %v9798_v63 = vor.u32 %v10920_v9, %v9795_v31  ;;  %v9523_v24 = vld [vmem:[#allocation5 + $0x1578] sm:$0xf0] }
 0x304   :  { %6006 = vmatpush.bf16.msra.mxu1 %v8966_v34  ;;  %v10852_v1 = vld [vmem:[#allocation5 + $0x156c] sm:$0xf]  ;;  %v5788_v22 = vadd.f32 %v5787_v10, %v913_v8  ;;  %v5800_v21 = vpop.f32.mrf.mxu1  ;;  %v9779_v34 = vld [vmem:[#allocation5 + $0x1778] sm:$0xf0]  ;;  %v9398_v40 = vor.u32 %v10820_v13, %v9395_v20  ;;  %v9969_v20 = vld [vmem:[#allocation8 + $0xf0] sm:$0xf] }
 0x305   :  { %6019 = vmatpush.bf16.msra.mxu2 %v9094_v39  ;;  %v10884_v27 = vld [vmem:[#allocation5 + $0x166c] sm:$0xf]  ;;  %v9526_v6 = vor.u32 %v10852_v1, %v9523_v24  ;;  %v9507_v51 = vld [vmem:[#allocation5 + $0x1558] sm:$0xf0] }
 0x306   :  { %6032 = vmatpush.bf16.msra.mxu3 %v9222_v42  ;;  %5994 = vmatmul.bf16.vlgmr.msra.gmra.mxu0 %v11358_v37  ;;  %v9411_v37 = vld [vmem:[#allocation5 + $0x1498] sm:$0xf0]  ;;  %v10916_v14 = vld [vmem:[#allocation5 + $0x176c] sm:$0xf]  ;;  %v5801_v39 = vadd.f32 %v5800_v21, %v5788_v22  ;;  %v9654_v42 = vor.u32 %v10884_v27, %v9651_v32  ;;  %v10033_v21 = vld [vmem:[#allocation8 + $0x170] sm:$0xf] }
 0x307   :  { %6038 = vmatpush.bf16.msrb.mxu0 %v9462_v47  ;;  %6007 = vmatmul.bf16.vlgmr.msra.gmra.mxu1 %v11362_v46  ;;  %v9667_v46 = vld [vmem:[#allocation5 + $0x1698] sm:$0xf0]  ;;  %v10816_v47 = vld [vmem:[#allocation5 + $0x144c] sm:$0xf]  ;;  %v9782_v38 = vor.u32 %v10916_v14, %v9779_v34 }
 0x308   :  { %6051 = vmatpush.bf16.msrb.mxu1 %v9590_v48  ;;  %6020 = vmatmul.bf16.vlgmr.msra.gmra.mxu2 %v11360_v45  ;;  %v9539_v45 = vld [vmem:[#allocation5 + $0x1598] sm:$0xf0]  ;;  %v9670_v19 = vor.u32 %v10888_v28, %v9667_v46  ;;  %v10912_v41 = vld [vmem:[#allocation5 + $0x174c] sm:$0xf] }
 0x309   :  { %6064 = vmatpush.bf16.msrb.mxu2 %v9718_v50  ;;  %6033 = vmatmul.bf16.vlgmr.msra.gmra.mxu3 %v11364_v49  ;;  %v9414_v49 = vor.u32 %v10824_v30, %v9411_v37  ;;  %v9542_v35 = vor.u32 %v10856_v33, %v9539_v45  ;;  %v9379_v48 = vld [vmem:[#allocation5 + $0x1458] sm:$0xf0]  ;;  %v10848_v50 = vld [vmem:[#allocation5 + $0x154c] sm:$0xf] }
 0x30a   :  { %6077 = vmatpush.bf16.msrb.mxu3 %v9846_v52  ;;  %v10880_v52 = vld [vmem:[#allocation5 + $0x164c] sm:$0xf]  ;;  %v9635_v17 = vld [vmem:[#allocation5 + $0x1658] sm:$0xf0]  ;;  %v9510_v61 = vor.u32 %v10848_v50, %v9507_v51 }
 0x30b   :  { %6039 = vmatpush.bf16.msrb.mxu0 %v9446_v53  ;;  %v5813_v15 = vpop.f32.mrf.mxu2  ;;  %v9763_v59 = vld [vmem:[#allocation5 + $0x1758] sm:$0xf0]  ;;  %v9382_v53 = vor.u32 %v10816_v47, %v9379_v48  ;;  %v9638_v0 = vor.u32 %v10880_v52, %v9635_v17  ;;  %v10812_v2 = vld [vmem:[#allocation5 + $0x142c] sm:$0xf]  ;;  %v10025_v48 = vld [vmem:[#allocation8 + $0x160] sm:$0xf] }
 0x30c   :  { %6052 = vmatpush.bf16.msrb.mxu1 %v9574_v44  ;;  %v5814_v57 = vadd.f32 %v5813_v15, %v5801_v39  ;;  %v5826_v58 = vpop.f32.mrf.mxu3  ;;  %v10844_v3 = vld [vmem:[#allocation5 + $0x152c] sm:$0xf]  ;;  %v5802_v4 = vpop.f32.mrf.mxu1  ;;  %v9766_v26 = vor.u32 %v10912_v41, %v9763_v59  ;;  %v9491_v36 = vld [vmem:[#allocation5 + $0x1538] sm:$0xf0]  ;;  %v9889_v52 = vld [vmem:[#allocation8 + $0x50] sm:$0xf] }
 0x30d   :  { %6065 = vmatpush.bf16.msrb.mxu2 %v9702_v60  ;;  %v5789_v60 = vpop.f32.mrf.mxu0  ;;  %v10876_v29 = vld [vmem:[#allocation5 + $0x162c] sm:$0xf]  ;;  %v9347_v33 = vld [vmem:[#allocation5 + $0x1418] sm:$0xf0]  ;;  %v9494_v18 = vor.u32 %v10844_v3, %v9491_v36  ;;  %v10017_v41 = vld [vmem:[#allocation8 + $0x150] sm:$0xf] }
 0x30e   :  { %6078 = vmatpush.bf16.msrb.mxu3 %v9830_v25  ;;  %v11501_v44 = vadd.f32 %v5826_v58, %v5814_v57  ;;  %v9363_v25 = vld [vmem:[#allocation5 + $0x1438] sm:$0xf0]  ;;  %v10908_v30 = vld [vmem:[#allocation5 + $0x172c] sm:$0xf]  ;;  %v9953_v57 = vld [vmem:[#allocation8 + $0xd0] sm:$0xf] }
 0x30f   :  { %6040 = vmatpush.bf16.msrb.mxu0 %v9430_v55  ;;  %v9619_v55 = vld [vmem:[#allocation5 + $0x1638] sm:$0xf0]  ;;  %v10808_v37 = vld [vmem:[#allocation5 + $0x140c] sm:$0xf] }
 0x310   :  { %6053 = vmatpush.bf16.msrb.mxu1 %v9558_v56  ;;  %v9747_v56 = vld [vmem:[#allocation5 + $0x1738] sm:$0xf0]  ;;  %v9622_v8 = vor.u32 %v10876_v29, %v9619_v55  ;;  %v10872_v28 = vld [vmem:[#allocation5 + $0x160c] sm:$0xf]  ;;  %v9350_v1 = vor.u32 %v10808_v37, %v9347_v33  ;;  %v9937_v55 = vld [vmem:[#allocation8 + $0xb0] sm:$0xf] }
 0x311   :  { %6066 = vmatpush.bf16.msrb.mxu2 %v9686_v23  ;;  %v9366_v23 = vor.u32 %v10812_v2, %v9363_v25  ;;  %v9475_v45 = vld [vmem:[#allocation5 + $0x1518] sm:$0xf0]  ;;  %v9750_v9 = vor.u32 %v10908_v30, %v9747_v56  ;;  %v10964_v47 = vld [vmem:[#allocation8 + $0xe4] sm:$0xf0]  ;;  %v9945_v25 = vld [vmem:[#allocation8 + $0xc0] sm:$0xf] }
 0x312   :  { %6079 = vmatpush.bf16.msrb.mxu3 %v9814_v5  ;;  %v10840_v5 = vld [vmem:[#allocation5 + $0x150c] sm:$0xf]  ;;  %v9603_v31 = vld [vmem:[#allocation5 + $0x1618] sm:$0xf0]  ;;  %v10001_v37 = vld [vmem:[#allocation8 + $0x130] sm:$0xf] }
 0x313   :  { %6041 = vmatpush.bf16.msrb.mxu0 %v9414_v49  ;;  %v5815_v46 = vpop.f32.mrf.mxu2  ;;  %v10904_v49 = vld [vmem:[#allocation5 + $0x170c] sm:$0xf]  ;;  %v9731_v10 = vld [vmem:[#allocation5 + $0x1718] sm:$0xf0]  ;;  %v9478_v24 = vor.u32 %v10840_v5, %v9475_v45  ;;  %v9606_v27 = vor.u32 %v10872_v28, %v9603_v31  ;;  %v9865_v28 = vld [vmem:[#allocation8 + $0x20] sm:$0xf] }
 0x314   :  { %6054 = vmatpush.bf16.msrb.mxu1 %v9542_v35  ;;  %v5828_v35 = vpop.f32.mrf.mxu3  ;;  %v10950_v13 = vld [vmem:[#allocation8 + $0x74] sm:$0xf0]  ;;  %v9734_v32 = vor.u32 %v10904_v49, %v9731_v10  ;;  %v10980_v50 = vld [vmem:[#allocation8 + $0x164] sm:$0xf0]  ;;  %v9993_v10 = vld [vmem:[#allocation8 + $0x120] sm:$0xf] }
 0x315   :  { %6067 = vmatpush.bf16.msrb.mxu2 %v9670_v19  ;;  %v9905_v19 = vld [vmem:[#allocation8 + $0x70] sm:$0xf]  ;;  %v10966_v22 = vld [vmem:[#allocation8 + $0xf4] sm:$0xf0]  ;;  %v10026_v51 = vor.u32 %v10980_v50, %v10025_v48  ;;  %v10944_v2 = vld [vmem:[#allocation8 + $0x44] sm:$0xf0] }
 0x316   :  { %6080 = vmatpush.bf16.msrb.mxu3 %v9798_v63  ;;  %v10982_v63 = vld [vmem:[#allocation8 + $0x174] sm:$0xf0]  ;;  %v9906_v14 = vor.u32 %v10950_v13, %v9905_v19  ;;  %v9970_v34 = vor.u32 %v10966_v22, %v9969_v20  ;;  %v10960_v3 = vld [vmem:[#allocation8 + $0xc4] sm:$0xf0]  ;;  %v9913_v50 = vld [vmem:[#allocation8 + $0x80] sm:$0xf] }
 0x317   :  { %6042 = vmatpush.bf16.msrb.mxu0 %v9398_v40  ;;  %v10034_v39 = vor.u32 %v10982_v63, %v10033_v21  ;;  %v9897_v40 = vld [vmem:[#allocation8 + $0x60] sm:$0xf]  ;;  %v10946_v17 = vld [vmem:[#allocation8 + $0x54] sm:$0xf0]  ;;  %v10976_v4 = vld [vmem:[#allocation8 + $0x144] sm:$0xf0] }
 0x318   :  { %6055 = vmatpush.bf16.msrb.mxu1 %v9526_v6  ;;  %v10948_v6 = vld [vmem:[#allocation8 + $0x64] sm:$0xf0]  ;;  %v10962_v58 = vld [vmem:[#allocation8 + $0xd4] sm:$0xf0]  ;;  %v9857_v63 = vld [vmem:[#allocation8 + $0x10] sm:$0xf] }
 0x319   :  { %6068 = vmatpush.bf16.msrb.mxu2 %v9654_v42  ;;  %v9961_v42 = vld [vmem:[#allocation8 + $0xe0] sm:$0xf]  ;;  %v9898_v15 = vor.u32 %v10948_v6, %v9897_v40  ;;  %v10978_v59 = vld [vmem:[#allocation8 + $0x154] sm:$0xf0]  ;;  %v9954_v60 = vor.u32 %v10962_v58, %v9953_v57  ;;  %v10940_v46 = vld [vmem:[#allocation8 + $0x24] sm:$0xf0] }
 0x31a   :  { %6081 = vmatpush.bf16.msrb.mxu3 %v9782_v38  ;;  %v9962_v38 = vor.u32 %v10964_v47, %v9961_v42  ;;  %v10942_v29 = vld [vmem:[#allocation8 + $0x34] sm:$0xf0]  ;;  %v10956_v49 = vld [vmem:[#allocation8 + $0xa4] sm:$0xf0]  ;;  %v9866_v13 = vor.u32 %v10940_v46, %v9865_v28  ;;  %v9849_v6 = vld [vmem:[#allocation8] sm:$0xf] }
 0x31b   :  { %6043 = vmatpush.bf16.msrb.mxu0 %v9382_v53  ;;  %v9890_v53 = vor.u32 %v10946_v17, %v9889_v52  ;;  %v10974_v33 = vld [vmem:[#allocation8 + $0x134] sm:$0xf0]  ;;  %v10972_v35 = vld [vmem:[#allocation8 + $0x124] sm:$0xf0]  ;;  %v10949_v17 = vld [vmem:[#allocation8 + $0x74] sm:$0xf] }
 0x31c   :  { %6056 = vmatpush.bf16.msrb.mxu1 %v9510_v61  ;;  %v10018_v61 = vor.u32 %v10978_v59, %v10017_v41  ;;  %v10002_v45 = vor.u32 %v10974_v33, %v10001_v37  ;;  %v9994_v21 = vor.u32 %v10972_v35, %v9993_v10  ;;  %v10936_v48 = vld [vmem:[#allocation8 + $0x4] sm:$0xf0]  ;;  %v9907_v58 = vld [vmem:[#allocation8 + $0x78] sm:$0xf0]  ;;  %v10965_v41 = vld [vmem:[#allocation8 + $0xf4] sm:$0xf] }
 0x31d   :  { %6069 = vmatpush.bf16.msrb.mxu2 %v9638_v0  ;;  %v9881_v0 = vld [vmem:[#allocation8 + $0x40] sm:$0xf]  ;;  %v10968_v52 = vld [vmem:[#allocation8 + $0x104] sm:$0xf0]  ;;  %v9971_v59 = vld [vmem:[#allocation8 + $0xf8] sm:$0xf0] }
 0x31e   :  { %6082 = vmatpush.bf16.msrb.mxu3 %v9766_v26  ;;  %v10945_v37 = vld [vmem:[#allocation8 + $0x54] sm:$0xf]  ;;  %v10019_v28 = vld [vmem:[#allocation8 + $0x158] sm:$0xf0]  ;;  %v9883_v10 = vld [vmem:[#allocation8 + $0x48] sm:$0xf0] }
 0x31f   :  { %6044 = vmatpush.bf16.msrb.mxu0 %v9366_v23  ;;  %v10958_v23 = vld [vmem:[#allocation8 + $0xb4] sm:$0xf0]  ;;  %v10959_v35 = vld [vmem:[#allocation8 + $0xc4] sm:$0xf] }
 0x320   :  { %6057 = vmatpush.bf16.msrb.mxu1 %v9494_v18  ;;  %v9938_v5 = vor.u32 %v10958_v23, %v9937_v55  ;;  %v10979_v55 = vld [vmem:[#allocation8 + $0x164] sm:$0xf] }
 0x321   :  { %6070 = vmatpush.bf16.msrb.mxu2 %v9622_v8 }
 0x322   :  { %6083 = vmatpush.bf16.msrb.mxu3 %v9750_v9  ;;  %v9929_v9 = vld [vmem:[#allocation8 + $0xa0] sm:$0xf] }
 0x323   :  { %6045 = vmatpush.bf16.msrb.mxu0 %v9350_v1  ;;  %v5839_v26 = vpop.f32.mrf.mxu0  ;;  %v9930_v22 = vor.u32 %v10956_v49, %v9929_v9 }
 0x324   :  { %6058 = vmatpush.bf16.msrb.mxu1 %v9478_v24  ;;  %v5840_v30 = vadd.f32 %v5839_v26, %v11501_v44  ;;  %v5852_v56 = vpop.f32.mrf.mxu1  ;;  %v10938_v24 = vld [vmem:[#allocation8 + $0x14] sm:$0xf0]  ;;  %v10947_v26 = vld [vmem:[#allocation8 + $0x64] sm:$0xf] }
 0x325   :  { %6071 = vmatpush.bf16.msrb.mxu2 %v9606_v27  ;;  %v9921_v27 = vld [vmem:[#allocation8 + $0x90] sm:$0xf]  ;;  %v9858_v40 = vor.u32 %v10938_v24, %v9857_v63 }
 0x326   :  { %6084 = vmatpush.bf16.msrb.mxu3 %v9734_v32  ;;  %6046 = vmatmul.bf16.vlgmr.msrb.gmra.mxu0 %v11372_v7  ;;  %v10009_v7 = vld [vmem:[#allocation8 + $0x140] sm:$0xf]  ;;  %v5853_v18 = vadd.f32 %v5852_v56, %v5840_v30  ;;  %v10027_v30 = vld [vmem:[#allocation8 + $0x168] sm:$0xf0] }
 0x327   :  { %6488 = vmatpush.bf16.msra.mxu0 %v9906_v14  ;;  %6059 = vmatmul.bf16.vlgmr.msrb.gmra.mxu1 %v11376_v12  ;;  %v9882_v12 = vor.u32 %v10944_v2, %v9881_v0  ;;  %v10010_v36 = vor.u32 %v10976_v4, %v10009_v7  ;;  %v10954_v14 = vld [vmem:[#allocation8 + $0x94] sm:$0xf0]  ;;  %v6090_v0 = vmax.f32 %v11413_v54, 0.0  ;;  %v6091_v2 = vmax.f32 %v11454_v43, 0.0 }
 0x328   :  { %6501 = vmatpush.bf16.msra.mxu1 %v9970_v34  ;;  %6072 = vmatmul.bf16.vlgmr.msrb.gmra.mxu2 %v11374_v11  ;;  %v9946_v11 = vor.u32 %v10960_v3, %v9945_v25  ;;  %v9985_v34 = vld [vmem:[#allocation8 + $0x110] sm:$0xf]  ;;  %v9922_v42 = vor.u32 %v10954_v14, %v9921_v27  ;;  %v6092_v7 = vmax.f32 %v11495_v62, 0.0  ;;  %v9910_v4 = vor.u32 %v10949_v17, %v9907_v58  ;;  %v10941_v27 = vld [vmem:[#allocation8 + $0x34] sm:$0xf] }
 0x329   :  { %6514 = vmatpush.bf16.msra.mxu2 %v10034_v39  ;;  %6085 = vmatmul.bf16.vlgmr.msrb.gmra.mxu3 %v11378_v16  ;;  %v9873_v16 = vld [vmem:[#allocation8 + $0x30] sm:$0xf]  ;;  %v10970_v39 = vld [vmem:[#allocation8 + $0x114] sm:$0xf0]  ;;  %v11513_v56 = vpack.c.bf16 %v6090_v0, %v6090_v0  ;;  %v11515_v54 = vpack.c.bf16 %v6091_v2, %v6091_v2  ;;  %v10030_v33 = vor.u32 %v10979_v55, %v10027_v30  ;;  %v9875_v14 = vld [vmem:[#allocation8 + $0x38] sm:$0xf0] }
 0x32a   :  { %v9874_v8 = vor.u32 %v10942_v29, %v9873_v16  ;;  %v9986_v47 = vor.u32 %v10970_v39, %v9985_v34  ;;  %v10963_v16 = vld [vmem:[#allocation8 + $0xe4] sm:$0xf]  ;;  %v9963_v29 = vld [vmem:[#allocation8 + $0xe8] sm:$0xf0]  ;;  %v11517_v43 = vpack.c.bf16 %v6092_v7, %v6092_v7  ;;  %v10957_v34 = vld [vmem:[#allocation8 + $0xb4] sm:$0xf] }
 0x32b   :  { %6489 = vmatpush.bf16.msra.mxu0 %v9898_v15  ;;  %v5865_v31 = vpop.f32.mrf.mxu2  ;;  %v5841_v1 = vpop.f32.mrf.mxu0  ;;  %v10952_v15 = vld [vmem:[#allocation8 + $0x84] sm:$0xf0]  ;;  %v9966_v23 = vor.u32 %v10963_v16, %v9963_v29  ;;  %v9939_v39 = vld [vmem:[#allocation8 + $0xb8] sm:$0xf0]  ;;  %v10971_v17 = vld [vmem:[#allocation8 + $0x124] sm:$0xf] }
 0x32c   :  { %6502 = vmatpush.bf16.msra.mxu1 %v9962_v38  ;;  %v5866_v19 = vadd.f32 %v5865_v31, %v5853_v18  ;;  %v5878_v44 = vpop.f32.mrf.mxu3  ;;  %v5854_v32 = vpop.f32.mrf.mxu1  ;;  %v9914_v25 = vor.u32 %v10952_v15, %v9913_v50  ;;  %v9891_v18 = vld [vmem:[#allocation8 + $0x58] sm:$0xf0]  ;;  %v10943_v31 = vld [vmem:[#allocation8 + $0x44] sm:$0xf]  ;;  %v10953_v7 = vld [vmem:[#allocation8 + $0x94] sm:$0xf] }
 0x32d   :  { %6515 = vmatpush.bf16.msra.mxu2 %v10026_v51  ;;  %v9977_v51 = vld [vmem:[#allocation8 + $0x100] sm:$0xf]  ;;  %v9894_v46 = vor.u32 %v10945_v37, %v9891_v18  ;;  %v10939_v50 = vld [vmem:[#allocation8 + $0x24] sm:$0xf]  ;;  %v9851_v55 = vld [vmem:[#allocation8 + $0x8] sm:$0xf0] }
 0x32e   :  { %v11508_v20 = vadd.f32 %v5878_v44, %v5866_v19  ;;  %v9978_v3 = vor.u32 %v10968_v52, %v9977_v51  ;;  %v9947_v19 = vld [vmem:[#allocation8 + $0xc8] sm:$0xf0]  ;;  %v10975_v44 = vld [vmem:[#allocation8 + $0x144] sm:$0xf] }
 0x32f   :  { %6490 = vmatpush.bf16.msra.mxu0 %v9890_v53  ;;  %v9850_v53 = vor.u32 %v10936_v48, %v9849_v6  ;;  %v9950_v63 = vor.u32 %v10959_v35, %v9947_v19  ;;  %v10973_v6 = vld [vmem:[#allocation8 + $0x134] sm:$0xf]  ;;  %v9942_v48 = vor.u32 %v10957_v34, %v9939_v39  ;;  %v9931_v51 = vld [vmem:[#allocation8 + $0xa8] sm:$0xf0]  ;;  %v10935_v16 = vld [vmem:[#allocation8 + $0x4] sm:$0xf] }
 0x330   :  { %6503 = vmatpush.bf16.msra.mxu1 %v9954_v60  ;;  %v10981_v60 = vld [vmem:[#allocation8 + $0x174] sm:$0xf]  ;;  %v10951_v30 = vld [vmem:[#allocation8 + $0x84] sm:$0xf]  ;;  %v9979_v37 = vld [vmem:[#allocation8 + $0x108] sm:$0xf0] }
 0x331   :  { %6516 = vmatpush.bf16.msra.mxu2 %v10018_v61  ;;  %v10035_v61 = vld [vmem:[#allocation8 + $0x178] sm:$0xf0]  ;;  %v10996_v35 = vld [vmem:[#allocation8 + $0x1e4] sm:$0xf0]  ;;  %v10057_v34 = vld [vmem:[#allocation8 + $0x1a0] sm:$0xf] }
 0x332   :  { %v10988_v39 = vld [vmem:[#allocation8 + $0x1a4] sm:$0xf0] }
 0x333   :  { %6491 = vmatpush.bf16.msra.mxu0 %v9882_v12  ;;  %v5867_v38 = vpop.f32.mrf.mxu2  ;;  %v9974_v12 = vor.u32 %v10965_v41, %v9971_v59 }
 0x334   :  { %6504 = vmatpush.bf16.msra.mxu1 %v9946_v11  ;;  %v5880_v57 = vpop.f32.mrf.mxu3  ;;  %v10038_v11 = vor.u32 %v10981_v60, %v10035_v61  ;;  %v10955_v38 = vld [vmem:[#allocation8 + $0xa4] sm:$0xf]  ;;  %v10937_v61 = vld [vmem:[#allocation8 + $0x14] sm:$0xf] }
 0x335   :  { %6517 = vmatpush.bf16.msra.mxu2 %v10010_v36  ;;  %v9899_v36 = vld [vmem:[#allocation8 + $0x68] sm:$0xf0]  ;;  %v9934_v60 = vor.u32 %v10955_v38, %v9931_v51  ;;  %v10997_v51 = vld [vmem:[#allocation8 + $0x1f4] sm:$0xf] }
 0x336   :  { %v9902_v62 = vor.u32 %v10947_v26, %v9899_v36  ;;  %v9995_v57 = vld [vmem:[#allocation8 + $0x128] sm:$0xf0]  ;;  %v9987_v26 = vld [vmem:[#allocation8 + $0x118] sm:$0xf0] }
 0x337   :  { %6492 = vmatpush.bf16.msra.mxu0 %v9874_v8  ;;  %v10961_v8 = vld [vmem:[#allocation8 + $0xd4] sm:$0xf] }
 0x338   :  { %6505 = vmatpush.bf16.msra.mxu1 %v9938_v5  ;;  %v9955_v5 = vld [vmem:[#allocation8 + $0xd8] sm:$0xf0] }
 0x339   :  { %6518 = vmatpush.bf16.msra.mxu2 %v10002_v45  ;;  %v10977_v45 = vld [vmem:[#allocation8 + $0x154] sm:$0xf]  ;;  %v9958_v9 = vor.u32 %v10961_v8, %v9955_v5  ;;  %v9854_v8 = vor.u32 %v10935_v16, %v9851_v55  ;;  %v10067_v55 = vld [vmem:[#allocation8 + $0x1b8] sm:$0xf0] }
 0x33a   :  { %v10022_v49 = vor.u32 %v10977_v45, %v10019_v28  ;;  %v10097_v28 = vld [vmem:[#allocation8 + $0x1f0] sm:$0xf] }
 0x33b   :  { %6493 = vmatpush.bf16.msra.mxu0 %v9866_v13  ;;  %v10011_v13 = vld [vmem:[#allocation8 + $0x148] sm:$0xf0] }
 0x33c   :  { %6506 = vmatpush.bf16.msra.mxu1 %v9930_v22  ;;  %v10014_v32 = vor.u32 %v10975_v44, %v10011_v13  ;;  %v10081_v44 = vld [vmem:[#allocation8 + $0x1d0] sm:$0xf]  ;;  %v10994_v13 = vld [vmem:[#allocation8 + $0x1d4] sm:$0xf0] }
 0x33d   :  { %6519 = vmatpush.bf16.msra.mxu2 %v9994_v21  ;;  %v9886_v21 = vor.u32 %v10943_v31, %v9883_v10  ;;  %v10089_v10 = vld [vmem:[#allocation8 + $0x1e0] sm:$0xf] }
 0x33e   :  { %v10090_v19 = vor.u32 %v10996_v35, %v10089_v10 }
 0x33f   :  { %6494 = vmatpush.bf16.msra.mxu0 %v9858_v40 }
 0x340   :  { %6507 = vmatpush.bf16.msra.mxu1 %v9922_v42  ;;  %v10003_v42 = vld [vmem:[#allocation8 + $0x138] sm:$0xf0] }
 0x341   :  { %6520 = vmatpush.bf16.msra.mxu2 %v9986_v47  ;;  %v9878_v47 = vor.u32 %v10941_v27, %v9875_v14  ;;  %v10006_v15 = vor.u32 %v10973_v6, %v10003_v42  ;;  %v10065_v27 = vld [vmem:[#allocation8 + $0x1b0] sm:$0xf]  ;;  %v10058_v42 = vor.u32 %v10988_v39, %v10057_v34  ;;  %v6162_v39 = vld [vmem:[#allocation10] sm:$0x3] }
 0x343   :  { %6495 = vmatpush.bf16.msra.mxu0 %v9850_v53  ;;  %v5891_v1 = vpop.f32.mrf.mxu0 }
 0x344   :  { %6508 = vmatpush.bf16.msra.mxu1 %v9914_v25  ;;  %v5892_v22 = vadd.f32 %v5891_v1, %v11508_v20  ;;  %v5904_v24 = vpop.f32.mrf.mxu1  ;;  %v9867_v20 = vld [vmem:[#allocation8 + $0x28] sm:$0xf0]  ;;  %v9998_v25 = vor.u32 %v10971_v17, %v9995_v57 }
 0x345   :  { %6521 = vmatpush.bf16.msra.mxu2 %v9978_v3  ;;  %v9870_v53 = vor.u32 %v10939_v50, %v9867_v20  ;;  %v9859_v3 = vld [vmem:[#allocation8 + $0x18] sm:$0xf0]  ;;  %v10984_v20 = vld [vmem:[#allocation8 + $0x184] sm:$0xf0] }
 0x346   :  { %6496 = vmatmul.bf16.vlgmr.msra.gmra.mxu0 %v11513_v56  ;;  %v5905_v40 = vadd.f32 %v5904_v24, %v5892_v22  ;;  %v10082_v22 = vor.u32 %v10994_v13, %v10081_v44 }
 0x347   :  { %6540 = vmatpush.bf16.msrb.mxu0 %v9910_v4  ;;  %6509 = vmatmul.bf16.vlgmr.msra.gmra.mxu1 %v11515_v54  ;;  %v9923_v4 = vld [vmem:[#allocation8 + $0x98] sm:$0xf0] }
 0x348   :  { %6553 = vmatpush.bf16.msrb.mxu1 %v9974_v12  ;;  %6522 = vmatmul.bf16.vlgmr.msra.gmra.mxu2 %v11517_v43  ;;  %v10969_v12 = vld [vmem:[#allocation8 + $0x114] sm:$0xf]  ;;  %v9926_v36 = vor.u32 %v10953_v7, %v9923_v4 }
 0x349   :  { %6566 = vmatpush.bf16.msrb.mxu2 %v10038_v11  ;;  %v9862_v11 = vor.u32 %v10937_v61, %v9859_v3  ;;  %v9990_v29 = vor.u32 %v10969_v12, %v9987_v26  ;;  %v10083_v61 = vld [vmem:[#allocation8 + $0x1d8] sm:$0xf0]  ;;  %v10991_v26 = vld [vmem:[#allocation8 + $0x1c4] sm:$0xf] }
 0x34b   :  { %6541 = vmatpush.bf16.msrb.mxu0 %v9902_v62  ;;  %v5917_v52 = vpop.f32.mrf.mxu2  ;;  %v5893_v59 = vpop.f32.mrf.mxu0  ;;  %v9915_v62 = vld [vmem:[#allocation8 + $0x88] sm:$0xf0] }
 0x34c   :  { %6554 = vmatpush.bf16.msrb.mxu1 %v9966_v23  ;;  %v5918_v58 = vadd.f32 %v5917_v52, %v5905_v40  ;;  %v5930_v41 = vpop.f32.mrf.mxu3  ;;  %v5906_v0 = vpop.f32.mrf.mxu1  ;;  %v10967_v23 = vld [vmem:[#allocation8 + $0x104] sm:$0xf]  ;;  %v9918_v5 = vor.u32 %v10951_v30, %v9915_v62  ;;  %v10099_v52 = vld [vmem:[#allocation8 + $0x1f8] sm:$0xf0]  ;;  %v10091_v59 = vld [vmem:[#allocation8 + $0x1e8] sm:$0xf0] }
 0x34d   :  { %6567 = vmatpush.bf16.msrb.mxu2 %v10030_v33  ;;  %v9982_v45 = vor.u32 %v10967_v23, %v9979_v37  ;;  %v10102_v17 = vor.u32 %v10997_v51, %v10099_v52  ;;  %v10987_v23 = vld [vmem:[#allocation8 + $0x1a4] sm:$0xf]  ;;  %v10059_v37 = vld [vmem:[#allocation8 + $0x1a8] sm:$0xf0]  ;;  %v11006_v51 = vld [vmem:[#allocation11 + $0x38] sm:$0xff] }
 0x34e   :  { %v11523_v2 = vadd.f32 %v5930_v41, %v5918_v58  ;;  %v10995_v41 = vld [vmem:[#allocation8 + $0x1e4] sm:$0xf]  ;;  %v11014_v52 = vld [vmem:[#allocation11 + $0x78] sm:$0xff] }
 0x34f   :  { %6542 = vmatpush.bf16.msrb.mxu0 %v9894_v46  ;;  %v10998_v46 = vld [vmem:[#allocation8 + $0x1f4] sm:$0xf0] }
 0x350   :  { %6555 = vmatpush.bf16.msrb.mxu1 %v9958_v9  ;;  %v10098_v9 = vor.u32 %v10998_v46, %v10097_v28 }
 0x351   :  { %6568 = vmatpush.bf16.msrb.mxu2 %v10022_v49 }
 0x352   :  { %6527 = vmatpush.bf16.msra.mxu3 %v10098_v9  ;;  %v10983_v9 = vld [vmem:[#allocation8 + $0x184] sm:$0xf] }
 0x353   :  { %6543 = vmatpush.bf16.msrb.mxu0 %v9886_v21  ;;  %v5919_v33 = vpop.f32.mrf.mxu2 }
 0x354   :  { %6556 = vmatpush.bf16.msrb.mxu1 %v9950_v63  ;;  %v5932_v18 = vpop.f32.mrf.mxu3  ;;  %v10073_v63 = vld [vmem:[#allocation8 + $0x1c0] sm:$0xf] }
 0x355   :  { %6569 = vmatpush.bf16.msrb.mxu2 %v10014_v32  ;;  %v10990_v32 = vld [vmem:[#allocation8 + $0x1b4] sm:$0xf0] }
 0x356   :  { %6528 = vmatpush.bf16.msra.mxu3 %v10090_v19  ;;  %v10066_v14 = vor.u32 %v10990_v32, %v10065_v27 }
 0x357   :  { %6544 = vmatpush.bf16.msrb.mxu0 %v9878_v47  ;;  %v10049_v47 = vld [vmem:[#allocation8 + $0x190] sm:$0xf] }
 0x358   :  { %6557 = vmatpush.bf16.msrb.mxu1 %v9942_v48  ;;  %v10986_v48 = vld [vmem:[#allocation8 + $0x194] sm:$0xf0] }
 0x359   :  { %6570 = vmatpush.bf16.msrb.mxu2 %v10006_v15  ;;  %v10050_v50 = vor.u32 %v10986_v48, %v10049_v47  ;;  %v10041_v15 = vld [vmem:[#allocation8 + $0x180] sm:$0xf] }
 0x35a   :  { %6529 = vmatpush.bf16.msra.mxu3 %v10082_v22  ;;  %v10042_v38 = vor.u32 %v10984_v20, %v10041_v15 }
 0x35b   :  { %6545 = vmatpush.bf16.msrb.mxu0 %v9870_v53  ;;  %v10094_v53 = vor.u32 %v10995_v41, %v10091_v59  ;;  %v11004_v41 = vld [vmem:[#allocation11 + $0x28] sm:$0xff]  ;;  %v11003_v59 = vld [vmem:[#allocation11 + $0x20] sm:$0xff] }
 0x35c   :  { %6558 = vmatpush.bf16.msrb.mxu1 %v9934_v60  ;;  %v10993_v60 = vld [vmem:[#allocation8 + $0x1d4] sm:$0xf] }
 0x35d   :  { %6571 = vmatpush.bf16.msrb.mxu2 %v9998_v25  ;;  %v10086_v0 = vor.u32 %v10993_v60, %v10083_v61  ;;  %v11002_v60 = vld [vmem:[#allocation11 + $0x18] sm:$0xff] }
 0x35f   :  { %6546 = vmatpush.bf16.msrb.mxu0 %v9862_v11  ;;  %v10075_v11 = vld [vmem:[#allocation8 + $0x1c8] sm:$0xf0] }
 0x360   :  { %6559 = vmatpush.bf16.msrb.mxu1 %v9926_v36  ;;  %v10078_v36 = vor.u32 %v10991_v26, %v10075_v11 }
 0x361   :  { %6572 = vmatpush.bf16.msrb.mxu2 %v9990_v29  ;;  %v10989_v29 = vld [vmem:[#allocation8 + $0x1b4] sm:$0xf] }
 0x362   :  { %v10070_v62 = vor.u32 %v10989_v29, %v10067_v55  ;;  %v11012_v29 = vld [vmem:[#allocation11 + $0x68] sm:$0xff]  ;;  %v10999_v55 = vld [vmem:[#allocation11] sm:$0xff] }
 0x363   :  { %6547 = vmatpush.bf16.msrb.mxu0 %v9854_v8  ;;  %v5943_v31 = vpop.f32.mrf.mxu0  ;;  %v10062_v8 = vor.u32 %v10987_v23, %v10059_v37  ;;  %v11009_v23 = vld [vmem:[#allocation11 + $0x50] sm:$0xff]  ;;  %v11008_v37 = vld [vmem:[#allocation11 + $0x48] sm:$0xff] }
 0x364   :  { %6560 = vmatpush.bf16.msrb.mxu1 %v9918_v5  ;;  %v5956_v49 = vpop.f32.mrf.mxu1  ;;  %v5944_v3 = vadd.f32 %v5943_v31, %v11523_v2  ;;  %v10985_v2 = vld [vmem:[#allocation8 + $0x194] sm:$0xf]  ;;  %v10051_v5 = vld [vmem:[#allocation8 + $0x198] sm:$0xf0]  ;;  %v10043_v31 = vld [vmem:[#allocation8 + $0x188] sm:$0xf0] }
 0x365   :  { %6573 = vmatpush.bf16.msrb.mxu2 %v9982_v45  ;;  %v10054_v46 = vor.u32 %v10985_v2, %v10051_v5  ;;  %v10046_v10 = vor.u32 %v10983_v9, %v10043_v31 }
 0x366   :  { %6548 = vmatmul.bf16.vlgmr.msrb.gmra.mxu0 %v11513_v56  ;;  %v5957_v16 = vadd.f32 %v5956_v49, %v5944_v3  ;;  %v11001_v3 = vld [vmem:[#allocation11 + $0x10] sm:$0xff] }
 0x367   :  { %6561 = vmatmul.bf16.vlgmr.msrb.gmra.mxu1 %v11515_v54  ;;  %v10992_v54 = vld [vmem:[#allocation8 + $0x1c4] sm:$0xf0]  ;;  %6728 = vmatpush.bf16.msra.mxu0 %v11006_v51 }
 0x368   :  { %6574 = vmatmul.bf16.vlgmr.msrb.gmra.mxu2 %v11517_v43  ;;  %v10074_v43 = vor.u32 %v10992_v54, %v10073_v63  ;;  %6741 = vmatpush.bf16.msra.mxu1 %v11014_v52 }
 0x36a   :  { %6530 = vmatpush.bf16.msra.mxu3 %v10074_v43 }
 0x36b   :  { %v5969_v1 = vpop.f32.mrf.mxu2  ;;  %v5945_v56 = vpop.f32.mrf.mxu0 }
 0x36c   :  { %v5982_v21 = vpop.f32.mrf.mxu3  ;;  %v5958_v24 = vpop.f32.mrf.mxu1  ;;  %v5970_v30 = vadd.f32 %v5969_v1, %v5957_v16  ;;  %v11000_v16 = vld [vmem:[#allocation11 + $0x8] sm:$0xff] }
 0x36e   :  { %6531 = vmatpush.bf16.msra.mxu3 %v10066_v14  ;;  %v5983_v45 = vadd.f32 %v5982_v21, %v5970_v30  ;;  %v11011_v30 = vld [vmem:[#allocation11 + $0x60] sm:$0xff] }
 0x372   :  { %6532 = vmatpush.bf16.msra.mxu3 %v10058_v42 }
 0x373   :  { %v5971_v40 = vpop.f32.mrf.mxu2 }
 0x374   :  { %v5984_v6 = vpop.f32.mrf.mxu3  ;;  %v6164_v40 = vperm.slane %v6162_v39, 0 }
 0x376   :  { %6533 = vmatpush.bf16.msra.mxu3 %v10050_v50 }
 0x37a   :  { %6534 = vmatpush.bf16.msra.mxu3 %v10042_v38 }
 0x37e   :  { %6579 = vmatpush.bf16.msrb.mxu3 %v10102_v17 }
 0x382   :  { %6580 = vmatpush.bf16.msrb.mxu3 %v10094_v53  ;;  %v6165_v53 = vperm.slane %v6162_v39, 1 }
 0x383   :  { %v5995_v57 = vpop.f32.mrf.mxu0 }
 0x384   :  { %v6008_v58 = vpop.f32.mrf.mxu1  ;;  %v5996_v28 = vadd.f32 %v5995_v57, %v5983_v45  ;;  %v11005_v57 = vld [vmem:[#allocation11 + $0x30] sm:$0xff] }
 0x385   :  { %6729 = vmatpush.bf16.msra.mxu0 %v11005_v57 }
 0x386   :  { %6581 = vmatpush.bf16.msrb.mxu3 %v10086_v0  ;;  %v6009_v49 = vadd.f32 %v6008_v58, %v5996_v28  ;;  %v11013_v58 = vld [vmem:[#allocation11 + $0x70] sm:$0xff] }
 0x387   :  { %6742 = vmatpush.bf16.msra.mxu1 %v11013_v58 }
 0x389   :  { %6730 = vmatpush.bf16.msra.mxu0 %v11004_v41 }
 0x38a   :  { %6582 = vmatpush.bf16.msrb.mxu3 %v10078_v36 }
 0x38b   :  { %v6021_v25 = vpop.f32.mrf.mxu2  ;;  %v5997_v4 = vpop.f32.mrf.mxu0  ;;  %6743 = vmatpush.bf16.msra.mxu1 %v11012_v29 }
 0x38c   :  { %v6034_v7 = vpop.f32.mrf.mxu3  ;;  %v6010_v12 = vpop.f32.mrf.mxu1  ;;  %v6022_v35 = vadd.f32 %v6021_v25, %v6009_v49 }
 0x38d   :  { %6731 = vmatpush.bf16.msra.mxu0 %v11003_v59 }
 0x38e   :  { %6583 = vmatpush.bf16.msrb.mxu3 %v10070_v62  ;;  %v6035_v19 = vadd.f32 %v6034_v7, %v6022_v35  ;;  %v11010_v62 = vld [vmem:[#allocation11 + $0x58] sm:$0xff] }
 0x38f   :  { %6744 = vmatpush.bf16.msra.mxu1 %v11011_v30 }
 0x391   :  { %6732 = vmatpush.bf16.msra.mxu0 %v11002_v60 }
 0x392   :  { %6584 = vmatpush.bf16.msrb.mxu3 %v10062_v8 }
 0x393   :  { %v6023_v33 = vpop.f32.mrf.mxu2  ;;  %6745 = vmatpush.bf16.msra.mxu1 %v11010_v62 }
 0x394   :  { %v6036_v18 = vpop.f32.mrf.mxu3  ;;  %v11007_v33 = vld [vmem:[#allocation11 + $0x40] sm:$0xff] }
 0x395   :  { %6733 = vmatpush.bf16.msra.mxu0 %v11001_v3 }
 0x396   :  { %6585 = vmatpush.bf16.msrb.mxu3 %v10054_v46 }
 0x397   :  { %6746 = vmatpush.bf16.msra.mxu1 %v11009_v23 }
 0x399   :  { %6734 = vmatpush.bf16.msra.mxu0 %v11000_v16 }
 0x39a   :  { %6586 = vmatpush.bf16.msrb.mxu3 %v10046_v10 }
 0x39b   :  { %6747 = vmatpush.bf16.msra.mxu1 %v11008_v37 }
 0x39d   :  { %6735 = vmatpush.bf16.msra.mxu0 %v10999_v55 }
 0x39f   :  { %6748 = vmatpush.bf16.msra.mxu1 %v11007_v33 }
 0x3a3   :  { %v6047_v44 = vpop.f32.mrf.mxu0 }
 0x3a4   :  { %v6060_v13 = vpop.f32.mrf.mxu1  ;;  %v6048_v1 = vadd.f32 %v6047_v44, %v6035_v19  ;;  %v11029_v19 = vld [vmem:[#allocation13] ss:$0 sm:$0xff] }
 0x3a6   :  { %v6061_v22 = vadd.f32 %v6060_v13, %v6048_v1 }
 0x3ab   :  { %v6073_v56 = vpop.f32.mrf.mxu2  ;;  %v6049_v24 = vpop.f32.mrf.mxu0 }
 0x3ac   :  { %v6086_v63 = vpop.f32.mrf.mxu3  ;;  %v6074_v54 = vadd.f32 %v6073_v56, %v6061_v22  ;;  %v6062_v21 = vpop.f32.mrf.mxu1 }
 0x3ae   :  { %v6087_v43 = vadd.f32 %v6086_v63, %v6074_v54 }
 0x3b0   :  { %v6093_v27 = vmax.f32 %v6087_v43, 0.0 }
 0x3b2   :  { %v6097_v32 = vpack.c.bf16 %v6093_v27, %v6093_v27 }
 0x3b3   :  { %v6075_v14 = vpop.f32.mrf.mxu2 }
 0x3b4   :  { %v6088_v34 = vpop.f32.mrf.mxu3  ;;  %6535 = vmatmul.bf16.vlgmr.msra.gmra.mxu3 %v6097_v32 }
 0x3c3   :  { %v6497_v6 = vpop.f32.mrf.mxu0 }
 0x3c4   :  { %v6498_v42 = vadd.f32 %v6497_v6, %v6164_v40  ;;  %v6510_v47 = vpop.f32.mrf.mxu1  ;;  %6587 = vmatmul.bf16.vlgmr.msrb.gmra.mxu3 %v6097_v32 }
 0x3c6   :  { %v6511_v48 = vadd.f32 %v6510_v47, %v6498_v42 }
 0x3cb   :  { %v6523_v50 = vpop.f32.mrf.mxu2  ;;  %v6499_v20 = vpop.f32.mrf.mxu0 }
 0x3cc   :  { %v6524_v15 = vadd.f32 %v6523_v50, %v6511_v48  ;;  %v6512_v38 = vpop.f32.mrf.mxu1 }
 0x3d3   :  { %v6525_v17 = vpop.f32.mrf.mxu2 }
 0x3e3   :  { %v6549_v61 = vpop.f32.mrf.mxu0 }
 0x3e4   :  { %v6562_v0 = vpop.f32.mrf.mxu1  ;;  %v6550_v25 = vadd.f32 %v6549_v61, %v6165_v53 }
 0x3e6   :  { %v6563_v7 = vadd.f32 %v6562_v0, %v6550_v25 }
 0x3eb   :  { %v6575_v4 = vpop.f32.mrf.mxu2  ;;  %v6551_v26 = vpop.f32.mrf.mxu0 }
 0x3ec   :  { %v6576_v12 = vadd.f32 %v6575_v4, %v6563_v7  ;;  %v6564_v11 = vpop.f32.mrf.mxu1 }
 0x3f3   :  { %v6577_v36 = vpop.f32.mrf.mxu2 }
 0x437   :  { %v6536_v18 = vpop.f32.mrf.mxu3 }
 0x438   :  { %v6537_v8 = vadd.f32 %v6536_v18, %v6524_v15 }
 0x43a   :  { %v6592_v2 = vmax.f32 %v6537_v8, 0.0 }
 0x43c   :  { %v6594_v5 = vpack.c.bf16 %v6592_v2, %v6592_v2 }
 0x43e   :  { %6736 = vmatmul.bf16.vlgmr.msra.gmra.mxu0 %v6594_v5 }
 0x43f   :  { %v6538_v45 = vpop.f32.mrf.mxu3 }
 0x447   :  { %v6588_v28 = vpop.f32.mrf.mxu3 }
 0x448   :  { %v6589_v46 = vadd.f32 %v6588_v28, %v6576_v12 }
 0x44a   :  { %v6593_v9 = vmax.f32 %v6589_v46, 0.0 }
 0x44c   :  { %v6595_v31 = vpack.c.bf16 %v6593_v9, %v6593_v9 }
 0x44e   :  { %6749 = vmatmul.bf16.vlgmr.msra.gmra.mxu1 %v6595_v31 }
 0x44f   :  { %v6590_v49 = vpop.f32.mrf.mxu3 }
 0x4bb   :  { %v6737_v10 = vpop.f32.mrf.mxu0 }
 0x4bc   :  { %v6738_v44 = vadd.f32 %v11029_v19, %v6737_v10 }
 0x4c3   :  { %v6739_v35 = vpop.f32.mrf.mxu0 }
 0x4cb   :  { %v6750_v13 = vpop.f32.mrf.mxu1 }
 0x4cc   :  { %v6751_v1 = vadd.f32 %v6750_v13, %v6738_v44 }
 0x4ce   :  { %6754 = vst [vmem:[#allocation14] sm:$0xff] %v6751_v1 }
 0x4cf   :  { %6765 = dma.vmem_to_hbm [thread:$0]  %s6761_s6, 128, %s6763_s15, [#allocation4]  }
 0x4d3   :  { %v6752_v22 = vpop.f32.mrf.mxu1 }
 0x4d4   :  { %11233 = dma.done.wait [#allocation4], 128  }
 0x4d5   :  { %11234 = vsyncadd [#allocation4], 4294967168 }
 0x4d6   :  { %6770 = vsyncpa [#allocation3], 1 }
 0x4d7   :  { %6771 = vsyncpa [#allocation6], 1 }
 0x4d8   :  { %6772 = vsyncpa [#allocation9], 1 }
 0x4d9   :  { %6773 = vsyncpa [#allocation12], 1 }
 0x4da   :  { %6774 = vsyncpa [#allocation4], 1 }

</bundles_post_ra>
